<compile_context>
chip_gen: v7x
topology: tpu7x:2x2x1
jax: 0.10.0
libtpu: 0.0.40
codegen_flags: <defaults>
</compile_context>

<pallas_src>
import numpy as np
import jax
import jax.numpy as jnp
from jax.experimental import pallas as pl
from jax.experimental.pallas import tpu as pltpu

IMG_SHAPE = (3, 32, 32)
LATENT_DIM = 100
LATENT_PAD = 128                       # latent zero-padded to lane width
IMG_FLAT = int(np.prod(IMG_SHAPE))     # 3072
HID = (128, 256, 512, 1024)
BN_EPS = 0.8                           # BatchNorm1d(C, 0.8): 0.8 is eps
LEAK = 0.2

NCORES = 2                             # leading grid axis (megacore on v7x)
TN = 768                               # head output-column tile
STEPS_PER_CORE = IMG_FLAT // (NCORES * TN)   # 2 column steps per core


def _leaky_relu(x):
    return jnp.where(x > 0, x, LEAK * x)


def _bn_train(x, gamma, beta):
    # Training-mode BatchNorm1d: batch mean, biased batch variance, eps=0.8.
    mean = jnp.mean(x, axis=0, keepdims=True)
    var = jnp.mean((x - mean) ** 2, axis=0, keepdims=True)
    return (x - mean) * jax.lax.rsqrt(var + BN_EPS) * gamma + beta


def gen_kernel(z_ref, w1_ref, b1_ref,
               w2_ref, g2_ref, be2_ref,
               w3_ref, g3_ref, be3_ref,
               w4_ref, g4_ref, be4_ref,
               w5_ref, b5_ref,
               out_ref, h4_ref):
    """Fused generator.  Grid = (core, column_step).

    The trunk (blocks 1-4, needs the whole batch because of batch-stat BN)
    runs once per core on its first column step into a bf16 VMEM scratch; all
    steps then compute one (B, TN) slab of the 1024->3072 head + tanh.
    Every matmul is bf16 x bf16 with f32 accumulation."""
    @pl.when(pl.program_id(1) == 0)
    def _():
        h = jnp.dot(z_ref[...], w1_ref[...],
                    preferred_element_type=jnp.float32) + b1_ref[...]
        h = _leaky_relu(h)
        # b2..b4 intentionally omitted: cancelled exactly by the BN batch mean.
        h = jnp.dot(h.astype(jnp.bfloat16), w2_ref[...],
                    preferred_element_type=jnp.float32)
        h = _leaky_relu(_bn_train(h, g2_ref[...], be2_ref[...]))
        h = jnp.dot(h.astype(jnp.bfloat16), w3_ref[...],
                    preferred_element_type=jnp.float32)
        h = _leaky_relu(_bn_train(h, g3_ref[...], be3_ref[...]))
        h = jnp.dot(h.astype(jnp.bfloat16), w4_ref[...],
                    preferred_element_type=jnp.float32)
        h = _leaky_relu(_bn_train(h, g4_ref[...], be4_ref[...]))
        h4_ref[...] = h.astype(jnp.bfloat16)

    # Output head: Linear(1024 -> TN slab) + Tanh on one streamed bf16 w5 tile.
    acc = jnp.dot(h4_ref[...], w5_ref[...],
                  preferred_element_type=jnp.float32) + b5_ref[...]
    out_ref[...] = jnp.tanh(acc)


def init_generator_params(key):
    """PyTorch-style init: Linear W,b ~ U(-1/sqrt(fan_in), 1/sqrt(fan_in));
    BatchNorm gamma=1, beta=0.  Weights stored (in, out) in bf16; small
    vectors (biases / BN affine) stay f32.  w1 is zero-padded to 128 rows."""
    dims = [LATENT_DIM, *HID, IMG_FLAT]
    keys = jax.random.split(key, 2 * (len(dims) - 1))
    params = {}
    for i in range(len(dims) - 1):
        fan_in, fan_out = dims[i], dims[i + 1]
        bound = 1.0 / np.sqrt(fan_in)
        w = jax.random.uniform(keys[2 * i], (fan_in, fan_out),
                               jnp.float32, -bound, bound)
        b = jax.random.uniform(keys[2 * i + 1], (1, fan_out),
                               jnp.float32, -bound, bound)
        if i == 0:  # pad latent 100 -> 128 with zero rows (math unchanged)
            w = jnp.pad(w, ((0, LATENT_PAD - LATENT_DIM), (0, 0)))
        params[f"w{i + 1}"] = w.astype(jnp.bfloat16)
        params[f"b{i + 1}"] = b
    for i, c in zip((2, 3, 4), HID[1:]):
        params[f"g{i}"] = jnp.ones((1, c), jnp.float32)
        params[f"be{i}"] = jnp.zeros((1, c), jnp.float32)
    return params


@jax.jit
def generator_forward(z, params):
    B = z.shape[0]
    z_pad = jnp.pad(z, ((0, 0), (0, LATENT_PAD - LATENT_DIM))).astype(jnp.bfloat16)

    def const(shape):
        # Whole-array block, constant index -> VMEM resident, no re-DMA.
        return pl.BlockSpec(shape, lambda i, j: (0, 0))

    def col(shape):
        # Streamed over the flattened (core, step) column-tile index.
        return pl.BlockSpec(shape, lambda i, j: (0, i * STEPS_PER_CORE + j))

    flat = pl.pallas_call(
        gen_kernel,
        out_shape=jax.ShapeDtypeStruct((B, IMG_FLAT), jnp.float32),
        grid=(NCORES, STEPS_PER_CORE),
        in_specs=[
            const((B, LATENT_PAD)),                               # z
            const((LATENT_PAD, HID[0])), const((1, HID[0])),      # w1, b1
            const((HID[0], HID[1])), const((1, HID[1])), const((1, HID[1])),  # w2,g2,be2
            const((HID[1], HID[2])), const((1, HID[2])), const((1, HID[2])),  # w3,g3,be3
            const((HID[2], HID[3])), const((1, HID[3])), const((1, HID[3])),  # w4,g4,be4
            col((HID[3], TN)),                                    # w5: streamed tiles
            col((1, TN)),                                         # b5
        ],
        out_specs=col((B, TN)),
        scratch_shapes=[pltpu.VMEM((B, HID[3]), jnp.bfloat16)],    # h4 (trunk out)
        compiler_params=pltpu.CompilerParams(
            # Leading axis shards across TensorCores on v7x (each core
            # recomputes the trunk at its own step 0); it is just a sequential
            # loop on single-TC v5e/v6e.  Inner axis carries the scratch dep.
            dimension_semantics=("parallel", "arbitrary"),
        ),
    )(z_pad,
      params["w1"], params["b1"],
      params["w2"], params["g2"], params["be2"],
      params["w3"], params["g3"], params["be3"],
      params["w4"], params["g4"], params["be4"],
      params["w5"], params["b5"])

    # Equivalent of PyTorch .view(B, *IMG_SHAPE): NCHW output.
    return flat.reshape(B, *IMG_SHAPE)


def _reference_forward(z, params):
    """Plain-JAX reference with full PyTorch semantics (including the pre-BN
    biases b2..b4, which the kernel omits because BN cancels them exactly),
    using the same bf16-operand / f32-accumulate precision recipe."""
    bf = jnp.bfloat16
    h_in = jnp.pad(z, ((0, 0), (0, LATENT_PAD - LATENT_DIM))).astype(bf)
    h = jnp.dot(h_in, params["w1"], preferred_element_type=jnp.float32) + params["b1"]
    h = jnp.where(h > 0, h, LEAK * h)
    for i in (2, 3, 4):
        h = jnp.dot(h.astype(bf), params[f"w{i}"],
                    preferred_element_type=jnp.float32) + params[f"b{i}"]
        mean = jnp.mean(h, axis=0, keepdims=True)
        var = jnp.mean((h - mean) ** 2, axis=0, keepdims=True)
        h = (h - mean) * jax.lax.rsqrt(var + BN_EPS) * params[f"g{i}"] + params[f"be{i}"]
        h = jnp.where(h > 0, h, LEAK * h)
    h = jnp.dot(h.astype(bf), params["w5"],
                preferred_element_type=jnp.float32) + params["b5"]
    return jnp.tanh(h).reshape(z.shape[0], *IMG_SHAPE)


if __name__ == "__main__":
    key = jax.random.PRNGKey(0)
    pkey, zkey = jax.random.split(key)
    params = init_generator_params(pkey)

    B = 8  # rows map onto the 8-sublane axis; BN uses batch stats over B
    z = jax.random.normal(zkey, (B, LATENT_DIM), jnp.float32)

    img = jax.block_until_ready(generator_forward(z, params))
    assert img.shape == (B, *IMG_SHAPE), img.shape

    ref = _reference_forward(z, params)
    np.testing.assert_allclose(np.asarray(img), np.asarray(ref),
                               rtol=5e-3, atol=5e-3)
    print("KERNEL_OK")
</pallas_src>

<mosaic_0001>
module attributes {stable_mosaic.version = 11 : i64} {
  func.func @gen_kernel(%arg0: i32, %arg1: i32, %arg2: memref<8x128xbf16, #tpu.memory_space<vmem>>, %arg3: memref<128x128xbf16, #tpu.memory_space<vmem>>, %arg4: memref<1x128xf32, #tpu.memory_space<vmem>>, %arg5: memref<128x256xbf16, #tpu.memory_space<vmem>>, %arg6: memref<1x256xf32, #tpu.memory_space<vmem>>, %arg7: memref<1x256xf32, #tpu.memory_space<vmem>>, %arg8: memref<256x512xbf16, #tpu.memory_space<vmem>>, %arg9: memref<1x512xf32, #tpu.memory_space<vmem>>, %arg10: memref<1x512xf32, #tpu.memory_space<vmem>>, %arg11: memref<512x1024xbf16, #tpu.memory_space<vmem>>, %arg12: memref<1x1024xf32, #tpu.memory_space<vmem>>, %arg13: memref<1x1024xf32, #tpu.memory_space<vmem>>, %arg14: memref<1024x768xbf16, #tpu.memory_space<vmem>>, %arg15: memref<1x768xf32, #tpu.memory_space<vmem>>, %arg16: memref<8x768xf32, #tpu.memory_space<vmem>>, %arg17: memref<8x1024xbf16, #tpu.memory_space<vmem>>) attributes {dimension_semantics = [#tpu.dimension_semantics<parallel>, #tpu.dimension_semantics<arbitrary>], iteration_bounds = array<i64: 2, 2>, scalar_prefetch = 0 : i64, scratch_operands = 1 : i64, tpu.core_type = #tpu.core_type<tc>, window_params = [{pipeline_mode = #tpu.pipeline_mode<synchronous>, transform_indices = @transform_0, window_bounds = array<i64: 8, 128>}, {pipeline_mode = #tpu.pipeline_mode<synchronous>, transform_indices = @transform_1, window_bounds = array<i64: 128, 128>}, {pipeline_mode = #tpu.pipeline_mode<synchronous>, transform_indices = @transform_2, window_bounds = array<i64: 1, 128>}, {pipeline_mode = #tpu.pipeline_mode<synchronous>, transform_indices = @transform_3, window_bounds = array<i64: 128, 256>}, {pipeline_mode = #tpu.pipeline_mode<synchronous>, transform_indices = @transform_4, window_bounds = array<i64: 1, 256>}, {pipeline_mode = #tpu.pipeline_mode<synchronous>, transform_indices = @transform_5, window_bounds = array<i64: 1, 256>}, {pipeline_mode = #tpu.pipeline_mode<synchronous>, transform_indices = @transform_6, window_bounds = array<i64: 256, 512>}, {pipeline_mode = #tpu.pipeline_mode<synchronous>, transform_indices = @transform_7, window_bounds = array<i64: 1, 512>}, {pipeline_mode = #tpu.pipeline_mode<synchronous>, transform_indices = @transform_8, window_bounds = array<i64: 1, 512>}, {pipeline_mode = #tpu.pipeline_mode<synchronous>, transform_indices = @transform_9, window_bounds = array<i64: 512, 1024>}, {pipeline_mode = #tpu.pipeline_mode<synchronous>, transform_indices = @transform_10, window_bounds = array<i64: 1, 1024>}, {pipeline_mode = #tpu.pipeline_mode<synchronous>, transform_indices = @transform_11, window_bounds = array<i64: 1, 1024>}, {transform_indices = @transform_12, window_bounds = array<i64: 1024, 768>}, {transform_indices = @transform_13, window_bounds = array<i64: 1, 768>}, {transform_indices = @transform_14, window_bounds = array<i64: 8, 768>}]} {
    %c0_i32 = arith.constant 0 : i32
    %0 = arith.cmpi eq, %arg1, %c0_i32 : i32
    %1 = arith.extui %0 : i1 to i32
    %c0_i32_0 = arith.constant 0 : i32
    %2 = arith.cmpi ne, %1, %c0_i32_0 : i32
    scf.if %2 {
      %c0_8 = arith.constant 0 : index
      %c0_9 = arith.constant 0 : index
      %11 = vector.load %arg2[%c0_8, %c0_9] : memref<8x128xbf16, #tpu.memory_space<vmem>>, vector<8x128xbf16>
      %c0_10 = arith.constant 0 : index
      %c0_11 = arith.constant 0 : index
      %12 = vector.load %arg3[%c0_10, %c0_11] : memref<128x128xbf16, #tpu.memory_space<vmem>>, vector<128x128xbf16>
      %cst_12 = arith.constant dense<0.000000e+00> : vector<8x128xf32>
      %13 = tpu.matmul %11, %12, %cst_12 {dimension_numbers = #tpu.dot_dimension_numbers<[1], [0], [0], [1], [0, 0, 1, 1], [], []>} : vector<8x128xbf16>, vector<128x128xbf16>, vector<8x128xf32> -> vector<8x128xf32>
      %c0_13 = arith.constant 0 : index
      %c0_14 = arith.constant 0 : index
      %14 = vector.load %arg4[%c0_13, %c0_14] : memref<1x128xf32, #tpu.memory_space<vmem>>, vector<1x128xf32>
      %15 = vector.broadcast %14 : vector<1x128xf32> to vector<8x128xf32>
      %16 = arith.addf %13, %15 : vector<8x128xf32>
      %cst_15 = arith.constant 0.000000e+00 : f32
      %17 = vector.broadcast %cst_15 : f32 to vector<8x128xf32>
      %18 = arith.cmpf ogt, %16, %17 : vector<8x128xf32>
      %cst_16 = arith.constant 2.000000e-01 : f32
      %19 = vector.broadcast %cst_16 : f32 to vector<8x128xf32>
      %20 = arith.mulf %19, %16 : vector<8x128xf32>
      %21 = arith.select %18, %16, %20 : vector<8x128xi1>, vector<8x128xf32>
      %22 = arith.truncf %21 : vector<8x128xf32> to vector<8x128xbf16>
      %c0_17 = arith.constant 0 : index
      %c0_18 = arith.constant 0 : index
      %23 = vector.load %arg5[%c0_17, %c0_18] : memref<128x256xbf16, #tpu.memory_space<vmem>>, vector<128x256xbf16>
      %cst_19 = arith.constant dense<0.000000e+00> : vector<8x256xf32>
      %24 = tpu.matmul %22, %23, %cst_19 {dimension_numbers = #tpu.dot_dimension_numbers<[1], [0], [0], [1], [0, 0, 1, 1], [], []>} : vector<8x128xbf16>, vector<128x256xbf16>, vector<8x256xf32> -> vector<8x256xf32>
      %c0_20 = arith.constant 0 : index
      %c0_21 = arith.constant 0 : index
      %25 = vector.load %arg6[%c0_20, %c0_21] : memref<1x256xf32, #tpu.memory_space<vmem>>, vector<1x256xf32>
      %c0_22 = arith.constant 0 : index
      %c0_23 = arith.constant 0 : index
      %26 = vector.load %arg7[%c0_22, %c0_23] : memref<1x256xf32, #tpu.memory_space<vmem>>, vector<1x256xf32>
      %cst_24 = arith.constant dense<0.000000e+00> : vector<256xf32>
      %27 = vector.multi_reduction <add>, %24, %cst_24 [0] : vector<8x256xf32> to vector<256xf32>
      %28 = vector.shape_cast %27 : vector<256xf32> to vector<1x256xf32>
      %cst_25 = arith.constant 8.000000e+00 : f32
      %29 = vector.broadcast %cst_25 : f32 to vector<1x256xf32>
      %30 = arith.divf %28, %29 : vector<1x256xf32>
      %31 = vector.broadcast %30 : vector<1x256xf32> to vector<8x256xf32>
      %32 = arith.subf %24, %31 : vector<8x256xf32>
      %33 = arith.mulf %32, %32 : vector<8x256xf32>
      %cst_26 = arith.constant dense<0.000000e+00> : vector<256xf32>
      %34 = vector.multi_reduction <add>, %33, %cst_26 [0] : vector<8x256xf32> to vector<256xf32>
      %35 = vector.shape_cast %34 : vector<256xf32> to vector<1x256xf32>
      %cst_27 = arith.constant 8.000000e+00 : f32
      %36 = vector.broadcast %cst_27 : f32 to vector<1x256xf32>
      %37 = arith.divf %35, %36 : vector<1x256xf32>
      %38 = vector.broadcast %30 : vector<1x256xf32> to vector<8x256xf32>
      %39 = arith.subf %24, %38 : vector<8x256xf32>
      %cst_28 = arith.constant 8.000000e-01 : f32
      %40 = vector.broadcast %cst_28 : f32 to vector<1x256xf32>
      %41 = arith.addf %37, %40 : vector<1x256xf32>
      %42 = math.rsqrt %41 : vector<1x256xf32>
      %43 = vector.broadcast %42 : vector<1x256xf32> to vector<8x256xf32>
      %44 = arith.mulf %39, %43 : vector<8x256xf32>
      %45 = vector.broadcast %25 : vector<1x256xf32> to vector<8x256xf32>
      %46 = arith.mulf %44, %45 : vector<8x256xf32>
      %47 = vector.broadcast %26 : vector<1x256xf32> to vector<8x256xf32>
      %48 = arith.addf %46, %47 : vector<8x256xf32>
      %cst_29 = arith.constant 0.000000e+00 : f32
      %49 = vector.broadcast %cst_29 : f32 to vector<8x256xf32>
      %50 = arith.cmpf ogt, %48, %49 : vector<8x256xf32>
      %cst_30 = arith.constant 2.000000e-01 : f32
      %51 = vector.broadcast %cst_30 : f32 to vector<8x256xf32>
      %52 = arith.mulf %51, %48 : vector<8x256xf32>
      %53 = arith.select %50, %48, %52 : vector<8x256xi1>, vector<8x256xf32>
      %54 = arith.truncf %53 : vector<8x256xf32> to vector<8x256xbf16>
      %c0_31 = arith.constant 0 : index
      %c0_32 = arith.constant 0 : index
      %55 = vector.load %arg8[%c0_31, %c0_32] : memref<256x512xbf16, #tpu.memory_space<vmem>>, vector<256x512xbf16>
      %cst_33 = arith.constant dense<0.000000e+00> : vector<8x512xf32>
      %56 = tpu.matmul %54, %55, %cst_33 {dimension_numbers = #tpu.dot_dimension_numbers<[1], [0], [0], [1], [0, 0, 1, 1], [], []>} : vector<8x256xbf16>, vector<256x512xbf16>, vector<8x512xf32> -> vector<8x512xf32>
      %c0_34 = arith.constant 0 : index
      %c0_35 = arith.constant 0 : index
      %57 = vector.load %arg9[%c0_34, %c0_35] : memref<1x512xf32, #tpu.memory_space<vmem>>, vector<1x512xf32>
      %c0_36 = arith.constant 0 : index
      %c0_37 = arith.constant 0 : index
      %58 = vector.load %arg10[%c0_36, %c0_37] : memref<1x512xf32, #tpu.memory_space<vmem>>, vector<1x512xf32>
      %cst_38 = arith.constant dense<0.000000e+00> : vector<512xf32>
      %59 = vector.multi_reduction <add>, %56, %cst_38 [0] : vector<8x512xf32> to vector<512xf32>
      %60 = vector.shape_cast %59 : vector<512xf32> to vector<1x512xf32>
      %cst_39 = arith.constant 8.000000e+00 : f32
      %61 = vector.broadcast %cst_39 : f32 to vector<1x512xf32>
      %62 = arith.divf %60, %61 : vector<1x512xf32>
      %63 = vector.broadcast %62 : vector<1x512xf32> to vector<8x512xf32>
      %64 = arith.subf %56, %63 : vector<8x512xf32>
      %65 = arith.mulf %64, %64 : vector<8x512xf32>
      %cst_40 = arith.constant dense<0.000000e+00> : vector<512xf32>
      %66 = vector.multi_reduction <add>, %65, %cst_40 [0] : vector<8x512xf32> to vector<512xf32>
      %67 = vector.shape_cast %66 : vector<512xf32> to vector<1x512xf32>
      %cst_41 = arith.constant 8.000000e+00 : f32
      %68 = vector.broadcast %cst_41 : f32 to vector<1x512xf32>
      %69 = arith.divf %67, %68 : vector<1x512xf32>
      %70 = vector.broadcast %62 : vector<1x512xf32> to vector<8x512xf32>
      %71 = arith.subf %56, %70 : vector<8x512xf32>
      %cst_42 = arith.constant 8.000000e-01 : f32
      %72 = vector.broadcast %cst_42 : f32 to vector<1x512xf32>
      %73 = arith.addf %69, %72 : vector<1x512xf32>
      %74 = math.rsqrt %73 : vector<1x512xf32>
      %75 = vector.broadcast %74 : vector<1x512xf32> to vector<8x512xf32>
      %76 = arith.mulf %71, %75 : vector<8x512xf32>
      %77 = vector.broadcast %57 : vector<1x512xf32> to vector<8x512xf32>
      %78 = arith.mulf %76, %77 : vector<8x512xf32>
      %79 = vector.broadcast %58 : vector<1x512xf32> to vector<8x512xf32>
      %80 = arith.addf %78, %79 : vector<8x512xf32>
      %cst_43 = arith.constant 0.000000e+00 : f32
      %81 = vector.broadcast %cst_43 : f32 to vector<8x512xf32>
      %82 = arith.cmpf ogt, %80, %81 : vector<8x512xf32>
      %cst_44 = arith.constant 2.000000e-01 : f32
      %83 = vector.broadcast %cst_44 : f32 to vector<8x512xf32>
      %84 = arith.mulf %83, %80 : vector<8x512xf32>
      %85 = arith.select %82, %80, %84 : vector<8x512xi1>, vector<8x512xf32>
      %86 = arith.truncf %85 : vector<8x512xf32> to vector<8x512xbf16>
      %c0_45 = arith.constant 0 : index
      %c0_46 = arith.constant 0 : index
      %87 = vector.load %arg11[%c0_45, %c0_46] : memref<512x1024xbf16, #tpu.memory_space<vmem>>, vector<512x1024xbf16>
      %cst_47 = arith.constant dense<0.000000e+00> : vector<8x1024xf32>
      %88 = tpu.matmul %86, %87, %cst_47 {dimension_numbers = #tpu.dot_dimension_numbers<[1], [0], [0], [1], [0, 0, 1, 1], [], []>} : vector<8x512xbf16>, vector<512x1024xbf16>, vector<8x1024xf32> -> vector<8x1024xf32>
      %c0_48 = arith.constant 0 : index
      %c0_49 = arith.constant 0 : index
      %89 = vector.load %arg12[%c0_48, %c0_49] : memref<1x1024xf32, #tpu.memory_space<vmem>>, vector<1x1024xf32>
      %c0_50 = arith.constant 0 : index
      %c0_51 = arith.constant 0 : index
      %90 = vector.load %arg13[%c0_50, %c0_51] : memref<1x1024xf32, #tpu.memory_space<vmem>>, vector<1x1024xf32>
      %cst_52 = arith.constant dense<0.000000e+00> : vector<1024xf32>
      %91 = vector.multi_reduction <add>, %88, %cst_52 [0] : vector<8x1024xf32> to vector<1024xf32>
      %92 = vector.shape_cast %91 : vector<1024xf32> to vector<1x1024xf32>
      %cst_53 = arith.constant 8.000000e+00 : f32
      %93 = vector.broadcast %cst_53 : f32 to vector<1x1024xf32>
      %94 = arith.divf %92, %93 : vector<1x1024xf32>
      %95 = vector.broadcast %94 : vector<1x1024xf32> to vector<8x1024xf32>
      %96 = arith.subf %88, %95 : vector<8x1024xf32>
      %97 = arith.mulf %96, %96 : vector<8x1024xf32>
      %cst_54 = arith.constant dense<0.000000e+00> : vector<1024xf32>
      %98 = vector.multi_reduction <add>, %97, %cst_54 [0] : vector<8x1024xf32> to vector<1024xf32>
      %99 = vector.shape_cast %98 : vector<1024xf32> to vector<1x1024xf32>
      %cst_55 = arith.constant 8.000000e+00 : f32
      %100 = vector.broadcast %cst_55 : f32 to vector<1x1024xf32>
      %101 = arith.divf %99, %100 : vector<1x1024xf32>
      %102 = vector.broadcast %94 : vector<1x1024xf32> to vector<8x1024xf32>
      %103 = arith.subf %88, %102 : vector<8x1024xf32>
      %cst_56 = arith.constant 8.000000e-01 : f32
      %104 = vector.broadcast %cst_56 : f32 to vector<1x1024xf32>
      %105 = arith.addf %101, %104 : vector<1x1024xf32>
      %106 = math.rsqrt %105 : vector<1x1024xf32>
      %107 = vector.broadcast %106 : vector<1x1024xf32> to vector<8x1024xf32>
      %108 = arith.mulf %103, %107 : vector<8x1024xf32>
      %109 = vector.broadcast %89 : vector<1x1024xf32> to vector<8x1024xf32>
      %110 = arith.mulf %108, %109 : vector<8x1024xf32>
      %111 = vector.broadcast %90 : vector<1x1024xf32> to vector<8x1024xf32>
      %112 = arith.addf %110, %111 : vector<8x1024xf32>
      %cst_57 = arith.constant 0.000000e+00 : f32
      %113 = vector.broadcast %cst_57 : f32 to vector<8x1024xf32>
      %114 = arith.cmpf ogt, %112, %113 : vector<8x1024xf32>
      %cst_58 = arith.constant 2.000000e-01 : f32
      %115 = vector.broadcast %cst_58 : f32 to vector<8x1024xf32>
      %116 = arith.mulf %115, %112 : vector<8x1024xf32>
      %117 = arith.select %114, %112, %116 : vector<8x1024xi1>, vector<8x1024xf32>
      %118 = arith.truncf %117 : vector<8x1024xf32> to vector<8x1024xbf16>
      %c0_59 = arith.constant 0 : index
      %c0_60 = arith.constant 0 : index
      %119 = vector.load %arg17[%c0_59, %c0_60] : memref<8x1024xbf16, #tpu.memory_space<vmem>>, vector<8x1024xbf16>
      tpu.vector_store %arg17[%c0_59, %c0_60], %118 {strides = array<i32>} : memref<8x1024xbf16, #tpu.memory_space<vmem>>, vector<8x1024xbf16>,
    } else {
    }
    %c0 = arith.constant 0 : index
    %c0_1 = arith.constant 0 : index
    %3 = vector.load %arg17[%c0, %c0_1] : memref<8x1024xbf16, #tpu.memory_space<vmem>>, vector<8x1024xbf16>
    %c0_2 = arith.constant 0 : index
    %c0_3 = arith.constant 0 : index
    %4 = vector.load %arg14[%c0_2, %c0_3] : memref<1024x768xbf16, #tpu.memory_space<vmem>>, vector<1024x768xbf16>
    %cst = arith.constant dense<0.000000e+00> : vector<8x768xf32>
    %5 = tpu.matmul %3, %4, %cst {dimension_numbers = #tpu.dot_dimension_numbers<[1], [0], [0], [1], [0, 0, 1, 1], [], []>} : vector<8x1024xbf16>, vector<1024x768xbf16>, vector<8x768xf32> -> vector<8x768xf32>
    %c0_4 = arith.constant 0 : index
    %c0_5 = arith.constant 0 : index
    %6 = vector.load %arg15[%c0_4, %c0_5] : memref<1x768xf32, #tpu.memory_space<vmem>>, vector<1x768xf32>
    %7 = vector.broadcast %6 : vector<1x768xf32> to vector<8x768xf32>
    %8 = arith.addf %5, %7 : vector<8x768xf32>
    %9 = math.tanh %8 : vector<8x768xf32>
    %c0_6 = arith.constant 0 : index
    %c0_7 = arith.constant 0 : index
    %10 = vector.load %arg16[%c0_6, %c0_7] : memref<8x768xf32, #tpu.memory_space<vmem>>, vector<8x768xf32>
    tpu.vector_store %arg16[%c0_6, %c0_7], %9 {strides = array<i32>} : memref<8x768xf32, #tpu.memory_space<vmem>>, vector<8x768xf32>,
    return
  }
  func.func @transform_0(%arg0: i32, %arg1: i32) -> (i32, i32) {
    %c0_i32 = arith.constant 0 : i32
    %c0_i32_0 = arith.constant 0 : i32
    %c0_i32_1 = arith.constant 0 : i32
    return %c0_i32, %c0_i32_0 : i32, i32
  }
  func.func @transform_1(%arg0: i32, %arg1: i32) -> (i32, i32) {
    %c0_i32 = arith.constant 0 : i32
    %c0_i32_0 = arith.constant 0 : i32
    %c0_i32_1 = arith.constant 0 : i32
    return %c0_i32, %c0_i32_0 : i32, i32
  }
  func.func @transform_2(%arg0: i32, %arg1: i32) -> (i32, i32) {
    %c0_i32 = arith.constant 0 : i32
    %c0_i32_0 = arith.constant 0 : i32
    %c0_i32_1 = arith.constant 0 : i32
    return %c0_i32, %c0_i32_0 : i32, i32
  }
  func.func @transform_3(%arg0: i32, %arg1: i32) -> (i32, i32) {
    %c0_i32 = arith.constant 0 : i32
    %c0_i32_0 = arith.constant 0 : i32
    %c0_i32_1 = arith.constant 0 : i32
    return %c0_i32, %c0_i32_0 : i32, i32
  }
  func.func @transform_4(%arg0: i32, %arg1: i32) -> (i32, i32) {
    %c0_i32 = arith.constant 0 : i32
    %c0_i32_0 = arith.constant 0 : i32
    %c0_i32_1 = arith.constant 0 : i32
    return %c0_i32, %c0_i32_0 : i32, i32
  }
  func.func @transform_5(%arg0: i32, %arg1: i32) -> (i32, i32) {
    %c0_i32 = arith.constant 0 : i32
    %c0_i32_0 = arith.constant 0 : i32
    %c0_i32_1 = arith.constant 0 : i32
    return %c0_i32, %c0_i32_0 : i32, i32
  }
  func.func @transform_6(%arg0: i32, %arg1: i32) -> (i32, i32) {
    %c0_i32 = arith.constant 0 : i32
    %c0_i32_0 = arith.constant 0 : i32
    %c0_i32_1 = arith.constant 0 : i32
    return %c0_i32, %c0_i32_0 : i32, i32
  }
  func.func @transform_7(%arg0: i32, %arg1: i32) -> (i32, i32) {
    %c0_i32 = arith.constant 0 : i32
    %c0_i32_0 = arith.constant 0 : i32
    %c0_i32_1 = arith.constant 0 : i32
    return %c0_i32, %c0_i32_0 : i32, i32
  }
  func.func @transform_8(%arg0: i32, %arg1: i32) -> (i32, i32) {
    %c0_i32 = arith.constant 0 : i32
    %c0_i32_0 = arith.constant 0 : i32
    %c0_i32_1 = arith.constant 0 : i32
    return %c0_i32, %c0_i32_0 : i32, i32
  }
  func.func @transform_9(%arg0: i32, %arg1: i32) -> (i32, i32) {
    %c0_i32 = arith.constant 0 : i32
    %c0_i32_0 = arith.constant 0 : i32
    %c0_i32_1 = arith.constant 0 : i32
    return %c0_i32, %c0_i32_0 : i32, i32
  }
  func.func @transform_10(%arg0: i32, %arg1: i32) -> (i32, i32) {
    %c0_i32 = arith.constant 0 : i32
    %c0_i32_0 = arith.constant 0 : i32
    %c0_i32_1 = arith.constant 0 : i32
    return %c0_i32, %c0_i32_0 : i32, i32
  }
  func.func @transform_11(%arg0: i32, %arg1: i32) -> (i32, i32) {
    %c0_i32 = arith.constant 0 : i32
    %c0_i32_0 = arith.constant 0 : i32
    %c0_i32_1 = arith.constant 0 : i32
    return %c0_i32, %c0_i32_0 : i32, i32
  }
  func.func @transform_12(%arg0: i32, %arg1: i32) -> (i32, i32) {
    %c2_i32 = arith.constant 2 : i32
    %0 = arith.muli %arg0, %c2_i32 : i32
    %1 = arith.addi %0, %arg1 : i32
    %c0_i32 = arith.constant 0 : i32
    %c0_i32_0 = arith.constant 0 : i32
    return %c0_i32, %1 : i32, i32
  }
  func.func @transform_13(%arg0: i32, %arg1: i32) -> (i32, i32) {
    %c2_i32 = arith.constant 2 : i32
    %0 = arith.muli %arg0, %c2_i32 : i32
    %1 = arith.addi %0, %arg1 : i32
    %c0_i32 = arith.constant 0 : i32
    %c0_i32_0 = arith.constant 0 : i32
    return %c0_i32, %1 : i32, i32
  }
  func.func @transform_14(%arg0: i32, %arg1: i32) -> (i32, i32) {
    %c2_i32 = arith.constant 2 : i32
    %0 = arith.muli %arg0, %c2_i32 : i32
    %1 = arith.addi %0, %arg1 : i32
    %c0_i32 = arith.constant 0 : i32
    %c0_i32_0 = arith.constant 0 : i32
    return %c0_i32, %1 : i32, i32
  }
}

</mosaic_0001>

<bundles_post_ra>
// kernel: generator_forward.1
= control target key start
LH: loop header
LB: loop body
LE: loop exit
PB: predicated region body
PF: predicated region fallthrough
CT: control target
= control target key end

     0   :  { %s10362_s0 = inlined_call_operand.vmem [shape: bf16[8,128], index: 0, kind: input, shape index: {}]   ;;  %s10363_s1 = inlined_call_operand.hbm [shape: bf16[128,128], index: 1, kind: input, shape index: {}]   ;;  %s10364_s2 = inlined_call_operand.hbm [shape: f32[1,128], index: 2, kind: input, shape index: {}]   ;;  %s10365_s3 = inlined_call_operand.hbm [shape: bf16[128,256], index: 3, kind: input, shape index: {}]   ;;  %s10366_s4 = inlined_call_operand.hbm [shape: f32[1,256], index: 4, kind: input, shape index: {}]   ;;  %s10367_s5 = inlined_call_operand.hbm [shape: f32[1,256], index: 5, kind: input, shape index: {}]   ;;  %s10368_s6 = inlined_call_operand.hbm [shape: bf16[256,512], index: 6, kind: input, shape index: {}]   ;;  %s10369_s7 = inlined_call_operand.hbm [shape: f32[1,512], index: 7, kind: input, shape index: {}]   ;;  %s10370_s8 = inlined_call_operand.hbm [shape: f32[1,512], index: 8, kind: input, shape index: {}]   ;;  %s10371_s9 = inlined_call_operand.hbm [shape: bf16[512,1024], index: 9, kind: input, shape index: {}]   ;;  %s10372_s10 = inlined_call_operand.hbm [shape: f32[1,1024], index: 10, kind: input, shape index: {}]   ;;  %s10373_s11 = inlined_call_operand.hbm [shape: f32[1,1024], index: 11, kind: input, shape index: {}]   ;;  %s10374_s12 = inlined_call_operand.hbm [shape: bf16[1024,3072], index: 12, kind: input, shape index: {}]   ;;  %s10375_s13 = inlined_call_operand.hbm [shape: f32[1,3072], index: 13, kind: input, shape index: {}]   ;;  %s10376_s14 = inlined_call_operand.vmem [shape: f32[8,3072], index: 14, kind: output, shape index: {}]  }
   0x1   :  { %10399 = sst [smem:[#allocation35_spill]] %s10362_s0 }
   0x2   :  { %10400 = sst [smem:[#allocation36_spill]] %s10363_s1 }
   0x3   :  { %10401 = sst [smem:[#allocation37_spill]] %s10364_s2 }
   0x4   :  { %10402 = sst [smem:[#allocation38_spill]] %s10365_s3 }
   0x5   :  { %10403 = sst [smem:[#allocation39_spill]] %s10366_s4 }
   0x6   :  { %10404 = sst [smem:[#allocation40_spill]] %s10367_s5 }
   0x7   :  { %10405 = sst [smem:[#allocation41_spill]] %s10368_s6 }
   0x8   :  { %10406 = sst [smem:[#allocation42_spill]] %s10369_s7 }
   0x9   :  { %10407 = sst [smem:[#allocation43_spill]] %s10370_s8 }
   0xa   :  { %10408 = sst [smem:[#allocation44_spill]] %s10371_s9 }
   0xb   :  { %10409 = sst [smem:[#allocation45_spill]] %s10372_s10 }
   0xc   :  { %10410 = sst [smem:[#allocation46_spill]] %s10373_s11 }
   0xd   :  { %10411 = sst [smem:[#allocation47_spill]] %s10374_s12 }
   0xe   :  { %10412 = sst [smem:[#allocation48_spill]] %s10375_s13 }
   0xf   :  { %10413 = sst [smem:[#allocation49_spill]] %s10376_s14 }
  0x10   :  { %19 = vsyncpa [#allocation4], 0 }
  0x11   :  { %20 = vsyncpa [#allocation6], 0 }
  0x12   :  { %21 = vsyncpa [#allocation9], 0 }
  0x13   :  { %22 = vsyncpa [#allocation12], 0 }
  0x14   :  { %23 = vsyncpa [#allocation15], 0 }
  0x15   :  { %24 = vsyncpa [#allocation18], 0 }
  0x16   :  { %25 = vsyncpa [#allocation21], 0 }
  0x17   :  { %27 = vsyncpa [#allocation21 + $0x1], 0  ;;  %s9310_s29 = smov 0   ;;  %s9312_s30 = smov 0  }
  0x18   :  { %s9314_s15 = smov 0   ;;  %s9316_s16 = smov 0  }
  0x19   :  { %s9318_s17 = smov 0   ;;  %s9320_s18 = smov 0  }
  0x1a   :  { %s9322_s19 = smov 0   ;;  %s9324_s20 = smov 0  }
  0x1b LB: > { %10414 = sst [smem:[#allocation30_spill]] %s9190_s16  ;;  %s9208_s21 = smov [#allocation5]   ;;  %s9206_s20 = sphi %s9324_s20, %s33_s20   ;;  %s9202_s19 = sphi %s9322_s19, %s10461_s19   ;;  %s9198_s18 = sphi %s9320_s18, %s10460_s18   ;;  %s9194_s17 = sphi %s9318_s17, %s10459_s17   ;;  %s9190_s16 = sphi %s9316_s16, %s10458_s16   ;;  %s9186_s15 = sphi %s9314_s15, %s10457_s15   ;;  %s9182_s30 = sphi %s9312_s30, %s10456_s30   ;;  %s9178_s29 = sphi %s9310_s29, %s10455_s29  }
  0x1c   : > { %10415 = sst [smem:[#allocation31_spill]] %s9194_s17  ;;  %s421_s22 = sshll.u32 %s9208_s21, 4  ;;  %s422_s22 = int_to_ptr.vmem [resolvable:$true] %s421_s22 }
  0x1d   : > { %s10377_s23 = sadd.s32 4294967295, %s9206_s20   ;;  %p6925_p0 = scmp.ge.s32.totalorder %s9206_s20, 1 }
  0x1e   : > { %p9354_p1 = scmp.eq.s32.totalorder %s10377_s23, 0  ;;  %p392_p2 = scmp.lt.s32.totalorder %s9206_s20, 5 }
  0x1f   : > { %s9209_s26 = smov [#allocation8]   ;;  %s9210_s28 = smov [#allocation11]  }
  0x20   : > { %s10416_s24 = scalar_select %p9354_p1, 1, 0 }
  0x21   : > { %p9359_p3 = pnand %p6925_p0, %p392_p2  ;;  %s445_s27 = sshll.u32 %s9209_s26, 4  ;;  %s9365_s27 = int_to_ptr.vmem [resolvable:$true] %s445_s27 }
  0x22   : > { %s466_s21 = sshll.u32 %s9210_s28, 4  ;;  %s10420_s2 = sld [smem:[#allocation37_spill]]  ;;  %s9373_s21 = int_to_ptr.vmem [resolvable:$true] %s466_s21 }
  0x23   : > { %s10417_s25 = scalar_select %p9359_p3, 1, 0 }
  0x24   : > { %p7843_p4 = pneg %p9359_p3 }
  0x25   : > { %10418 = sst [smem:[#allocation32_spill]] %s10417_s25 }
  0x26   : > { %p9369_p5 = pnand %p7843_p4, %p9354_p1 }
  0x28   : > { %s10419_s23 = scalar_select %p9369_p5, 1, 0 }
  0x29   : > { %s8748_s16 = scalar_lea.hbm %s10420_s2, 16  ;;  %p9383_p7 = pneg %p9369_p5 }
  0x2a   : > { %p8749_p6 = scmp.ne.s32.totalorder %s10420_s2, %s8748_s16  ;;  %p8755_p10 = scmp.lt.u32.totalorder %s8748_s16, %s10420_s2 }
  0x2c   : > { %p8751_p8 = pnand %p9383_p7, %p8749_p6 }
  0x2e   : > { %p8752_p9 = pneg %p8751_p8 }
  0x30   : > { %p8757_p11 = pnand %p8755_p10, %p8752_p9 }
  0x32   : > { %8760 = shalt.err (!%p8757_p11)
}
  0x33   : > { %s8761_s0 = scalar_lea.vmem %s422_s22, 16  ;;  %s8768_s14 = scalar_lea.vmem %s422_s22, 32 }
  0x34   : > { %p8762_p12 = scmp.ne.s32.totalorder %s422_s22, %s8761_s0  ;;  %p8769_p2 = scmp.lt.s32.totalorder %s422_s22, %s422_s22 }
  0x35   : > { %p8770_p4 = scmp.lt.s32.totalorder %s8768_s14, %s8761_s0 }
  0x36   : > { %p8764_p13 = pnand %p8762_p12, %p9383_p7 }
  0x37   : > { %p8771_p3 = por %p8770_p4, %p8769_p2 }
  0x38   : > { %p8765_p0 = pneg %p8764_p13 }
  0x3a   : > { %p8772_p1 = pnand %p8771_p3, %p8765_p0 }
  0x3c   : > { %8775 = shalt.err (!%p8772_p1)
}
  0x3d   : > { %7849 = dma.hbm_to_vmem [thread:$0]  (!%p9369_p5), %s10420_s2, 16, %s422_s22, [#allocation6]  }
  0x3e   : > { %s10422_s4 = sld [smem:[#allocation39_spill]] }
  0x44   : > { %s8776_s28 = scalar_lea.hbm %s10422_s4, 32 }
  0x45   : > { %p8777_p6 = scmp.ne.s32.totalorder %s10422_s4, %s8776_s28  ;;  %p8783_p1 = scmp.lt.u32.totalorder %s8776_s28, %s10422_s4 }
  0x47   : > { %p8779_p8 = pnand %p8777_p6, %p9383_p7 }
  0x49   : > { %p8780_p9 = pneg %p8779_p8 }
  0x4b   : > { %p8785_p3 = pnand %p8783_p1, %p8780_p9 }
  0x4d   : > { %8788 = shalt.err (!%p8785_p3)
}
  0x4e   : > { %s8789_s22 = scalar_lea.vmem %s9365_s27, 32  ;;  %p8797_p13 = scmp.lt.s32.totalorder %s9365_s27, %s9365_s27 }
  0x4f   : > { %p8790_p10 = scmp.ne.s32.totalorder %s9365_s27, %s8789_s22  ;;  %p8798_p0 = scmp.lt.s32.totalorder %s8789_s22, %s8789_s22 }
  0x51   : > { %p8792_p11 = pnand %p8790_p10, %p9383_p7  ;;  %p8799_p2 = por %p8798_p0, %p8797_p13 }
  0x53   : > { %p8793_p12 = pneg %p8792_p11 }
  0x55   : > { %p8800_p4 = pnand %p8799_p2, %p8793_p12 }
  0x57   : > { %8803 = shalt.err (!%p8800_p4)
}
  0x58   : > { %7855 = dma.hbm_to_vmem [thread:$0]  (!%p9369_p5), %s10422_s4, 32, %s9365_s27, [#allocation9]  }
  0x59   : > { %s10423_s6 = sld [smem:[#allocation41_spill]] }
  0x5f   : > { %s8804_s13 = scalar_lea.hbm %s10423_s6, 8192 }
  0x60   : > { %p8805_p6 = scmp.ne.s32.totalorder %s10423_s6, %s8804_s13  ;;  %p8811_p1 = scmp.lt.u32.totalorder %s8804_s13, %s10423_s6 }
  0x62   : > { %p8807_p8 = pnand %p8805_p6, %p9383_p7 }
  0x64   : > { %p8808_p9 = pneg %p8807_p8 }
  0x66   : > { %p8813_p3 = pnand %p8811_p1, %p8808_p9 }
  0x68   : > { %8816 = shalt.err (!%p8813_p3)
}
  0x69   : > { %s8817_s27 = scalar_lea.vmem %s9373_s21, 8192  ;;  %p8825_p13 = scmp.lt.s32.totalorder %s9373_s21, %s9373_s21 }
  0x6a   : > { %p8818_p10 = scmp.ne.s32.totalorder %s9373_s21, %s8817_s27  ;;  %p8826_p0 = scmp.lt.s32.totalorder %s8817_s27, %s8817_s27 }
  0x6c   : > { %p8820_p11 = pnand %p8818_p10, %p9383_p7  ;;  %p8827_p2 = por %p8826_p0, %p8825_p13 }
  0x6e   : > { %p8821_p12 = pneg %p8820_p11 }
  0x70   : > { %p8828_p4 = pnand %p8827_p2, %p8821_p12 }
  0x72   : > { %8831 = shalt.err (!%p8828_p4)
}
  0x73   : > { %s9211_s22 = smov 256   ;;  %s9212_s9 = smov 16  }
  0x74   : > { %7861 = dma.hbm_to_vmem [thread:$0]  (!%p9369_p5), %s10423_s6, 8192, %s9373_s21, [#allocation12], %s9211_s22, %s9211_s22, %s9212_s9  }
  0x75   : > { %s9213_s25 = smov [#allocation14]   ;;  %s9214_s16 = smov [#allocation17]  }
  0x76   : > { %s491_s13 = sshll.u32 %s9213_s25, 4  ;;  %s515_s28 = sshll.u32 %s9214_s16, 4  ;;  %s492_s13 = int_to_ptr.vmem [resolvable:$true] %s491_s13  ;;  %s516_s28 = int_to_ptr.vmem [resolvable:$true] %s515_s28 }
  0x77   : > { %s10424_s8 = sld [smem:[#allocation43_spill]] }
  0x7d   : > { %s8832_s27 = scalar_lea.hbm %s10424_s8, 64 }
  0x7e   : > { %p8833_p6 = scmp.ne.s32.totalorder %s10424_s8, %s8832_s27  ;;  %p8839_p1 = scmp.lt.u32.totalorder %s8832_s27, %s10424_s8 }
  0x80   : > { %p8835_p8 = pnand %p8833_p6, %p9383_p7 }
  0x82   : > { %p8836_p9 = pneg %p8835_p8 }
  0x84   : > { %p8841_p3 = pnand %p8839_p1, %p8836_p9 }
  0x86   : > { %8844 = shalt.err (!%p8841_p3)
}
  0x87   : > { %s8845_s21 = scalar_lea.vmem %s492_s13, 64  ;;  %p8853_p13 = scmp.lt.s32.totalorder %s492_s13, %s492_s13 }
  0x88   : > { %p8846_p10 = scmp.ne.s32.totalorder %s492_s13, %s8845_s21  ;;  %p8854_p0 = scmp.lt.s32.totalorder %s8845_s21, %s8845_s21 }
  0x8a   : > { %p8848_p11 = pnand %p8846_p10, %p9383_p7  ;;  %p8855_p2 = por %p8854_p0, %p8853_p13 }
  0x8c   : > { %p8849_p12 = pneg %p8848_p11 }
  0x8e   : > { %p8856_p4 = pnand %p8855_p2, %p8849_p12 }
  0x90   : > { %8859 = shalt.err (!%p8856_p4)
}
  0x91   : > { %7867 = dma.hbm_to_vmem [thread:$0]  (!%p9369_p5), %s10424_s8, 64, %s492_s13, [#allocation15]  }
  0x92   : > { %s10425_s10 = sld [smem:[#allocation45_spill]] }
  0x98   : > { %s8860_s22 = scalar_lea.hbm %s10425_s10, 128 }
  0x99   : > { %p8861_p6 = scmp.ne.s32.totalorder %s10425_s10, %s8860_s22  ;;  %p8867_p1 = scmp.lt.u32.totalorder %s8860_s22, %s10425_s10 }
  0x9b   : > { %p8863_p8 = pnand %p8861_p6, %p9383_p7 }
  0x9d   : > { %p8864_p9 = pneg %p8863_p8 }
  0x9f   : > { %p8869_p3 = pnand %p8867_p1, %p8864_p9 }
  0xa1   : > { %8872 = shalt.err (!%p8869_p3)
}
  0xa2   : > { %s8873_s16 = scalar_lea.vmem %s516_s28, 128  ;;  %p8881_p13 = scmp.lt.s32.totalorder %s516_s28, %s516_s28 }
  0xa3   : > { %p8874_p10 = scmp.ne.s32.totalorder %s516_s28, %s8873_s16  ;;  %p8882_p0 = scmp.lt.s32.totalorder %s8873_s16, %s8873_s16 }
  0xa5   : > { %p8876_p11 = pnand %p8874_p10, %p9383_p7  ;;  %p8883_p2 = por %p8882_p0, %p8881_p13 }
  0xa7   : > { %p8877_p12 = pneg %p8876_p11 }
  0xa9   : > { %p8884_p4 = pnand %p8883_p2, %p8877_p12 }
  0xab   : > { %8887 = shalt.err (!%p8884_p4)
}
  0xac   : > { %7873 = dma.hbm_to_vmem [thread:$0]  (!%p9369_p5), %s10425_s10, 128, %s516_s28, [#allocation18]  }
  0xad   : > { %s42_s14 = sadd.s32 1, %s9198_s18  ;;  %s45_s27 = sadd.s32 1, %s9202_s19 }
  0xae   : > { %p43_p6 = scmp.ge.s32.totalorder %s42_s14, 2  ;;  %s6919_s21 = sshll.u32 %s9202_s19, 1 }
  0xaf   : > { %s308_s2 = sadd.s32 1, %s9186_s15  ;;  %s9489_s4 = sadd.s32 %s9198_s18, %s6919_s21 }
  0xb0   : > { %s10463_s14 = smov (%p43_p6, %s42_s14), 0  ;;  %s10465_s27 = smov (!%p43_p6, %s45_s27), %s9202_s19 }
  0xb1   : > { %10426 = sst [smem:[#allocation33_spill]] %s10463_s14  ;;  %p315_p8 = scmp.ne.s32.totalorder %s9186_s15, %s9182_s30 }
  0xb2   : > { %p47_p9 = scmp.ge.s32.totalorder %s10465_s27, 2  ;;  %p316_p1 = scmp.eq.s32.totalorder %s9206_s20, 0 }
  0xb3   : > { %p321_p3 = scmp.ne.s32.totalorder %s9182_s30, %s9178_s29  ;;  %p7895_p10 = scmp.lt.s32.totalorder %s9206_s20, 4 }
  0xb4   : > { %s10467_s27 = smov (%p47_p9, %s10465_s27), 0  ;;  %p317_p11 = por %p316_p1, %p315_p8 }
  0xb5   : > { %10427 = sst [smem:[#allocation34_spill]] %s10467_s27  ;;  %p10428_p12 = scmp.ne.s32.totalorder %s10416_s24, 0 }
  0xb6   : > { %s6920_s5 = sshll.u32 %s10467_s27, 1  ;;  %s537_s7 = sand.u32 1, %s9206_s20  }
  0xb7   : > { %p9501_p13 = por %p10428_p12, %p321_p3  ;;  %s304_s22 = sadd.s32 %s6920_s5, %s10463_s14 }
  0xb8   : > { %s305_s9 = ssub.s32 %s9489_s4, %s304_s22  ;;  %s10388_s11 = sand.u32 1, %s9186_s15  }
  0xb9   : > { %s10429_s28 = scalar_select %p9501_p13, 1, 0 }
  0xba   : > { %p306_p0 = scmp.eq.s32.totalorder %s305_s9, 0  ;;  %s7791_s17 = smul.u32 3072, %s10388_s11 }
  0xbb   : > { %s7700_s25 = smul.u32 384, %s9489_s4  ;;  %p9513_p2 = pnand %p7895_p10, %p317_p11 }
  0xbc   : > { %s9518_s16 = scalar_select %p306_p0, %s9186_s15, %s308_s2  }
  0xbd   : > { %s10430_s29 = scalar_select %p9513_p2, 1, 0 }
  0xbe   : > { %s10431_s12 = sld [smem:[#allocation47_spill]]  ;;  %s541_s5 = scalar_lea.vmem [#allocation20], %s7791_s17 }
  0xbf   : > { %s550_s22 = sshll.u32 %s541_s5, 4  ;;  %s9527_s9 = scalar_lea.sflag [#allocation21], %s537_s7  ;;  %s9525_s22 = int_to_ptr.vmem [resolvable:$true] %s550_s22 }
  0xc0   : > { %p10392_p6 = pneg %p9513_p2 }
  0xc4   : > { %s9523_s21 = scalar_lea.hbm %s10431_s12, %s7700_s25  ;;  %s8893_s13 = scalar_lea.hbm %s10431_s12, 196608 }
  0xc5   : > { %s8888_s11 = scalar_lea.hbm %s9523_s21, 49152  ;;  %p8894_p1 = scmp.lt.u32.totalorder %s9523_s21, %s10431_s12 }
  0xc6   : > { %p8889_p4 = scmp.ne.s32.totalorder %s9523_s21, %s8888_s11  ;;  %p8895_p3 = scmp.lt.u32.totalorder %s8893_s13, %s8888_s11 }
  0xc7   : > { %p8897_p11 = scmp.lt.u32.totalorder %s8888_s11, %s9523_s21 }
  0xc8   : > { %p8891_p8 = pnand %p10392_p6, %p8889_p4  ;;  %p8896_p10 = por %p8895_p3, %p8894_p1 }
  0xca   : > { %p8892_p9 = pneg %p8891_p8  ;;  %p8898_p12 = por %p8897_p11, %p8896_p10 }
  0xcc   : > { %p8899_p0 = pnand %p8898_p12, %p8892_p9 }
  0xce   : > { %8902 = shalt.err (!%p8899_p0)
}
  0xcf   : > { %s8903_s7 = scalar_lea.vmem %s9525_s22, 49152  ;;  %s9215_s17 = smov [#allocation20]  }
  0xd0   : > { %p8904_p4 = scmp.ne.s32.totalorder %s9525_s22, %s8903_s7  ;;  %s8908_s5 = sshll.u32 %s9215_s17, 4  ;;  %s8909_s5 = int_to_ptr.vmem [resolvable:$false] %s8908_s5 }
  0xd1   : > { %s8910_s6 = scalar_lea.vmem %s8909_s5, 98304  ;;  %p8911_p5 = scmp.lt.s32.totalorder %s9525_s22, %s8909_s5 }
  0xd2   : > { %p8906_p8 = pnand %p8904_p4, %p10392_p6  ;;  %p8912_p1 = scmp.lt.s32.totalorder %s8910_s6, %s8903_s7 }
  0xd4   : > { %p8907_p13 = pneg %p8906_p8  ;;  %p8913_p3 = por %p8912_p1, %p8911_p5 }
  0xd6   : > { %p8914_p10 = pnand %p8913_p3, %p8907_p13 }
  0xd8   : > { %8917 = shalt.err (!%p8914_p10)
}
  0xd9   : > { %s9216_s11 = smov 1536   ;;  %s9217_s2 = smov 384  }
  0xda   : > { %s9218_s25 = smov 24   ;;  %s9219_s13 = smov [#allocation3]  }
  0xdb   : > { %7880 = dma.hbm_to_vmem [thread:$0]  (!%p9513_p2), %s9523_s21, 49152, %s9525_s22, %s9527_s9, %s9216_s11, %s9217_s2, %s9218_s25  }
  0xdc   : > { %s407_s0 = sshll.u32 %s9219_s13, 4  ;;  %s10432_s1 = sld [smem:[#allocation36_spill]]  ;;  %s408_s0 = int_to_ptr.vmem [resolvable:$true] %s407_s0 }
  0xe2   : > { %s8918_s7 = scalar_lea.hbm %s10432_s1, 1024 }
  0xe3   : > { %p8919_p5 = scmp.ne.s32.totalorder %s10432_s1, %s8918_s7  ;;  %p8925_p11 = scmp.lt.u32.totalorder %s8918_s7, %s10432_s1 }
  0xe5   : > { %p8921_p13 = pnand %p8919_p5, %p9383_p7 }
  0xe7   : > { %p8922_p9 = pneg %p8921_p13 }
  0xe9   : > { %p8927_p12 = pnand %p8925_p11, %p8922_p9 }
  0xeb   : > { %8930 = shalt.err (!%p8927_p12)
}
  0xec   : > { %s8931_s21 = scalar_lea.vmem %s408_s0, 1024  ;;  %p8939_p1 = scmp.lt.s32.totalorder %s408_s0, %s408_s0 }
  0xed   : > { %p8932_p0 = scmp.ne.s32.totalorder %s408_s0, %s8931_s21  ;;  %p8940_p3 = scmp.lt.s32.totalorder %s8931_s21, %s8931_s21 }
  0xef   : > { %p8934_p4 = pnand %p8932_p0, %p9383_p7  ;;  %p8941_p10 = por %p8940_p3, %p8939_p1 }
  0xf1   : > { %p8935_p8 = pneg %p8934_p4 }
  0xf3   : > { %p8942_p6 = pnand %p8941_p10, %p8935_p8 }
  0xf5   : > { %8945 = shalt.err (!%p8942_p6)
}
  0xf6   : > { %s9220_s8 = smov 64   ;;  %s9221_s22 = smov 4  }
  0xf7   : > { %p10433_p5 = scmp.ne.s32.totalorder %s10419_s23, 0  ;;  %s9222_s11 = smov [#allocation7]  }
  0xf8   : > { %s431_s2 = sshll.u32 %s9222_s11, 4  ;;  %s10434_s3 = sld [smem:[#allocation38_spill]]  ;;  %s432_s2 = int_to_ptr.vmem [resolvable:$true] %s431_s2 }
  0xf9   : > { %7846 = dma.hbm_to_vmem [thread:$0]  (!%p10433_p5), %s10432_s1, 1024, %s408_s0, [#allocation4], %s9220_s8, %s9220_s8, %s9221_s22  }
  0xfe   : > { %s8946_s17 = scalar_lea.hbm %s10434_s3, 2048 }
  0xff   : > { %p8947_p6 = scmp.ne.s32.totalorder %s10434_s3, %s8946_s17  ;;  %p8953_p11 = scmp.lt.u32.totalorder %s8946_s17, %s10434_s3 }
 0x101   : > { %p8949_p13 = pnand %p8947_p6, %p9383_p7 }
 0x103   : > { %p8950_p9 = pneg %p8949_p13 }
 0x105   : > { %p8955_p12 = pnand %p8953_p11, %p8950_p9 }
 0x107   : > { %8958 = shalt.err (!%p8955_p12)
}
 0x108   : > { %s8959_s0 = scalar_lea.vmem %s432_s2, 2048  ;;  %p8967_p1 = scmp.lt.s32.totalorder %s432_s2, %s432_s2 }
 0x109   : > { %p8960_p0 = scmp.ne.s32.totalorder %s432_s2, %s8959_s0  ;;  %p8968_p3 = scmp.lt.s32.totalorder %s8959_s0, %s8959_s0 }
 0x10b   : > { %p8962_p4 = pnand %p8960_p0, %p9383_p7  ;;  %p8969_p10 = por %p8968_p3, %p8967_p1 }
 0x10d   : > { %p8963_p8 = pneg %p8962_p4 }
 0x10f   : > { %p8970_p2 = pnand %p8969_p10, %p8963_p8 }
 0x111   : > { %8973 = shalt.err (!%p8970_p2)
}
 0x112   : > { %s9223_s8 = smov 128   ;;  %s9224_s22 = smov 8  }
 0x113   : > { %7852 = dma.hbm_to_vmem [thread:$0]  (!%p10433_p5), %s10434_s3, 2048, %s432_s2, [#allocation6], %s9223_s8, %s9223_s8, %s9224_s22  }
 0x114   : > { %s9225_s11 = smov [#allocation10]   ;;  %s9226_s13 = smov [#allocation13]  }
 0x115   : > { %s456_s25 = sshll.u32 %s9225_s11, 4  ;;  %s480_s17 = sshll.u32 %s9226_s13, 4  ;;  %s457_s25 = int_to_ptr.vmem [resolvable:$true] %s456_s25  ;;  %s9591_s17 = int_to_ptr.vmem [resolvable:$true] %s480_s17 }
 0x116   : > { %s10435_s6 = sld [smem:[#allocation40_spill]] }
 0x11c   : > { %s8974_s21 = scalar_lea.hbm %s10435_s6, 32 }
 0x11d   : > { %p8975_p2 = scmp.ne.s32.totalorder %s10435_s6, %s8974_s21  ;;  %p8981_p9 = scmp.lt.u32.totalorder %s8974_s21, %s10435_s6 }
 0x11f   : > { %p8977_p6 = pnand %p8975_p2, %p9383_p7 }
 0x121   : > { %p8978_p13 = pneg %p8977_p6 }
 0x123   : > { %p8983_p11 = pnand %p8981_p9, %p8978_p13 }
 0x125   : > { %8986 = shalt.err (!%p8983_p11)
}
 0x126   : > { %s8987_s8 = scalar_lea.vmem %s457_s25, 32  ;;  %p8995_p8 = scmp.lt.s32.totalorder %s457_s25, %s457_s25 }
 0x127   : > { %p8988_p12 = scmp.ne.s32.totalorder %s457_s25, %s8987_s8  ;;  %p8996_p1 = scmp.lt.s32.totalorder %s8987_s8, %s8987_s8 }
 0x129   : > { %p8990_p0 = pnand %p8988_p12, %p9383_p7  ;;  %p8997_p3 = por %p8996_p1, %p8995_p8 }
 0x12b   : > { %p8991_p4 = pneg %p8990_p0 }
 0x12d   : > { %p8998_p10 = pnand %p8997_p3, %p8991_p4 }
 0x12f   : > { %9001 = shalt.err (!%p8998_p10)
}
 0x130   : > { %7858 = dma.hbm_to_vmem [thread:$0]  (!%p10433_p5), %s10435_s6, 32, %s457_s25, [#allocation9]  }
 0x131   : > { %s10436_s13 = sld [smem:[#allocation42_spill]] }
 0x137   : > { %s9002_s7 = scalar_lea.hbm %s10436_s13, 64 }
 0x138   : > { %p9003_p2 = scmp.ne.s32.totalorder %s10436_s13, %s9002_s7  ;;  %p9009_p9 = scmp.lt.u32.totalorder %s9002_s7, %s10436_s13 }
 0x13a   : > { %p9005_p6 = pnand %p9003_p2, %p9383_p7 }
 0x13c   : > { %p9006_p13 = pneg %p9005_p6 }
 0x13e   : > { %p9011_p11 = pnand %p9009_p9, %p9006_p13 }
 0x140   : > { %9014 = shalt.err (!%p9011_p11)
}
 0x141   : > { %s9015_s25 = scalar_lea.vmem %s9591_s17, 64  ;;  %p9023_p8 = scmp.lt.s32.totalorder %s9591_s17, %s9591_s17 }
 0x142   : > { %p9016_p12 = scmp.ne.s32.totalorder %s9591_s17, %s9015_s25  ;;  %p9024_p1 = scmp.lt.s32.totalorder %s9015_s25, %s9015_s25 }
 0x144   : > { %p9018_p0 = pnand %p9016_p12, %p9383_p7  ;;  %p9025_p3 = por %p9024_p1, %p9023_p8 }
 0x146   : > { %p9019_p4 = pneg %p9018_p0 }
 0x148   : > { %p9026_p10 = pnand %p9025_p3, %p9019_p4 }
 0x14a   : > { %9029 = shalt.err (!%p9026_p10)
}
 0x14b   : > { %7864 = dma.hbm_to_vmem [thread:$0]  (!%p10433_p5), %s10436_s13, 64, %s9591_s17, [#allocation12]  }
 0x14c   : > { %s9227_s1 = smov [#allocation16]   ;;  %s10437_s7 = sld [smem:[#allocation44_spill]] }
 0x14d   : > { %s501_s22 = sshll.u32 %s9227_s1, 4  ;;  %s502_s22 = int_to_ptr.vmem [resolvable:$true] %s501_s22 }
 0x152   : > { %s9030_s5 = scalar_lea.hbm %s10437_s7, 32768 }
 0x153   : > { %p9031_p2 = scmp.ne.s32.totalorder %s10437_s7, %s9030_s5  ;;  %p9037_p9 = scmp.lt.u32.totalorder %s9030_s5, %s10437_s7 }
 0x155   : > { %p9033_p6 = pnand %p9031_p2, %p9383_p7 }
 0x157   : > { %p9034_p13 = pneg %p9033_p6 }
 0x159   : > { %p9039_p11 = pnand %p9037_p9, %p9034_p13 }
 0x15b   : > { %9042 = shalt.err (!%p9039_p11)
}
 0x15c   : > { %s9043_s17 = scalar_lea.vmem %s502_s22, 32768  ;;  %p9051_p8 = scmp.lt.s32.totalorder %s502_s22, %s502_s22 }
 0x15d   : > { %p9044_p12 = scmp.ne.s32.totalorder %s502_s22, %s9043_s17  ;;  %p9052_p1 = scmp.lt.s32.totalorder %s9043_s17, %s9043_s17 }
 0x15f   : > { %p9046_p0 = pnand %p9044_p12, %p9383_p7  ;;  %p9053_p3 = por %p9052_p1, %p9051_p8 }
 0x161   : > { %p9047_p4 = pneg %p9046_p0 }
 0x163   : > { %p9054_p10 = pnand %p9053_p3, %p9047_p4 }
 0x165   : > { %9057 = shalt.err (!%p9054_p10)
}
 0x166   : > { %s9228_s2 = smov 512   ;;  %s9229_s8 = smov 32  }
 0x167   : > { %7870 = dma.hbm_to_vmem [thread:$0]  (!%p10433_p5), %s10437_s7, 32768, %s502_s22, [#allocation15], %s9228_s2, %s9228_s2, %s9229_s8  }
 0x168   : > { %s9230_s11 = smov [#allocation19]   ;;  %s10438_s21 = sand.u32 1, %s9186_s15  }
 0x169   : > { %s526_s5 = sshll.u32 %s9230_s11, 4  ;;  %s7792_s0 = smul.u32 6, %s10438_s21  ;;  %s527_s5 = int_to_ptr.vmem [resolvable:$true] %s526_s5 }
 0x16a   : > { %s7701_s10 = smul.u32 96, %s9489_s4  ;;  %s10439_s3 = sld [smem:[#allocation46_spill]] }
 0x170   : > { %s9058_s6 = scalar_lea.hbm %s10439_s3, 128 }
 0x171   : > { %p9059_p2 = scmp.ne.s32.totalorder %s10439_s3, %s9058_s6  ;;  %p9065_p9 = scmp.lt.u32.totalorder %s9058_s6, %s10439_s3 }
 0x173   : > { %p9061_p6 = pnand %p9059_p2, %p9383_p7 }
 0x175   : > { %p9062_p13 = pneg %p9061_p6 }
 0x177   : > { %p9067_p11 = pnand %p9065_p9, %p9062_p13 }
 0x179   : > { %9070 = shalt.err (!%p9067_p11)
}
 0x17a   : > { %s9071_s22 = scalar_lea.vmem %s527_s5, 128  ;;  %p9079_p8 = scmp.lt.s32.totalorder %s527_s5, %s527_s5 }
 0x17b   : > { %p9072_p12 = scmp.ne.s32.totalorder %s527_s5, %s9071_s22  ;;  %p9080_p1 = scmp.lt.s32.totalorder %s9071_s22, %s9071_s22 }
 0x17d   : > { %p9074_p0 = pnand %p9072_p12, %p9383_p7  ;;  %p9081_p3 = por %p9080_p1, %p9079_p8 }
 0x17f   : > { %p9075_p4 = pneg %p9074_p0 }
 0x181   : > { %p9082_p10 = pnand %p9081_p3, %p9075_p4 }
 0x183   : > { %9085 = shalt.err (!%p9082_p10)
}
 0x184   : > { %7876 = dma.hbm_to_vmem [thread:$0]  (!%p10433_p5), %s10439_s3, 128, %s527_s5, [#allocation18]  }
 0x185   : > { %s10440_s13 = sld [smem:[#allocation48_spill]]  ;;  %s564_s26 = scalar_lea.vmem [#allocation22], %s7792_s0 }
 0x186   : > { %s574_s8 = sshll.u32 %s564_s26, 4  ;;  %p10441_p2 = scmp.ne.s32.totalorder %s10430_s29, 0  ;;  %s575_s8 = int_to_ptr.vmem [resolvable:$true] %s574_s8 }
 0x188   : > { %p10442_p6 = pneg %p10441_p2 }
 0x18b   : > { %s9676_s2 = scalar_lea.hbm %s10440_s13, %s7701_s10  ;;  %s9091_s5 = scalar_lea.hbm %s10440_s13, 384 }
 0x18c   : > { %s9086_s12 = scalar_lea.hbm %s9676_s2, 96  ;;  %p9092_p5 = scmp.lt.u32.totalorder %s9676_s2, %s10440_s13 }
 0x18d   : > { %p9087_p7 = scmp.ne.s32.totalorder %s9676_s2, %s9086_s12  ;;  %p9093_p11 = scmp.lt.u32.totalorder %s9091_s5, %s9086_s12 }
 0x18e   : > { %p9095_p0 = scmp.lt.u32.totalorder %s9086_s12, %s9676_s2 }
 0x18f   : > { %p9089_p13 = pnand %p9087_p7, %p10442_p6  ;;  %p9094_p12 = por %p9093_p11, %p9092_p5 }
 0x191   : > { %p9090_p9 = pneg %p9089_p13  ;;  %p9096_p4 = por %p9095_p0, %p9094_p12 }
 0x193   : > { %p9097_p8 = pnand %p9096_p4, %p9090_p9 }
 0x195   : > { %9100 = shalt.err (!%p9097_p8)
}
 0x196   : > { %s9101_s0 = scalar_lea.vmem %s575_s8, 96  ;;  %p10443_p3 = pmov %p10442_p6 }
 0x197   : > { %p9102_p1 = scmp.ne.s32.totalorder %s575_s8, %s9101_s0  ;;  %s9231_s25 = smov [#allocation22]  }
 0x198   : > { %s9106_s17 = sshll.u32 %s9231_s25, 4  ;;  %s9107_s17 = int_to_ptr.vmem [resolvable:$false] %s9106_s17 }
 0x199   : > { %p9104_p10 = pnand %p9102_p1, %p10443_p3  ;;  %s9108_s1 = scalar_lea.vmem %s9107_s17, 192 }
 0x19a   : > { %p9109_p6 = scmp.lt.s32.totalorder %s575_s8, %s9107_s17  ;;  %p9110_p13 = scmp.lt.s32.totalorder %s9108_s1, %s9101_s0 }
 0x19b   : > { %p9105_p7 = pneg %p9104_p10 }
 0x19c   : > { %p9111_p5 = por %p9110_p13, %p9109_p6 }
 0x19e   : > { %p9112_p11 = pnand %p9111_p5, %p9105_p7 }
 0x1a0   : > { %9115 = shalt.err (!%p9112_p11)
}
 0x1a1   : > { %7883 = dma.hbm_to_vmem [thread:$0]  (!%p10441_p2), %s9676_s2, 96, %s575_s8, %s9527_s9  }
 0x1a2   : > { %s10444_s22 = sld [smem:[#allocation32_spill]] }
 0x1a8   : > { %p10445_p9 = scmp.ne.s32.totalorder %s10444_s22, 0 }
 0x1a9   : > { %p10446_p12 = scmp.ne.s32.totalorder (!%p10445_p9), %s10416_s24, 0 }
 0x1aa   : > { %583 = sbr.rel (%p10445_p9) target bundleno = 2327 (0x917), region = 76 }
 0x1b1   : > { %9149 = dma.done.wait (%p10446_p12), [#allocation4], 1024  }
 0x1b2   : > { %9151 = vsyncadd (%p10446_p12), [#allocation4], 4294966272 }
 0x1b3   : > { %9153 = dma.done.wait (%p10446_p12), [#allocation6], 2064  }
 0x1b4   : > { %9155 = vsyncadd (%p10446_p12), [#allocation6], 4294965232 }
 0x1b5   : > { %9157 = dma.done.wait (%p10446_p12), [#allocation9], 64  }
 0x1b6   : > { %9159 = vsyncadd (%p10446_p12), [#allocation9], 4294967232 }
 0x1b7   : > { %9161 = dma.done.wait (%p10446_p12), [#allocation12], 8256  }
 0x1b8   : > { %9163 = vsyncadd (%p10446_p12), [#allocation12], 4294959040 }
 0x1b9   : > { %9165 = dma.done.wait (%p10446_p12), [#allocation15], 32832  }
 0x1ba   : > { %9167 = vsyncadd (%p10446_p12), [#allocation15], 4294934464 }
 0x1bb   : > { %9169 = dma.done.wait (%p10446_p12), [#allocation18], 256  }
 0x1bc   : > { %9171 = vsyncadd (%p10446_p12), [#allocation18], 4294967040  ;;  %s10447_s29 = sadd.s32 4294967295, %s9206_s20   ;;  %s631_s27 = sand.u32 1, %s9182_s30  }
 0x1bd   : > { %s629_s9 = sand.u32 1, %s10447_s29   ;;  %s7793_s4 = smul.u32 3072, %s631_s27 }
 0x1be   : > { %s630_s14 = scalar_lea.sflag [#allocation21], %s629_s9  ;;  %p10448_p2 = scmp.ne.s32.totalorder %s10429_s28, 0 }
 0x1bf   : > { %s9727_s6 = scalar_lea.vmem [#allocation20], %s7793_s4 }
 0x1c0   : > { %9173 = dma.done.wait (%p10448_p2), %s630_s14, 49248  }
 0x1c1   : > { %9175 = vsyncadd (%p10448_p2), %s630_s14, 4294918048  ;;  %s10449_s2 = sld [smem:[#allocation31_spill]]  ;;  %s10450_s26 = sld [smem:[#allocation30_spill]] }
 0x1c2   : > { %s9733_s8 = smul.u32 6, %s631_s27  ;;  %s10451_s10 = sld [smem:[#allocation49_spill]] }
 0x1c4   : > { %s642_s25 = scalar_lea.vmem [#allocation22], %s9733_s8 }
 0x1c7   : > { %s6954_s24 = sshll.u32 %s10449_s2, 1  ;;  %p6956_p4 = scmp.ne.s32.totalorder %s10450_s26, 0 }
 0x1c8   : > { %s701_s12 = sadd.s32 %s10450_s26, %s6954_s24  ;;  %v7996_v0 = vld [vmem:[#allocation3] sm:$0xff] (!%p6956_p4)   ;;  %v9232_v1 = vmov (!%p6956_p4), 0.0   ;;  %v7997_v2 = vld [vmem:[#allocation3 + $0x8] sm:$0xff] (!%p6956_p4)   ;;  %vm9233_vm0 = vmmov (!%p6956_p4), 0   ;;  %v7998_v3 = vld [vmem:[#allocation3 + $0x10] sm:$0xff] (!%p6956_p4)   ;;  %s10452_s1 = sld [smem:[#allocation35_spill]] (!%p6956_p4) }
 0x1c9   : > { %s702_s23 = smul.u32 6, %s701_s12  ;;  %7715 = vmatprep.subr.bf16.mxu0 (!%p6956_p4), %v9232_v1  ;;  %7731 = vmatprep.mubr.msk.bf16.mxu0 (!%p6956_p4), %vm9233_vm0, %v9232_v1  ;;  %v8004_v4 = vld [vmem:[#allocation7 + $0x4] ss:$8 sps:$4 sm:$0xff] (!%p6956_p4)   ;;  %v8006_v5 = vld [vmem:[#allocation7] ss:$8 sps:$4 sm:$0xff] (!%p6956_p4)   ;;  %v7999_v6 = vld [vmem:[#allocation3 + $0x18] sm:$0xff] (!%p6956_p4)  }
 0x1ca   : > { %714 = sbr.rel (%p6956_p4) target bundleno = 1713 (0x6b1), region = 132  ;;  %7716 = vmatpush3.bf16.msra.mxu0 (!%p6956_p4), %v7996_v0  ;;  %v8007_v7 = vld [vmem:[#allocation7 + $0x14] ss:$8 sps:$4 sm:$0xff] (!%p6956_p4)   ;;  %927 = vmatprep.subr.bf16.mxu1 (!%p6956_p4), %v8004_v4  ;;  %v8009_v8 = vld [vmem:[#allocation7 + $0x10] ss:$8 sps:$4 sm:$0xff] (!%p6956_p4)   ;;  %v8001_v11 = vld [vmem:[#allocation3 + $0x28] sm:$0xff] (!%p6956_p4)  }
 0x1cb   : > { %p703_p0 = scmp.lt.s32.totalorder %s702_s23, 23  ;;  %7717 = vmatprep.subr.bf16.mxu0 (!%p6956_p4), %v9232_v1  ;;  %928 = vmatpush1.bf16.msra.mxu1 (!%p6956_p4), %v8006_v5  ;;  %v8010_v9 = vld [vmem:[#allocation7 + $0x24] ss:$8 sps:$4 sm:$0xff] (!%p6956_p4)   ;;  %v8012_v12 = vld [vmem:[#allocation7 + $0x20] ss:$8 sps:$4 sm:$0xff] (!%p6956_p4)   ;;  %v8003_v19 = vld [vmem:[#allocation3 + $0x38] sm:$0xff] (!%p6956_p4)  }
 0x1cc   : > { %929 = vmatprep.subr.bf16.mxu1 (!%p6956_p4), %v8007_v7  ;;  %v8000_v10 = vld [vmem:[#allocation3 + $0x20] sm:$0xff] (!%p6956_p4)   ;;  %v8015_v14 = vld [vmem:[#allocation7 + $0x30] ss:$8 sps:$4 sm:$0xff] (!%p6956_p4)   ;;  %v9234_v26 = vmov (!%p6956_p4), 0  }
 0x1cd   : > { %s10469_s23 = smov (!%p703_p0, %s702_s23), 23  ;;  %v8013_v13 = vld [vmem:[#allocation7 + $0x34] ss:$8 sps:$4 sm:$0xff] (!%p6956_p4)   ;;  %v8016_v15 = vld [vmem:[#allocation7 + $0x44] ss:$8 sps:$4 sm:$0xff] (!%p6956_p4)   ;;  %959 = vmatprep.mubr.bf16.mxu1 (!%p6956_p4), %v9234_v26 }
 0x1ce   : > { %s6955_s11 = sshll.u32 %s10469_s23, 3  ;;  %7718 = vmatpush3.bf16.msra.mxu0 (!%p6956_p4), %v7997_v2  ;;  %v8002_v16 = vld [vmem:[#allocation3 + $0x30] sm:$0xff] (!%p6956_p4)   ;;  %v8018_v17 = vld [vmem:[#allocation7 + $0x40] ss:$8 sps:$4 sm:$0xff] (!%p6956_p4)   ;;  %v6957_v32 = vld [vmem:[#allocation5] ss:$0 sm:$0xff] (!%p6956_p4) }
 0x1cf   : > { %s9740_s0 = scalar_lea.vmem %s10451_s10, %s6955_s11  ;;  %7719 = vmatprep.subr.bf16.mxu0 (!%p6956_p4), %v9232_v1  ;;  %930 = vmatpush1.bf16.msra.mxu1 (!%p6956_p4), %v8009_v8  ;;  %v8019_v18 = vld [vmem:[#allocation7 + $0x54] ss:$8 sps:$4 sm:$0xff] (!%p6956_p4)   ;;  %v8021_v20 = vld [vmem:[#allocation7 + $0x50] ss:$8 sps:$4 sm:$0xff] (!%p6956_p4)   ;;  %v8022_v22 = vld [vmem:[#allocation7 + $0x64] ss:$8 sps:$4 sm:$0xff] (!%p6956_p4)  }
 0x1d0   : > { %931 = vmatprep.subr.bf16.mxu1 (!%p6956_p4), %v8010_v9  ;;  %v715_v21 = vld [vmem:[%s10452_s1] sm:$0xf] (!%p6956_p4)  ;;  %v8027_v25 = vld [vmem:[#allocation7 + $0x70] ss:$8 sps:$4 sm:$0xff] (!%p6956_p4)   ;;  %v8028_v27 = vld [vmem:[#allocation11] ss:$16 sps:$4 sm:$0xff] (!%p6956_p4)  }
 0x1d1   : > { %v8024_v23 = vld [vmem:[#allocation7 + $0x60] ss:$8 sps:$4 sm:$0xff]   ;;  %v8025_v24 = vld [vmem:[#allocation7 + $0x74] ss:$8 sps:$4 sm:$0xff]  }
 0x1d2   : > { %7720 = vmatpush3.bf16.msra.mxu0 %v7998_v3  ;;  %v8030_v28 = vld [vmem:[#allocation11 + $0x4] ss:$16 sps:$4 sm:$0xff]   ;;  %v8033_v29 = vld [vmem:[#allocation11 + $0xc] ss:$16 sps:$4 sm:$0xff]   ;;  %v8034_v31 = vld [vmem:[#allocation11 + $0x20] ss:$16 sps:$4 sm:$0xff]  }
 0x1d3   : > { %7721 = vmatprep.subr.bf16.mxu0 %v9232_v1  ;;  %932 = vmatpush1.bf16.msra.mxu1 %v8012_v12  ;;  %v8036_v30 = vld [vmem:[#allocation11 + $0x24] ss:$16 sps:$4 sm:$0xff]   ;;  %v8031_v40 = vld [vmem:[#allocation11 + $0x8] ss:$16 sps:$4 sm:$0xff]   ;;  %v8039_v42 = vld [vmem:[#allocation11 + $0x2c] ss:$16 sps:$4 sm:$0xff]  }
 0x1d4   : > { %933 = vmatprep.subr.bf16.mxu1 %v8013_v13  ;;  %v8037_v43 = vld [vmem:[#allocation11 + $0x28] ss:$16 sps:$4 sm:$0xff]   ;;  %v8042_v44 = vld [vmem:[#allocation11 + $0x44] ss:$16 sps:$4 sm:$0xff]   ;;  %v8045_v45 = vld [vmem:[#allocation11 + $0x4c] ss:$16 sps:$4 sm:$0xff]  }
 0x1d5   : > { %v8040_v46 = vld [vmem:[#allocation11 + $0x40] ss:$16 sps:$4 sm:$0xff]   ;;  %v8043_v47 = vld [vmem:[#allocation11 + $0x48] ss:$16 sps:$4 sm:$0xff]   ;;  %v8048_v48 = vld [vmem:[#allocation11 + $0x64] ss:$16 sps:$4 sm:$0xff]  }
 0x1d6   : > { %7722 = vmatpush3.bf16.msra.mxu0 %v7999_v6  ;;  %v8051_v49 = vld [vmem:[#allocation11 + $0x6c] ss:$16 sps:$4 sm:$0xff]   ;;  %v8046_v50 = vld [vmem:[#allocation11 + $0x60] ss:$16 sps:$4 sm:$0xff]   ;;  %v8049_v51 = vld [vmem:[#allocation11 + $0x68] ss:$16 sps:$4 sm:$0xff]  }
 0x1d7   : > { %7723 = vmatprep.subr.bf16.mxu0 %v9232_v1  ;;  %934 = vmatpush1.bf16.msra.mxu1 %v8015_v14  ;;  %v8054_v52 = vld [vmem:[#allocation11 + $0x84] ss:$16 sps:$4 sm:$0xff]   ;;  %v8057_v53 = vld [vmem:[#allocation11 + $0x8c] ss:$16 sps:$4 sm:$0xff]   ;;  %v8052_v54 = vld [vmem:[#allocation11 + $0x80] ss:$16 sps:$4 sm:$0xff]  }
 0x1d8   : > { %935 = vmatprep.subr.bf16.mxu1 %v8016_v15  ;;  %v8055_v55 = vld [vmem:[#allocation11 + $0x88] ss:$16 sps:$4 sm:$0xff]   ;;  %v8060_v56 = vld [vmem:[#allocation11 + $0xa4] ss:$16 sps:$4 sm:$0xff]   ;;  %v8063_v57 = vld [vmem:[#allocation11 + $0xac] ss:$16 sps:$4 sm:$0xff]  }
 0x1d9   : > { %v8058_v58 = vld [vmem:[#allocation11 + $0xa0] ss:$16 sps:$4 sm:$0xff]   ;;  %v8061_v59 = vld [vmem:[#allocation11 + $0xa8] ss:$16 sps:$4 sm:$0xff]   ;;  %v8066_v60 = vld [vmem:[#allocation11 + $0xc4] ss:$16 sps:$4 sm:$0xff]  }
 0x1da   : > { %7724 = vmatpush3.bf16.msra.mxu0 %v8000_v10  ;;  %v8069_v61 = vld [vmem:[#allocation11 + $0xcc] ss:$16 sps:$4 sm:$0xff]   ;;  %v8064_v62 = vld [vmem:[#allocation11 + $0xc0] ss:$16 sps:$4 sm:$0xff]   ;;  %v8067_v63 = vld [vmem:[#allocation11 + $0xc8] ss:$16 sps:$4 sm:$0xff]  }
 0x1db   : > { %7725 = vmatprep.subr.bf16.mxu0 %v9232_v1  ;;  %936 = vmatpush1.bf16.msra.mxu1 %v8018_v17  ;;  %v8072_v0 = vld [vmem:[#allocation11 + $0xe4] ss:$16 sps:$4 sm:$0xff]   ;;  %v8070_v2 = vld [vmem:[#allocation11 + $0xe0] ss:$16 sps:$4 sm:$0xff]   ;;  %v8073_v3 = vld [vmem:[#allocation11 + $0xe8] ss:$16 sps:$4 sm:$0xff]  }
 0x1dc   : > { %937 = vmatprep.subr.bf16.mxu1 %v8019_v18  ;;  %v8078_v4 = vld [vmem:[#allocation11 + $0x104] ss:$16 sps:$4 sm:$0xff]   ;;  %v8081_v5 = vld [vmem:[#allocation11 + $0x10c] ss:$16 sps:$4 sm:$0xff]   ;;  %v8076_v6 = vld [vmem:[#allocation11 + $0x100] ss:$16 sps:$4 sm:$0xff]  }
 0x1dd   : > { %v8079_v7 = vld [vmem:[#allocation11 + $0x108] ss:$16 sps:$4 sm:$0xff]   ;;  %v8084_v8 = vld [vmem:[#allocation11 + $0x124] ss:$16 sps:$4 sm:$0xff]   ;;  %v8087_v9 = vld [vmem:[#allocation11 + $0x12c] ss:$16 sps:$4 sm:$0xff]  }
 0x1de   : > { %7726 = vmatpush3.bf16.msra.mxu0 %v8001_v11  ;;  %v8082_v10 = vld [vmem:[#allocation11 + $0x120] ss:$16 sps:$4 sm:$0xff]   ;;  %v8085_v11 = vld [vmem:[#allocation11 + $0x128] ss:$16 sps:$4 sm:$0xff]   ;;  %v8090_v12 = vld [vmem:[#allocation11 + $0x144] ss:$16 sps:$4 sm:$0xff]  }
 0x1df   : > { %7727 = vmatprep.subr.bf16.mxu0 %v9232_v1  ;;  %938 = vmatpush1.bf16.msra.mxu1 %v8021_v20  ;;  %v8093_v13 = vld [vmem:[#allocation11 + $0x14c] ss:$16 sps:$4 sm:$0xff]   ;;  %v8088_v14 = vld [vmem:[#allocation11 + $0x140] ss:$16 sps:$4 sm:$0xff]   ;;  %v8091_v15 = vld [vmem:[#allocation11 + $0x148] ss:$16 sps:$4 sm:$0xff]  }
 0x1e0   : > { %939 = vmatprep.subr.bf16.mxu1 %v8022_v22  ;;  %v8099_v17 = vld [vmem:[#allocation11 + $0x16c] ss:$16 sps:$4 sm:$0xff]   ;;  %v8094_v18 = vld [vmem:[#allocation11 + $0x160] ss:$16 sps:$4 sm:$0xff]   ;;  %v8102_v20 = vld [vmem:[#allocation11 + $0x184] ss:$16 sps:$4 sm:$0xff]  }
 0x1e1   : > { %v8100_v22 = vld [vmem:[#allocation11 + $0x180] ss:$16 sps:$4 sm:$0xff]  }
 0x1e2   : > { %7728 = vmatpush3.bf16.msra.mxu0 %v8002_v16  ;;  %v8096_v16 = vld [vmem:[#allocation11 + $0x164] ss:$16 sps:$4 sm:$0xff]   ;;  %v8106_v26 = vld [vmem:[#allocation11 + $0x1a0] ss:$16 sps:$4 sm:$0xff]  }
 0x1e3   : > { %7729 = vmatprep.subr.bf16.mxu0 %v9232_v1  ;;  %940 = vmatpush1.bf16.msra.mxu1 %v8024_v23  ;;  %v8075_v1 = vld [vmem:[#allocation11 + $0xec] ss:$16 sps:$4 sm:$0xff]   ;;  %v8103_v23 = vld [vmem:[#allocation11 + $0x188] ss:$16 sps:$4 sm:$0xff]  }
 0x1e4   : > { %941 = vmatprep.subr.bf16.mxu1 %v8025_v24  ;;  %v8108_v24 = vld [vmem:[#allocation11 + $0x1a4] ss:$16 sps:$4 sm:$0xff]  }
 0x1e6   : > { %7730 = vmatpush3.bf16.msra.mxu0 %v8003_v19  ;;  %v8097_v19 = vld [vmem:[#allocation11 + $0x168] ss:$16 sps:$4 sm:$0xff]  }
 0x1e7   : > { %942 = vmatpush1.bf16.msra.mxu1 %v8027_v25  ;;  %1427 = vmatprep.subr.bf16.mxu0 %v8030_v28  ;;  %v8111_v25 = vld [vmem:[#allocation11 + $0x1ac] ss:$16 sps:$4 sm:$0xff]   ;;  %v8114_v28 = vld [vmem:[#allocation11 + $0x1c4] ss:$16 sps:$4 sm:$0xff]  }
 0x1e8   : > { %1468 = vmatprep.subr.bf16.mxu1 %v8033_v29  ;;  %v8117_v29 = vld [vmem:[#allocation11 + $0x1cc] ss:$16 sps:$4 sm:$0xff]  }
 0x1e9   : > { %7732 = vmatmul.mubr.bf16.vlgmr.msra.gmra.mrb[0].mxu0 %v715_v21  ;;  %v8105_v21 = vld [vmem:[#allocation11 + $0x18c] ss:$16 sps:$4 sm:$0xff]  }
 0x1ea   : > { %1428 = vmatpush1.bf16.msra.mxu0 %v8028_v27  ;;  %v8109_v27 = vld [vmem:[#allocation11 + $0x1a8] ss:$16 sps:$4 sm:$0xff]  }
 0x1eb   : > { %1429 = vmatprep.subr.bf16.mxu0 %v8036_v30  ;;  %v8112_v30 = vld [vmem:[#allocation11 + $0x1c0] ss:$16 sps:$4 sm:$0xff]  }
 0x1ee   : > { %1430 = vmatpush1.bf16.msra.mxu0 %v8034_v31  ;;  %v8115_v31 = vld [vmem:[#allocation11 + $0x1c8] ss:$16 sps:$4 sm:$0xff]  }
 0x1ef   : > { %1431 = vmatprep.subr.bf16.mxu0 %v8042_v44 }
 0x1f2   : > { %1432 = vmatpush1.bf16.msra.mxu0 %v8040_v46 }
 0x1f3   : > { %1433 = vmatprep.subr.bf16.mxu0 %v8048_v48 }
 0x1f6   : > { %1434 = vmatpush1.bf16.msra.mxu0 %v8046_v50 }
 0x1f7   : > { %1435 = vmatprep.subr.bf16.mxu0 %v8054_v52 }
 0x1fa   : > { %1436 = vmatpush1.bf16.msra.mxu0 %v8052_v54 }
 0x1fb   : > { %1437 = vmatprep.subr.bf16.mxu0 %v8060_v56 }
 0x1fe   : > { %1438 = vmatpush1.bf16.msra.mxu0 %v8058_v58 }
 0x1ff   : > { %1439 = vmatprep.subr.bf16.mxu0 %v8066_v60 }
 0x202   : > { %1440 = vmatpush1.bf16.msra.mxu0 %v8064_v62 }
 0x203   : > { %1441 = vmatprep.subr.bf16.mxu0 %v8072_v0 }
 0x206   : > { %1442 = vmatpush1.bf16.msra.mxu0 %v8070_v2 }
 0x207   : > { %1443 = vmatprep.subr.bf16.mxu0 %v8078_v4 }
 0x20a   : > { %1444 = vmatpush1.bf16.msra.mxu0 %v8076_v6 }
 0x20b   : > { %1445 = vmatprep.subr.bf16.mxu0 %v8084_v8 }
 0x20e   : > { %1446 = vmatpush1.bf16.msra.mxu0 %v8082_v10 }
 0x20f   : > { %1447 = vmatprep.subr.bf16.mxu0 %v8090_v12 }
 0x212   : > { %1448 = vmatpush1.bf16.msra.mxu0 %v8088_v14 }
 0x213   : > { %1449 = vmatprep.subr.bf16.mxu0 %v8096_v16 }
 0x216   : > { %1450 = vmatpush1.bf16.msra.mxu0 %v8094_v18 }
 0x217   : > { %1451 = vmatprep.subr.bf16.mxu0 %v8102_v20 }
 0x21a   : > { %1452 = vmatpush1.bf16.msra.mxu0 %v8100_v22 }
 0x21b   : > { %1453 = vmatprep.subr.bf16.mxu0 %v8108_v24 }
 0x21e   : > { %1454 = vmatpush1.bf16.msra.mxu0 %v8106_v26 }
 0x21f   : > { %1455 = vmatprep.subr.bf16.mxu0 %v8114_v28 }
 0x222   : > { %1456 = vmatpush1.bf16.msra.mxu0 %v8112_v30 }
 0x2bc   : > { %v821_v33 = vpop.f32.mrb[0].mxu0 }
 0x2bd   : > { %v822_v34 = vadd.f32 %v6957_v32, %v821_v33  ;;  %v7733_v35 = vpop.f32.mrb[1].mxu0  ;;  %v8120_v32 = vld [vmem:[#allocation11 + $0x1e4] ss:$16 sps:$4 sm:$0xff]   ;;  %v8123_v33 = vld [vmem:[#allocation11 + $0x1ec] ss:$16 sps:$4 sm:$0xff]  }
 0x2be   : > { %v824_v36 = vpop.f32.mrb[2].mxu0  ;;  %v8121_v35 = vld [vmem:[#allocation11 + $0x1e8] ss:$16 sps:$4 sm:$0xff]   ;;  %1457 = vmatprep.subr.bf16.mxu0 %v8120_v32 }
 0x2bf   : > { %vm827_vm1 = vcmp.gt.f32.partialorder %v822_v34, 0.0  ;;  %v828_v37 = vmul.f32 0.2, %v822_v34  ;;  %v7734_v38 = vpop.f32.mrb[3].mxu0  ;;  %v9747_v36 = vld [vmem:[#allocation16] sm:$0xff] }
 0x2c0   : > { %v9751_v38 = vld [vmem:[#allocation16 + $0x8] sm:$0xff] }
 0x2c1   : > { %v829_v39 = vsel %vm827_vm1, %v822_v34, %v828_v37  ;;  %v8118_v34 = vld [vmem:[#allocation11 + $0x1e0] ss:$16 sps:$4 sm:$0xff]   ;;  %v9749_v37 = vld [vmem:[#allocation16 + $0x20] sm:$0xff] }
 0x2c2   : > { %v830_v41 = vpack.c.bf16 %v829_v39, %v829_v39  ;;  %1458 = vmatpush1.bf16.msra.mxu0 %v8118_v34  ;;  %v7046_v39 = vcombine.low %v9747_v36, %v9749_v37 }
 0x2c4   : > { %960 = vmatmul.mubr.bf16.vlgmr.msra.gmra.mrb[0].mxu1 %v830_v41  ;;  %v9757_v41 = vld [vmem:[#allocation16 + $0x28] sm:$0xff] }
 0x2c5   : > { %1469 = vmatpush1.bf16.msra.mxu1 %v8031_v40  ;;  %v7047_v40 = vcombine.high %v9747_v36, %v9749_v37  ;;  %v1677_v36 = vld [vmem:[#allocation16 + $0xc0] sm:$0xff] }
 0x2c6   : > { %1470 = vmatprep.subr.bf16.mxu1 %v8039_v42  ;;  %v7048_v42 = vcombine.low %v9751_v38, %v9757_v41  ;;  %v1681_v37 = vld [vmem:[#allocation16 + $0xe0] sm:$0xff] }
 0x2c7   : > { %3189 = vmatprep.subr.bf16.mxu0 %v7047_v40 }
 0x2c9   : > { %1471 = vmatpush1.bf16.msra.mxu1 %v8037_v43  ;;  %v7049_v43 = vcombine.high %v9751_v38, %v9757_v41  ;;  %v1678_v38 = vld [vmem:[#allocation16 + $0xc8] sm:$0xff] }
 0x2ca   : > { %1472 = vmatprep.subr.bf16.mxu1 %v8045_v45  ;;  %v1682_v41 = vld [vmem:[#allocation16 + $0xe8] sm:$0xff] }
 0x2cd   : > { %1473 = vmatpush1.bf16.msra.mxu1 %v8043_v47 }
 0x2ce   : > { %1474 = vmatprep.subr.bf16.mxu1 %v8051_v49 }
 0x2d1   : > { %1475 = vmatpush1.bf16.msra.mxu1 %v8049_v51 }
 0x2d2   : > { %1476 = vmatprep.subr.bf16.mxu1 %v8057_v53 }
 0x2d5   : > { %1477 = vmatpush1.bf16.msra.mxu1 %v8055_v55 }
 0x2d6   : > { %1478 = vmatprep.subr.bf16.mxu1 %v8063_v57 }
 0x2d9   : > { %1479 = vmatpush1.bf16.msra.mxu1 %v8061_v59 }
 0x2da   : > { %1480 = vmatprep.subr.bf16.mxu1 %v8069_v61 }
 0x2dd   : > { %1481 = vmatpush1.bf16.msra.mxu1 %v8067_v63 }
 0x2de   : > { %1482 = vmatprep.subr.bf16.mxu1 %v8075_v1 }
 0x2e1   : > { %1483 = vmatpush1.bf16.msra.mxu1 %v8073_v3 }
 0x2e2   : > { %1484 = vmatprep.subr.bf16.mxu1 %v8081_v5 }
 0x2e5   : > { %1485 = vmatpush1.bf16.msra.mxu1 %v8079_v7 }
 0x2e6   : > { %1486 = vmatprep.subr.bf16.mxu1 %v8087_v9 }
 0x2e9   : > { %1487 = vmatpush1.bf16.msra.mxu1 %v8085_v11 }
 0x2ea   : > { %1488 = vmatprep.subr.bf16.mxu1 %v8093_v13 }
 0x2ed   : > { %1489 = vmatpush1.bf16.msra.mxu1 %v8091_v15  ;;  %v1010_v15 = vlaneseq }
 0x2ee   : > { %1490 = vmatprep.subr.bf16.mxu1 %v8099_v17 }
 0x2f1   : > { %1491 = vmatpush1.bf16.msra.mxu1 %v8097_v19  ;;  %v9763_v19 = vshrl.u32 %v1010_v15, 7 }
 0x2f2   : > { %1492 = vmatprep.subr.bf16.mxu1 %v8105_v21  ;;  %v968_v21 = vld [vmem:[#allocation8] sm:$0x3] }
 0x2f3   : > { %v9766_v20 = vsub.s32 0, %v9763_v19  ;;  %v9769_v22 = vsub.s32 1, %v9763_v19 }
 0x2f5   : > { %1493 = vmatpush1.bf16.msra.mxu1 %v8103_v23  ;;  %v969_v23 = vld [vmem:[#allocation10] sm:$0x3]  ;;  %v1013_v24 = vrot.slane %v968_v21, %v9766_v20  ;;  %v1017_v26 = vrot.slane %v968_v21, %v9769_v22  ;;  %v1705_v21 = vld [vmem:[#allocation16 + $0x1a0] sm:$0xff] }
 0x2f6   : > { %1494 = vmatprep.subr.bf16.mxu1 %v8111_v25 }
 0x2f9   : > { %1495 = vmatpush1.bf16.msra.mxu1 %v8109_v27 }
 0x2fa   : > { %1496 = vmatprep.subr.bf16.mxu1 %v8117_v29  ;;  %v1026_v29 = vrot.slane %v969_v23, %v9766_v20 }
 0x2fd   : > { %1497 = vmatpush1.bf16.msra.mxu1 %v8115_v31  ;;  %v1030_v31 = vrot.slane %v969_v23, %v9769_v22  ;;  %v1702_v23 = vld [vmem:[#allocation16 + $0x188] sm:$0xff] }
 0x2fe   : > { %1498 = vmatprep.subr.bf16.mxu1 %v8123_v33 }
 0x301   : > { %1499 = vmatpush1.bf16.msra.mxu1 %v8121_v35 }
 0x302   : > { %3271 = vmatprep.subr.bf16.mxu1 %v7049_v43 }
 0x397   : > { %v961_v44 = vpop.f32.mrb[0].mxu1 }
 0x398   : > { %v970_v45 = vrot.slane %v961_v44, 4  ;;  %v963_v46 = vpop.f32.mrb[1].mxu1 }
 0x399   : > { %v976_v47 = vrot.slane %v963_v46, 4  ;;  %v965_v48 = vpop.f32.mrb[2].mxu1 }
 0x39a   : > { %v971_v49 = vadd.f32 %v970_v45, %v961_v44  ;;  %v966_v50 = vpop.f32.mrb[3].mxu1  ;;  %v1666_v48 = vld [vmem:[#allocation16 + $0x68] sm:$0xff] }
 0x39b   : > { %v977_v51 = vadd.f32 %v976_v47, %v963_v46  ;;  %v1662_v47 = vld [vmem:[#allocation16 + $0x48] sm:$0xff] }
 0x39c   : > { %v972_v52 = vrot.slane %v971_v49, 2 }
 0x39d   : > { %v978_v53 = vrot.slane %v977_v51, 2 }
 0x39e   : > { %v973_v54 = vadd.f32 %v972_v52, %v971_v49 }
 0x39f   : > { %v979_v55 = vadd.f32 %v978_v53, %v977_v51  ;;  %v7057_v53 = vcombine.high %v1662_v47, %v1666_v48 }
 0x3a0   : > { %v974_v56 = vrot.slane %v973_v54, 1 }
 0x3a1   : > { %v980_v57 = vrot.slane %v979_v55, 1 }
 0x3a2   : > { %v975_v58 = vadd.f32 %v974_v56, %v973_v54  ;;  %v1669_v56 = vld [vmem:[#allocation16 + $0x80] sm:$0xff] }
 0x3a3   : > { %v981_v59 = vadd.f32 %v980_v57, %v979_v55  ;;  %v7056_v55 = vcombine.low %v1662_v47, %v1666_v48  ;;  %v1673_v57 = vld [vmem:[#allocation16 + $0xa0] sm:$0xff]  ;;  %v1722_v47 = vld [vmem:[#allocation16 + $0x228] sm:$0xff] }
 0x3a4   : > { %v983_v60 = vmul.f32 0.125, %v975_v58  ;;  %v1670_v58 = vld [vmem:[#allocation16 + $0x88] sm:$0xff] }
 0x3a5   : > { %v984_v61 = vmul.f32 0.125, %v981_v59  ;;  %v7063_v59 = vcombine.high %v1669_v56, %v1673_v57 }
 0x3a6   : > { %v985_v62 = vsub.f32 %v961_v44, %v983_v60  ;;  %v1661_v44 = vld [vmem:[#allocation16 + $0x40] sm:$0xff]  ;;  %v1674_v60 = vld [vmem:[#allocation16 + $0xa8] sm:$0xff] }
 0x3a7   : > { %v986_v63 = vsub.f32 %v963_v46, %v984_v61  ;;  %v1665_v46 = vld [vmem:[#allocation16 + $0x60] sm:$0xff]  ;;  %v7062_v61 = vcombine.low %v1669_v56, %v1673_v57 }
 0x3a8   : > { %v987_v0 = vmul.f32 %v985_v62, %v985_v62  ;;  %v7055_v52 = vcombine.high %v1661_v44, %v1665_v46  ;;  %v7054_v54 = vcombine.low %v1661_v44, %v1665_v46  ;;  %v1721_v44 = vld [vmem:[#allocation16 + $0x220] sm:$0xff] }
 0x3a9   : > { %v988_v1 = vmul.f32 %v986_v63, %v986_v63 }
 0x3aa   : > { %v989_v2 = vrot.slane %v987_v0, 4 }
 0x3ab   : > { %v995_v3 = vrot.slane %v988_v1, 4 }
 0x3ac   : > { %v990_v4 = vadd.f32 %v989_v2, %v987_v0  ;;  %v7072_v0 = vcombine.low %v1678_v38, %v1682_v41  ;;  %v1685_v2 = vld [vmem:[#allocation16 + $0x100] sm:$0xff] }
 0x3ad   : > { %v996_v5 = vadd.f32 %v995_v3, %v988_v1  ;;  %v7073_v1 = vcombine.high %v1678_v38, %v1682_v41  ;;  %v1689_v3 = vld [vmem:[#allocation16 + $0x120] sm:$0xff] }
 0x3ae   : > { %v991_v6 = vrot.slane %v990_v4, 2  ;;  %v1745_v41 = vld [vmem:[#allocation16 + $0x2e0] sm:$0xff] }
 0x3af   : > { %v997_v7 = vrot.slane %v996_v5, 2 }
 0x3b0   : > { %v992_v8 = vadd.f32 %v991_v6, %v990_v4  ;;  %v1686_v4 = vld [vmem:[#allocation16 + $0x108] sm:$0xff] }
 0x3b1   : > { %v998_v9 = vadd.f32 %v997_v7, %v996_v5  ;;  %v7079_v5 = vcombine.high %v1685_v2, %v1689_v3  ;;  %v1690_v6 = vld [vmem:[#allocation16 + $0x128] sm:$0xff]  ;;  %v7078_v7 = vcombine.low %v1685_v2, %v1689_v3 }
 0x3b2   : > { %v993_v10 = vrot.slane %v992_v8, 1 }
 0x3b3   : > { %v999_v11 = vrot.slane %v998_v9, 1 }
 0x3b4   : > { %v994_v12 = vadd.f32 %v993_v10, %v992_v8  ;;  %v7080_v8 = vcombine.low %v1686_v4, %v1690_v6  ;;  %v1693_v10 = vld [vmem:[#allocation16 + $0x140] sm:$0xff] }
 0x3b5   : > { %v1000_v13 = vadd.f32 %v999_v11, %v998_v9  ;;  %v7081_v9 = vcombine.high %v1686_v4, %v1690_v6  ;;  %v1697_v11 = vld [vmem:[#allocation16 + $0x160] sm:$0xff] }
 0x3b6   : > { %v1001_v14 = vmul.f32 0.125, %v994_v12  ;;  %v1694_v12 = vld [vmem:[#allocation16 + $0x148] sm:$0xff]  ;;  %v7086_v15 = vcombine.low %v1693_v10, %v1697_v11  ;;  %v1753_v6 = vld [vmem:[#allocation16 + $0x320] sm:$0xff] }
 0x3b7   : > { %v1002_v16 = vmul.f32 0.125, %v1000_v13  ;;  %v7087_v13 = vcombine.high %v1693_v10, %v1697_v11 }
 0x3b8   : > { %v1003_v17 = vadd.f32 0.8, %v1001_v14  ;;  %v1698_v14 = vld [vmem:[#allocation16 + $0x168] sm:$0xff] }
 0x3b9   : > { %v1004_v18 = vadd.f32 0.8, %v1002_v16  ;;  %v7088_v16 = vcombine.low %v1694_v12, %v1698_v14 }
 0x3ba   : > { %8124 = vrsqrt.f32 %v1003_v17  ;;  %v7089_v17 = vcombine.high %v1694_v12, %v1698_v14  ;;  %v1761_v14 = vld [vmem:[#allocation16 + $0x360] sm:$0xff] }
 0x3bb   : > { %8126 = vrsqrt.f32 %v1004_v18  ;;  %v1701_v18 = vld [vmem:[#allocation16 + $0x180] sm:$0xff] }
 0x3c4   : > { %v8125_v25 = vpop.eup %8124 }
 0x3c5   : > { %v8127_v27 = vpop.eup %8126  ;;  %v1007_v28 = vmul.f32 %v8125_v25, %v985_v62  ;;  %v7064_v62 = vcombine.low %v1670_v58, %v1674_v60  ;;  %v1706_v25 = vld [vmem:[#allocation16 + $0x1a8] sm:$0xff] }
 0x3c6   : > { %v1008_v30 = vmul.f32 %v8127_v27, %v986_v63  ;;  %v7065_v63 = vcombine.high %v1670_v58, %v1674_v60  ;;  %v7096_v27 = vcombine.low %v1702_v23, %v1706_v25  ;;  %v1737_v60 = vld [vmem:[#allocation16 + $0x2a0] sm:$0xff] }
 0x3c7   : > { %v1020_v32 = vmul.f32 %v1013_v24, %v1007_v28  ;;  %v7095_v24 = vcombine.high %v1701_v18, %v1705_v21  ;;  %v7097_v28 = vcombine.high %v1702_v23, %v1706_v25  ;;  %v1769_v25 = vld [vmem:[#allocation16 + $0x3a0] sm:$0xff] }
 0x3c8   : > { %v1021_v33 = vmul.f32 %v1017_v26, %v1008_v30  ;;  %v7094_v26 = vcombine.low %v1701_v18, %v1705_v21  ;;  %v1713_v30 = vld [vmem:[#allocation16 + $0x1e0] sm:$0xff] }
 0x3c9   : > { %v1033_v34 = vadd.f32 %v1026_v29, %v1020_v32  ;;  %v1709_v29 = vld [vmem:[#allocation16 + $0x1c0] sm:$0xff] }
 0x3ca   : > { %v1034_v35 = vadd.f32 %v1030_v31, %v1021_v33  ;;  %v1710_v31 = vld [vmem:[#allocation16 + $0x1c8] sm:$0xff]  ;;  %v7103_v32 = vcombine.high %v1709_v29, %v1713_v30 }
 0x3cb   : > { %vm1035_vm2 = vcmp.gt.f32.partialorder %v1033_v34, 0.0  ;;  %v1037_v40 = vmul.f32 0.2, %v1033_v34  ;;  %v1714_v33 = vld [vmem:[#allocation16 + $0x1e8] sm:$0xff] }
 0x3cc   : > { %vm1036_vm3 = vcmp.gt.f32.partialorder %v1034_v35, 0.0  ;;  %v1038_v43 = vmul.f32 0.2, %v1034_v35 }
 0x3cd   : > { %v1039_v45 = vsel %vm1035_vm2, %v1033_v34, %v1037_v40  ;;  %v7102_v34 = vcombine.low %v1709_v29, %v1713_v30  ;;  %v7105_v40 = vcombine.high %v1710_v31, %v1714_v33 }
 0x3ce   : > { %v1040_v49 = vsel %vm1036_vm3, %v1034_v35, %v1038_v43  ;;  %v1041_v51 = vpack.c.bf16 %v1039_v45, %v1039_v45  ;;  %v7104_v35 = vcombine.low %v1710_v31, %v1714_v33  ;;  %v1717_v43 = vld [vmem:[#allocation16 + $0x200] sm:$0xff]  ;;  %v1718_v45 = vld [vmem:[#allocation16 + $0x208] sm:$0xff] }
 0x3cf   : > { %v1042_v50 = vpack.c.bf16 %v1040_v49, %v1040_v49  ;;  %v7111_v46 = vcombine.high %v1717_v43, %v1721_v44  ;;  %v7110_v48 = vcombine.low %v1717_v43, %v1721_v44  ;;  %v7112_v49 = vcombine.low %v1718_v45, %v1722_v47  ;;  %v1777_v33 = vld [vmem:[#allocation16 + $0x3e0] sm:$0xff]  ;;  %v1778_v43 = vld [vmem:[#allocation16 + $0x3e8] sm:$0xff] }
 0x3d1   : > { %1459 = vmatprep.mubr.bf16.mxu0 %v1042_v50  ;;  %1500 = vmatprep.mubr.bf16.mxu1 %v1042_v50  ;;  %v7113_v50 = vcombine.high %v1718_v45, %v1722_v47  ;;  %v9783_v47 = vld [vmem:[#allocation16 + $0x420] sm:$0xff] }
 0x3d2   : > { %1460 = vmatmul.mubr.bf16.vlgmr.msra.gmra.mrb[4].mxu0 %v1041_v51  ;;  %1501 = vmatmul.mubr.bf16.vlgmr.msra.gmra.mrb[4].mxu1 %v1041_v51  ;;  %v1725_v51 = vld [vmem:[#allocation16 + $0x240] sm:$0xff] }
 0x3d3   : > { %3190 = vmatpush1.bf16.msra.mxu0 %v7046_v39  ;;  %3272 = vmatpush1.bf16.msra.mxu1 %v7048_v42  ;;  %v7071_v39 = vcombine.high %v1677_v36, %v1681_v37  ;;  %v7070_v42 = vcombine.low %v1677_v36, %v1681_v37 }
 0x3d4   : > { %3191 = vmatprep.subr.bf16.mxu0 %v7055_v52  ;;  %3273 = vmatprep.subr.bf16.mxu1 %v7057_v53  ;;  %v1729_v52 = vld [vmem:[#allocation16 + $0x260] sm:$0xff]  ;;  %v1726_v53 = vld [vmem:[#allocation16 + $0x248] sm:$0xff] }
 0x3d5   : > { %v7118_v56 = vcombine.low %v1725_v51, %v1729_v52 }
 0x3d7   : > { %3192 = vmatpush1.bf16.msra.mxu0 %v7054_v54  ;;  %3274 = vmatpush1.bf16.msra.mxu1 %v7056_v55  ;;  %v7119_v54 = vcombine.high %v1725_v51, %v1729_v52  ;;  %v1730_v55 = vld [vmem:[#allocation16 + $0x268] sm:$0xff] }
 0x3d8   : > { %3193 = vmatprep.subr.bf16.mxu0 %v7063_v59  ;;  %3275 = vmatprep.subr.bf16.mxu1 %v7065_v63  ;;  %v7120_v57 = vcombine.low %v1726_v53, %v1730_v55  ;;  %v7121_v58 = vcombine.high %v1726_v53, %v1730_v55  ;;  %v1733_v59 = vld [vmem:[#allocation16 + $0x280] sm:$0xff]  ;;  %v1738_v63 = vld [vmem:[#allocation16 + $0x2a8] sm:$0xff] }
 0x3d9   : > { %v7126_v36 = vcombine.low %v1733_v59, %v1737_v60 }
 0x3db   : > { %3194 = vmatpush1.bf16.msra.mxu0 %v7062_v61  ;;  %3276 = vmatpush1.bf16.msra.mxu1 %v7064_v62  ;;  %v1734_v61 = vld [vmem:[#allocation16 + $0x288] sm:$0xff]  ;;  %v7127_v62 = vcombine.high %v1733_v59, %v1737_v60 }
 0x3dc   : > { %3195 = vmatprep.subr.bf16.mxu0 %v7071_v39  ;;  %3277 = vmatprep.subr.bf16.mxu1 %v7073_v1  ;;  %v7128_v37 = vcombine.low %v1734_v61, %v1738_v63  ;;  %v7129_v38 = vcombine.high %v1734_v61, %v1738_v63  ;;  %v1741_v39 = vld [vmem:[#allocation16 + $0x2c0] sm:$0xff]  ;;  %v1746_v1 = vld [vmem:[#allocation16 + $0x2e8] sm:$0xff] }
 0x3dd   : > { %v7134_v2 = vcombine.low %v1741_v39, %v1745_v41 }
 0x3df   : > { %3196 = vmatpush1.bf16.msra.mxu0 %v7070_v42  ;;  %3278 = vmatpush1.bf16.msra.mxu1 %v7072_v0  ;;  %v1742_v42 = vld [vmem:[#allocation16 + $0x2c8] sm:$0xff]  ;;  %v7135_v0 = vcombine.high %v1741_v39, %v1745_v41 }
 0x3e0   : > { %3197 = vmatprep.subr.bf16.mxu0 %v7079_v5  ;;  %3279 = vmatprep.subr.bf16.mxu1 %v7081_v9  ;;  %v7136_v3 = vcombine.low %v1742_v42, %v1746_v1  ;;  %v7137_v4 = vcombine.high %v1742_v42, %v1746_v1  ;;  %v1749_v5 = vld [vmem:[#allocation16 + $0x300] sm:$0xff]  ;;  %v1754_v9 = vld [vmem:[#allocation16 + $0x328] sm:$0xff] }
 0x3e1   : > { %v7142_v10 = vcombine.low %v1749_v5, %v1753_v6 }
 0x3e3   : > { %3198 = vmatpush1.bf16.msra.mxu0 %v7078_v7  ;;  %3280 = vmatpush1.bf16.msra.mxu1 %v7080_v8  ;;  %v1750_v7 = vld [vmem:[#allocation16 + $0x308] sm:$0xff]  ;;  %v7143_v8 = vcombine.high %v1749_v5, %v1753_v6 }
 0x3e4   : > { %3199 = vmatprep.subr.bf16.mxu0 %v7087_v13  ;;  %3281 = vmatprep.subr.bf16.mxu1 %v7089_v17  ;;  %v7144_v11 = vcombine.low %v1750_v7, %v1754_v9  ;;  %v7145_v12 = vcombine.high %v1750_v7, %v1754_v9  ;;  %v1757_v13 = vld [vmem:[#allocation16 + $0x340] sm:$0xff]  ;;  %v1762_v17 = vld [vmem:[#allocation16 + $0x368] sm:$0xff] }
 0x3e5   : > { %v7150_v18 = vcombine.low %v1757_v13, %v1761_v14 }
 0x3e7   : > { %3200 = vmatpush1.bf16.msra.mxu0 %v7086_v15  ;;  %3282 = vmatpush1.bf16.msra.mxu1 %v7088_v16  ;;  %v1758_v15 = vld [vmem:[#allocation16 + $0x348] sm:$0xff]  ;;  %v7151_v16 = vcombine.high %v1757_v13, %v1761_v14 }
 0x3e8   : > { %3201 = vmatprep.subr.bf16.mxu0 %v7095_v24  ;;  %3283 = vmatprep.subr.bf16.mxu1 %v7097_v28  ;;  %v7152_v21 = vcombine.low %v1758_v15, %v1762_v17  ;;  %v7153_v23 = vcombine.high %v1758_v15, %v1762_v17  ;;  %v1765_v24 = vld [vmem:[#allocation16 + $0x380] sm:$0xff]  ;;  %v1770_v28 = vld [vmem:[#allocation16 + $0x3a8] sm:$0xff] }
 0x3e9   : > { %v7158_v29 = vcombine.low %v1765_v24, %v1769_v25 }
 0x3eb   : > { %3202 = vmatpush1.bf16.msra.mxu0 %v7094_v26  ;;  %3284 = vmatpush1.bf16.msra.mxu1 %v7096_v27  ;;  %v1766_v26 = vld [vmem:[#allocation16 + $0x388] sm:$0xff]  ;;  %v7159_v27 = vcombine.high %v1765_v24, %v1769_v25 }
 0x3ec   : > { %3203 = vmatprep.subr.bf16.mxu0 %v7103_v32  ;;  %3285 = vmatprep.subr.bf16.mxu1 %v7105_v40  ;;  %v7160_v30 = vcombine.low %v1766_v26, %v1770_v28  ;;  %v7161_v31 = vcombine.high %v1766_v26, %v1770_v28  ;;  %v1773_v32 = vld [vmem:[#allocation16 + $0x3c0] sm:$0xff] }
 0x3ed   : > { %v7167_v40 = vcombine.high %v1773_v32, %v1777_v33 }
 0x3ef   : > { %3204 = vmatpush1.bf16.msra.mxu0 %v7102_v34  ;;  %3286 = vmatpush1.bf16.msra.mxu1 %v7104_v35  ;;  %v1774_v34 = vld [vmem:[#allocation16 + $0x3c8] sm:$0xff]  ;;  %v7166_v35 = vcombine.low %v1773_v32, %v1777_v33 }
 0x3f0   : > { %3205 = vmatprep.subr.bf16.mxu0 %v7111_v46  ;;  %3287 = vmatprep.subr.bf16.mxu1 %v7113_v50  ;;  %v7168_v44 = vcombine.low %v1774_v34, %v1778_v43  ;;  %v7169_v45 = vcombine.high %v1774_v34, %v1778_v43  ;;  %v9781_v46 = vld [vmem:[#allocation16 + $0x400] sm:$0xff]  ;;  %v9789_v50 = vld [vmem:[#allocation16 + $0x428] sm:$0xff] }
 0x3f1   : > { %v7174_v51 = vcombine.low %v9781_v46, %v9783_v47 }
 0x3f3   : > { %3206 = vmatpush1.bf16.msra.mxu0 %v7110_v48  ;;  %3288 = vmatpush1.bf16.msra.mxu1 %v7112_v49  ;;  %v9785_v48 = vld [vmem:[#allocation16 + $0x408] sm:$0xff]  ;;  %v7175_v49 = vcombine.high %v9781_v46, %v9783_v47 }
 0x3f4   : > { %3207 = vmatprep.subr.bf16.mxu0 %v7119_v54  ;;  %3289 = vmatprep.subr.bf16.mxu1 %v7121_v58  ;;  %v7176_v52 = vcombine.low %v9785_v48, %v9789_v50  ;;  %v7177_v53 = vcombine.high %v9785_v48, %v9789_v50 }
 0x3f7   : > { %3208 = vmatpush1.bf16.msra.mxu0 %v7118_v56  ;;  %3290 = vmatpush1.bf16.msra.mxu1 %v7120_v57 }
 0x3f8   : > { %3209 = vmatprep.subr.bf16.mxu0 %v7127_v62  ;;  %3291 = vmatprep.subr.bf16.mxu1 %v7129_v38 }
 0x3fb   : > { %3210 = vmatpush1.bf16.msra.mxu0 %v7126_v36  ;;  %3292 = vmatpush1.bf16.msra.mxu1 %v7128_v37 }
 0x3fc   : > { %3211 = vmatprep.subr.bf16.mxu0 %v7135_v0  ;;  %3293 = vmatprep.subr.bf16.mxu1 %v7137_v4 }
 0x3ff   : > { %3212 = vmatpush1.bf16.msra.mxu0 %v7134_v2  ;;  %3294 = vmatpush1.bf16.msra.mxu1 %v7136_v3 }
 0x400   : > { %3213 = vmatprep.subr.bf16.mxu0 %v7143_v8  ;;  %3295 = vmatprep.subr.bf16.mxu1 %v7145_v12 }
 0x403   : > { %3214 = vmatpush1.bf16.msra.mxu0 %v7142_v10  ;;  %3296 = vmatpush1.bf16.msra.mxu1 %v7144_v11 }
 0x404   : > { %3215 = vmatprep.subr.bf16.mxu0 %v7151_v16  ;;  %3297 = vmatprep.subr.bf16.mxu1 %v7153_v23 }
 0x407   : > { %3216 = vmatpush1.bf16.msra.mxu0 %v7150_v18  ;;  %3298 = vmatpush1.bf16.msra.mxu1 %v7152_v21 }
 0x408   : > { %3217 = vmatprep.subr.bf16.mxu0 %v7159_v27  ;;  %3299 = vmatprep.subr.bf16.mxu1 %v7161_v31 }
 0x40b   : > { %3218 = vmatpush1.bf16.msra.mxu0 %v7158_v29  ;;  %3300 = vmatpush1.bf16.msra.mxu1 %v7160_v30 }
 0x40c   : > { %3219 = vmatprep.subr.bf16.mxu0 %v7167_v40  ;;  %3301 = vmatprep.subr.bf16.mxu1 %v7169_v45 }
 0x40f   : > { %3220 = vmatpush1.bf16.msra.mxu0 %v7166_v35  ;;  %3302 = vmatpush1.bf16.msra.mxu1 %v7168_v44 }
 0x410   : > { %3230 = vmatprep.subr.bf16.mxu0 %v7175_v49  ;;  %3312 = vmatprep.subr.bf16.mxu1 %v7177_v53 }
 0x4a5   : > { %v1461_v54 = vpop.f32.mrb[4].mxu0  ;;  %v1502_v55 = vpop.f32.mrb[4].mxu1 }
 0x4a6   : > { %v1511_v56 = vrot.slane %v1461_v54, 4  ;;  %v1523_v57 = vrot.slane %v1502_v55, 4  ;;  %v1463_v58 = vpop.f32.mrb[5].mxu0  ;;  %v1504_v59 = vpop.f32.mrb[5].mxu1 }
 0x4a7   : > { %v1517_v60 = vrot.slane %v1463_v58, 4  ;;  %v1529_v61 = vrot.slane %v1504_v59, 4  ;;  %v1465_v62 = vpop.f32.mrb[6].mxu0  ;;  %v1506_v63 = vpop.f32.mrb[6].mxu1 }
 0x4a8   : > { %v1512_v36 = vadd.f32 %v1511_v56, %v1461_v54  ;;  %v1524_v37 = vadd.f32 %v1523_v57, %v1502_v55  ;;  %v1466_v38 = vpop.f32.mrb[7].mxu0  ;;  %v1507_v39 = vpop.f32.mrb[7].mxu1 }
 0x4a9   : > { %v1518_v41 = vadd.f32 %v1517_v60, %v1463_v58  ;;  %v1530_v42 = vadd.f32 %v1529_v61, %v1504_v59 }
 0x4aa   : > { %v1513_v0 = vrot.slane %v1512_v36, 2  ;;  %v1525_v1 = vrot.slane %v1524_v37, 2 }
 0x4ab   : > { %v1519_v2 = vrot.slane %v1518_v41, 2  ;;  %v1531_v3 = vrot.slane %v1530_v42, 2 }
 0x4ac   : > { %v1514_v4 = vadd.f32 %v1513_v0, %v1512_v36  ;;  %v1526_v5 = vadd.f32 %v1525_v1, %v1524_v37 }
 0x4ad   : > { %v1520_v6 = vadd.f32 %v1519_v2, %v1518_v41  ;;  %v1532_v7 = vadd.f32 %v1531_v3, %v1530_v42 }
 0x4ae   : > { %v1515_v8 = vrot.slane %v1514_v4, 1  ;;  %v1527_v9 = vrot.slane %v1526_v5, 1 }
 0x4af   : > { %v1521_v10 = vrot.slane %v1520_v6, 1  ;;  %v1533_v11 = vrot.slane %v1532_v7, 1 }
 0x4b0   : > { %v1516_v12 = vadd.f32 %v1515_v8, %v1514_v4  ;;  %v1528_v13 = vadd.f32 %v1527_v9, %v1526_v5  ;;  %v1509_v5 = vld [vmem:[#allocation13] sm:$0xf]  ;;  %v9801_v8 = vsub.s32 3, %v9763_v19 }
 0x4b1   : > { %v1522_v14 = vadd.f32 %v1521_v10, %v1520_v6  ;;  %v1534_v15 = vadd.f32 %v1533_v11, %v1532_v7  ;;  %v9798_v6 = vsub.s32 2, %v9763_v19  ;;  %v1510_v7 = vld [vmem:[#allocation14] sm:$0xf]  ;;  %v1591_v9 = vrot.slane %v1509_v5, %v9766_v20 }
 0x4b2   : > { %v1535_v16 = vmul.f32 0.125, %v1516_v12  ;;  %v1537_v17 = vmul.f32 0.125, %v1528_v13 }
 0x4b3   : > { %v1536_v18 = vmul.f32 0.125, %v1522_v14  ;;  %v1538_v21 = vmul.f32 0.125, %v1534_v15  ;;  %v1599_v11 = vrot.slane %v1509_v5, %v9798_v6  ;;  %v1616_v14 = vrot.slane %v1510_v7, %v9766_v20 }
 0x4b4   : > { %v1539_v23 = vsub.f32 %v1461_v54, %v1535_v16  ;;  %v1541_v24 = vsub.f32 %v1502_v55, %v1537_v17  ;;  %v1595_v15 = vrot.slane %v1509_v5, %v9769_v22 }
 0x4b5   : > { %v1540_v25 = vsub.f32 %v1463_v58, %v1536_v18  ;;  %v1542_v26 = vsub.f32 %v1504_v59, %v1538_v21  ;;  %v1624_v18 = vrot.slane %v1510_v7, %v9798_v6  ;;  %v1603_v21 = vrot.slane %v1509_v5, %v9801_v8  ;;  %v1814_v5 = vld [vmem:[#allocation16 + $0x508] sm:$0xff] }
 0x4b6   : > { %v1543_v27 = vmul.f32 %v1539_v23, %v1539_v23  ;;  %v1545_v28 = vmul.f32 %v1541_v24, %v1541_v24 }
 0x4b7   : > { %v1544_v29 = vmul.f32 %v1540_v25, %v1540_v25  ;;  %v1546_v30 = vmul.f32 %v1542_v26, %v1542_v26 }
 0x4b8   : > { %v1547_v31 = vrot.slane %v1543_v27, 4  ;;  %v1559_v32 = vrot.slane %v1545_v28, 4 }
 0x4b9   : > { %v1553_v33 = vrot.slane %v1544_v29, 4  ;;  %v1565_v34 = vrot.slane %v1546_v30, 4 }
 0x4ba   : > { %v1548_v35 = vadd.f32 %v1547_v31, %v1543_v27  ;;  %v1560_v40 = vadd.f32 %v1559_v32, %v1545_v28 }
 0x4bb   : > { %v1554_v43 = vadd.f32 %v1553_v33, %v1544_v29  ;;  %v1566_v44 = vadd.f32 %v1565_v34, %v1546_v30  ;;  %v1620_v30 = vrot.slane %v1510_v7, %v9769_v22  ;;  %v1628_v33 = vrot.slane %v1510_v7, %v9801_v8  ;;  %v1818_v7 = vld [vmem:[#allocation16 + $0x528] sm:$0xff] }
 0x4bc   : > { %v1549_v45 = vrot.slane %v1548_v35, 2  ;;  %v1561_v49 = vrot.slane %v1560_v40, 2 }
 0x4bd   : > { %v1555_v53 = vrot.slane %v1554_v43, 2  ;;  %v1567_v56 = vrot.slane %v1566_v44, 2 }
 0x4be   : > { %v1550_v54 = vadd.f32 %v1549_v45, %v1548_v35  ;;  %v1562_v55 = vadd.f32 %v1561_v49, %v1560_v40 }
 0x4bf   : > { %v1556_v57 = vadd.f32 %v1555_v53, %v1554_v43  ;;  %v1568_v58 = vadd.f32 %v1567_v56, %v1566_v44  ;;  %v1789_v53 = vld [vmem:[#allocation16 + $0x440] sm:$0xff] }
 0x4c0   : > { %v1551_v59 = vrot.slane %v1550_v54, 1  ;;  %v1563_v60 = vrot.slane %v1562_v55, 1 }
 0x4c1   : > { %v1557_v61 = vrot.slane %v1556_v57, 1  ;;  %v1569_v62 = vrot.slane %v1568_v58, 1 }
 0x4c2   : > { %v1552_v63 = vadd.f32 %v1551_v59, %v1550_v54  ;;  %v1564_v36 = vadd.f32 %v1563_v60, %v1562_v55  ;;  %v1793_v54 = vld [vmem:[#allocation16 + $0x460] sm:$0xff]  ;;  %v1794_v55 = vld [vmem:[#allocation16 + $0x468] sm:$0xff] }
 0x4c3   : > { %v1558_v37 = vadd.f32 %v1557_v61, %v1556_v57  ;;  %v1570_v38 = vadd.f32 %v1569_v62, %v1568_v58  ;;  %v1797_v60 = vld [vmem:[#allocation16 + $0x480] sm:$0xff]  ;;  %v7183_v61 = vcombine.high %v1789_v53, %v1793_v54 }
 0x4c4   : > { %v1571_v39 = vmul.f32 0.125, %v1552_v63  ;;  %v1573_v41 = vmul.f32 0.125, %v1564_v36  ;;  %v1801_v63 = vld [vmem:[#allocation16 + $0x4a0] sm:$0xff]  ;;  %v1798_v36 = vld [vmem:[#allocation16 + $0x488] sm:$0xff] }
 0x4c5   : > { %v1572_v42 = vmul.f32 0.125, %v1558_v37  ;;  %v1574_v0 = vmul.f32 0.125, %v1570_v38  ;;  %v1802_v37 = vld [vmem:[#allocation16 + $0x4a8] sm:$0xff]  ;;  %v7190_v46 = vcombine.low %v1797_v60, %v1801_v63 }
 0x4c6   : > { %v1575_v1 = vadd.f32 0.8, %v1571_v39  ;;  %v1577_v2 = vadd.f32 0.8, %v1573_v41  ;;  %v7182_v39 = vcombine.low %v1789_v53, %v1793_v54  ;;  %v7192_v47 = vcombine.low %v1798_v36, %v1802_v37  ;;  %v1849_v54 = vld [vmem:[#allocation16 + $0x620] sm:$0xff] }
 0x4c7   : > { %v1576_v3 = vadd.f32 0.8, %v1572_v42  ;;  %v1578_v4 = vadd.f32 0.8, %v1574_v0  ;;  %v7191_v42 = vcombine.high %v1797_v60, %v1801_v63  ;;  %v7193_v0 = vcombine.high %v1798_v36, %v1802_v37  ;;  %v1853_v63 = vld [vmem:[#allocation16 + $0x640] sm:$0xff]  ;;  %v1854_v37 = vld [vmem:[#allocation16 + $0x648] sm:$0xff] }
 0x4c8   : > { %8128 = vrsqrt.f32 %v1575_v1  ;;  %v1805_v1 = vld [vmem:[#allocation16 + $0x4c0] sm:$0xff] }
 0x4c9   : > { %8130 = vrsqrt.f32 %v1577_v2  ;;  %v1809_v2 = vld [vmem:[#allocation16 + $0x4e0] sm:$0xff] }
 0x4ca   : > { %8132 = vrsqrt.f32 %v1576_v3  ;;  %v1806_v3 = vld [vmem:[#allocation16 + $0x4c8] sm:$0xff]  ;;  %v7199_v48 = vcombine.high %v1805_v1, %v1809_v2  ;;  %v1857_v36 = vld [vmem:[#allocation16 + $0x660] sm:$0xff] }
 0x4cb   : > { %8134 = vrsqrt.f32 %v1578_v4  ;;  %v1810_v4 = vld [vmem:[#allocation16 + $0x4e8] sm:$0xff] }
 0x4cc   : > { %v7201_v50 = vcombine.high %v1806_v3, %v1810_v4 }
 0x4d2   : > { %v8129_v10 = vpop.eup %8128 }
 0x4d3   : > { %v8131_v12 = vpop.eup %8130  ;;  %v1583_v13 = vmul.f32 %v8129_v10, %v1539_v23  ;;  %v7200_v10 = vcombine.low %v1806_v3, %v1810_v4  ;;  %v1865_v3 = vld [vmem:[#allocation16 + $0x6a0] sm:$0xff]  ;;  %v1862_v4 = vld [vmem:[#allocation16 + $0x688] sm:$0xff] }
 0x4d4   : > { %v8133_v16 = vpop.eup %8132  ;;  %v1585_v17 = vmul.f32 %v8131_v12, %v1541_v24  ;;  %v7209_v12 = vcombine.high %v1814_v5, %v1818_v7 }
 0x4d5   : > { %v8135_v27 = vpop.eup %8134  ;;  %v1608_v28 = vmul.f32 %v1591_v9, %v1583_v13  ;;  %v1584_v29 = vmul.f32 %v8133_v16, %v1540_v25  ;;  %v7198_v9 = vcombine.low %v1805_v1, %v1809_v2  ;;  %v1821_v13 = vld [vmem:[#allocation16 + $0x540] sm:$0xff]  ;;  %v1826_v16 = vld [vmem:[#allocation16 + $0x568] sm:$0xff] }
 0x4d6   : > { %v1610_v31 = vmul.f32 %v1599_v11, %v1585_v17  ;;  %v1586_v32 = vmul.f32 %v8135_v27, %v1542_v26  ;;  %v1790_v26 = vld [vmem:[#allocation16 + $0x448] sm:$0xff]  ;;  %v1861_v2 = vld [vmem:[#allocation16 + $0x680] sm:$0xff] }
 0x4d7   : > { %v1633_v23 = vadd.f32 %v1616_v14, %v1608_v28  ;;  %v1609_v34 = vmul.f32 %v1595_v15, %v1584_v29  ;;  %v7185_v62 = vcombine.high %v1790_v26, %v1794_v55  ;;  %v7184_v41 = vcombine.low %v1790_v26, %v1794_v55  ;;  %v1825_v14 = vld [vmem:[#allocation16 + $0x560] sm:$0xff]  ;;  %v1822_v15 = vld [vmem:[#allocation16 + $0x548] sm:$0xff] }
 0x4d8   : > { %v9811_v35 = vadd.f32 %v1624_v18, %v1610_v31  ;;  %v1611_v40 = vmul.f32 %v1603_v21, %v1586_v32  ;;  %v7208_v18 = vcombine.low %v1814_v5, %v1818_v7  ;;  %v7215_v21 = vcombine.high %v1821_v13, %v1825_v14  ;;  %v1829_v28 = vld [vmem:[#allocation16 + $0x580] sm:$0xff]  ;;  %v1834_v31 = vld [vmem:[#allocation16 + $0x5a8] sm:$0xff] }
 0x4d9   : > { %v1634_v43 = vadd.f32 %v1620_v30, %v1609_v34  ;;  %vm1637_vm4 = vcmp.gt.f32.partialorder %v1633_v23, 0.0  ;;  %v1641_v24 = vmul.f32 0.2, %v1633_v23  ;;  %v7217_v27 = vcombine.high %v1822_v15, %v1826_v16  ;;  %v1833_v29 = vld [vmem:[#allocation16 + $0x5a0] sm:$0xff]  ;;  %v1830_v30 = vld [vmem:[#allocation16 + $0x588] sm:$0xff] }
 0x4da   : > { %v1636_v44 = vadd.f32 %v1628_v33, %v1611_v40  ;;  %v7214_v32 = vcombine.low %v1821_v13, %v1825_v14  ;;  %v7216_v33 = vcombine.low %v1822_v15, %v1826_v16  ;;  %v7225_v34 = vcombine.high %v1830_v30, %v1834_v31  ;;  %v1837_v40 = vld [vmem:[#allocation16 + $0x5c0] sm:$0xff]  ;;  %v1846_v26 = vld [vmem:[#allocation16 + $0x608] sm:$0xff] }
 0x4db   : > { %vm1638_vm5 = vcmp.gt.f32.partialorder %v1634_v43, 0.0  ;;  %v1642_v45 = vmul.f32 0.2, %v1634_v43  ;;  %v1645_v49 = vsel %vm1637_vm4, %v1633_v23, %v1641_v24  ;;  %v7223_v23 = vcombine.high %v1829_v28, %v1833_v29  ;;  %v1838_v24 = vld [vmem:[#allocation16 + $0x5c8] sm:$0xff]  ;;  %v1873_v5 = vld [vmem:[#allocation16 + $0x6e0] sm:$0xff] }
 0x4dc   : > { %vm1640_vm6 = vcmp.gt.f32.partialorder %v1636_v44, 0.0  ;;  %v1644_v25 = vmul.f32 0.2, %v1636_v44  ;;  %v9815_v59 = vpack.c.bf16 %v1645_v49, %v1645_v49  ;;  %v7224_v49 = vcombine.low %v1830_v30, %v1834_v31  ;;  %v1850_v55 = vld [vmem:[#allocation16 + $0x628] sm:$0xff]  ;;  %v1877_v14 = vld [vmem:[#allocation16 + $0x700] sm:$0xff] }
 0x4dd   : > { %v1646_v56 = vsel %vm1638_vm5, %v1634_v43, %v1642_v45  ;;  %v1841_v43 = vld [vmem:[#allocation16 + $0x5e0] sm:$0xff]  ;;  %v7222_v45 = vcombine.low %v1829_v28, %v1833_v29  ;;  %v1870_v7 = vld [vmem:[#allocation16 + $0x6c8] sm:$0xff]  ;;  %vm1639_vm7 = vcmp.gt.f32.partialorder %v9811_v35, 0.0 }
 0x4de   : > { %v9813_v57 = vpack.c.bf16 %v1646_v56, %v1646_v56  ;;  %v1648_v58 = vsel %vm1640_vm6, %v1636_v44, %v1644_v25  ;;  %v1842_v44 = vld [vmem:[#allocation16 + $0x5e8] sm:$0xff]  ;;  %v7231_v25 = vcombine.high %v1837_v40, %v1841_v43  ;;  %v1845_v56 = vld [vmem:[#allocation16 + $0x600] sm:$0xff] }
 0x4df   : > { %v9821_v38 = vpack.c.bf16 %v1648_v58, %v1648_v58  ;;  %v7233_v53 = vcombine.high %v1838_v24, %v1842_v44  ;;  %v7230_v58 = vcombine.low %v1837_v40, %v1841_v43  ;;  %v7232_v60 = vcombine.low %v1838_v24, %v1842_v44  ;;  %v1881_v15 = vld [vmem:[#allocation16 + $0x720] sm:$0xff]  ;;  %v1878_v16 = vld [vmem:[#allocation16 + $0x708] sm:$0xff] }
 0x4e0   : > { %3221 = vmatprep.mubr.bf16.mxu0 %v9813_v57  ;;  %3303 = vmatprep.mubr.bf16.mxu1 %v9813_v57  ;;  %v1885_v29 = vld [vmem:[#allocation16 + $0x740] sm:$0xff]  ;;  %v1886_v31 = vld [vmem:[#allocation16 + $0x748] sm:$0xff] }
 0x4e1   : > { %3222 = vmatmul.mubr.bf16.vlgmr.msra.gmra.mrb[8].mxu0 %v9815_v59  ;;  %3304 = vmatmul.mubr.bf16.vlgmr.msra.gmra.mrb[8].mxu1 %v9815_v59  ;;  %v1889_v30 = vld [vmem:[#allocation16 + $0x760] sm:$0xff]  ;;  %v1894_v44 = vld [vmem:[#allocation16 + $0x788] sm:$0xff] }
 0x4e2   : > { %3231 = vmatpush1.bf16.msra.mxu0 %v7174_v51  ;;  %3313 = vmatpush1.bf16.msra.mxu1 %v7176_v52  ;;  %v1813_v51 = vld [vmem:[#allocation16 + $0x500] sm:$0xff] }
 0x4e3   : > { %3262 = vmatprep.mubr.bf16.mxu0 %v9821_v38  ;;  %3344 = vmatprep.mubr.bf16.mxu1 %v9821_v38  ;;  %v1817_v52 = vld [vmem:[#allocation16 + $0x520] sm:$0xff] }
 0x4e4   : > { %3232 = vmatprep.subr.bf16.mxu0 %v7183_v61  ;;  %3314 = vmatprep.subr.bf16.mxu1 %v7185_v62  ;;  %v7207_v11 = vcombine.high %v1813_v51, %v1817_v52  ;;  %v7206_v17 = vcombine.low %v1813_v51, %v1817_v52  ;;  %v7239_v61 = vcombine.high %v1845_v56, %v1849_v54  ;;  %v1869_v52 = vld [vmem:[#allocation16 + $0x6c0] sm:$0xff] }
 0x4e5   : > { %v7241_v62 = vcombine.high %v1846_v26, %v1850_v55  ;;  %v1893_v43 = vld [vmem:[#allocation16 + $0x780] sm:$0xff] }
 0x4e6   : > { %3233 = vmatpush1.bf16.msra.mxu0 %v7182_v39  ;;  %3315 = vmatpush1.bf16.msra.mxu1 %v7184_v41  ;;  %v1858_v39 = vld [vmem:[#allocation16 + $0x668] sm:$0xff]  ;;  %v7238_v41 = vcombine.low %v1845_v56, %v1849_v54  ;;  %v1897_v24 = vld [vmem:[#allocation16 + $0x7a0] sm:$0xff] }
 0x4e7   : > { %3234 = vmatprep.subr.bf16.mxu0 %v7191_v42  ;;  %3316 = vmatprep.subr.bf16.mxu1 %v7193_v0  ;;  %v7240_v42 = vcombine.low %v1846_v26, %v1850_v55  ;;  %v7247_v0 = vcombine.high %v1853_v63, %v1857_v36  ;;  %v7249_v1 = vcombine.high %v1854_v37, %v1858_v39  ;;  %v1901_v54 = vld [vmem:[#allocation16 + $0x7c0] sm:$0xff]  ;;  %v1902_v55 = vld [vmem:[#allocation16 + $0x7c8] sm:$0xff] }
 0x4e8   : > { %v1905_v26 = vld [vmem:[#allocation16 + $0x7e0] sm:$0xff] }
 0x4ea   : > { %3235 = vmatpush1.bf16.msra.mxu0 %v7190_v46  ;;  %3317 = vmatpush1.bf16.msra.mxu1 %v7192_v47  ;;  %v1866_v46 = vld [vmem:[#allocation16 + $0x6a8] sm:$0xff]  ;;  %v7246_v47 = vcombine.low %v1853_v63, %v1857_v36  ;;  %v1655_v36 = vld [vmem:[#allocation16 + $0x10] sm:$0xff] }
 0x4eb   : > { %3236 = vmatprep.subr.bf16.mxu0 %v7199_v48  ;;  %3318 = vmatprep.subr.bf16.mxu1 %v7201_v50  ;;  %v7248_v48 = vcombine.low %v1854_v37, %v1858_v39  ;;  %v7255_v50 = vcombine.high %v1861_v2, %v1865_v3  ;;  %v7257_v51 = vcombine.high %v1862_v4, %v1866_v46  ;;  %v1643_v37 = vmul.f32 0.2, %v9811_v35  ;;  %v1659_v39 = vld [vmem:[#allocation16 + $0x30] sm:$0xff] }
 0x4ee   : > { %3237 = vmatpush1.bf16.msra.mxu0 %v7198_v9  ;;  %3319 = vmatpush1.bf16.msra.mxu1 %v7200_v10  ;;  %v1874_v9 = vld [vmem:[#allocation16 + $0x6e8] sm:$0xff]  ;;  %v7254_v10 = vcombine.low %v1861_v2, %v1865_v3  ;;  %v7051_v2 = vcombine.high %v1655_v36, %v1659_v39 }
 0x4ef   : > { %3238 = vmatprep.subr.bf16.mxu0 %v7207_v11  ;;  %3320 = vmatprep.subr.bf16.mxu1 %v7209_v12  ;;  %v7256_v11 = vcombine.low %v1862_v4, %v1866_v46  ;;  %v7263_v12 = vcombine.high %v1869_v52, %v1873_v5  ;;  %v7265_v13 = vcombine.high %v1870_v7, %v1874_v9  ;;  %v1663_v46 = vld [vmem:[#allocation16 + $0x50] sm:$0xff] }
 0x4f0   : > { %v1647_v4 = vsel %vm1639_vm7, %v9811_v35, %v1643_v37  ;;  %v1672_v35 = vld [vmem:[#allocation16 + $0x98] sm:$0xff] }
 0x4f2   : > { %3239 = vmatpush1.bf16.msra.mxu0 %v7206_v17  ;;  %3321 = vmatpush1.bf16.msra.mxu1 %v7208_v18  ;;  %v1882_v17 = vld [vmem:[#allocation16 + $0x728] sm:$0xff]  ;;  %v7262_v18 = vcombine.low %v1869_v52, %v1873_v5  ;;  %v9834_v52 = vpack.c.bf16 %v1647_v4, %v1647_v4 }
 0x4f3   : > { %3240 = vmatprep.subr.bf16.mxu0 %v7215_v21  ;;  %3322 = vmatprep.subr.bf16.mxu1 %v7217_v27  ;;  %v7264_v21 = vcombine.low %v1870_v7, %v1874_v9  ;;  %v7271_v27 = vcombine.high %v1877_v14, %v1881_v15  ;;  %v7273_v28 = vcombine.high %v1878_v16, %v1882_v17 }
 0x4f6   : > { %3241 = vmatpush1.bf16.msra.mxu0 %v7214_v32  ;;  %3323 = vmatpush1.bf16.msra.mxu1 %v7216_v33  ;;  %v1890_v32 = vld [vmem:[#allocation16 + $0x768] sm:$0xff]  ;;  %v7270_v33 = vcombine.low %v1877_v14, %v1881_v15 }
 0x4f7   : > { %3242 = vmatprep.subr.bf16.mxu0 %v7223_v23  ;;  %3324 = vmatprep.subr.bf16.mxu1 %v7225_v34  ;;  %v7272_v23 = vcombine.low %v1878_v16, %v1882_v17  ;;  %v7279_v34 = vcombine.high %v1885_v29, %v1889_v30  ;;  %v7281_v40 = vcombine.high %v1886_v31, %v1890_v32  ;;  %v1679_v17 = vld [vmem:[#allocation16 + $0xd0] sm:$0xff] }
 0x4fa   : > { %3243 = vmatpush1.bf16.msra.mxu0 %v7222_v45  ;;  %3325 = vmatpush1.bf16.msra.mxu1 %v7224_v49  ;;  %v1898_v45 = vld [vmem:[#allocation16 + $0x7a8] sm:$0xff]  ;;  %v7278_v49 = vcombine.low %v1885_v29, %v1889_v30 }
 0x4fb   : > { %3244 = vmatprep.subr.bf16.mxu0 %v7231_v25  ;;  %3326 = vmatprep.subr.bf16.mxu1 %v7233_v53  ;;  %v7280_v25 = vcombine.low %v1886_v31, %v1890_v32  ;;  %v7287_v53 = vcombine.high %v1893_v43, %v1897_v24  ;;  %v7289_v56 = vcombine.high %v1894_v44, %v1898_v45  ;;  %v1687_v32 = vld [vmem:[#allocation16 + $0x110] sm:$0xff] }
 0x4fe   : > { %3245 = vmatpush1.bf16.msra.mxu0 %v7230_v58  ;;  %3327 = vmatpush1.bf16.msra.mxu1 %v7232_v60  ;;  %v1906_v58 = vld [vmem:[#allocation16 + $0x7e8] sm:$0xff]  ;;  %v7286_v60 = vcombine.low %v1893_v43, %v1897_v24 }
 0x4ff   : > { %3246 = vmatprep.subr.bf16.mxu0 %v7239_v61  ;;  %3328 = vmatprep.subr.bf16.mxu1 %v7241_v62  ;;  %v7288_v61 = vcombine.low %v1894_v44, %v1898_v45  ;;  %v7295_v62 = vcombine.high %v1901_v54, %v1905_v26  ;;  %v7297_v63 = vcombine.high %v1902_v55, %v1906_v58  ;;  %v1695_v44 = vld [vmem:[#allocation16 + $0x150] sm:$0xff] }
 0x500   : > { %v1699_v45 = vld [vmem:[#allocation16 + $0x170] sm:$0xff] }
 0x502   : > { %3247 = vmatpush1.bf16.msra.mxu0 %v7238_v41  ;;  %3329 = vmatpush1.bf16.msra.mxu1 %v7240_v42  ;;  %v1656_v41 = vld [vmem:[#allocation16 + $0x18] sm:$0xff] }
 0x503   : > { %3248 = vmatprep.subr.bf16.mxu0 %v7247_v0  ;;  %3330 = vmatprep.subr.bf16.mxu1 %v7249_v1  ;;  %v1660_v42 = vld [vmem:[#allocation16 + $0x38] sm:$0xff]  ;;  %v7294_v0 = vcombine.low %v1901_v54, %v1905_v26  ;;  %v7296_v1 = vcombine.low %v1902_v55, %v1906_v58  ;;  %v7091_v54 = vcombine.high %v1695_v44, %v1699_v45  ;;  %v1703_v55 = vld [vmem:[#allocation16 + $0x190] sm:$0xff] }
 0x504   : > { %v7053_v3 = vcombine.high %v1656_v41, %v1660_v42  ;;  %v7052_v5 = vcombine.low %v1656_v41, %v1660_v42  ;;  %v1707_v58 = vld [vmem:[#allocation16 + $0x1b0] sm:$0xff]  ;;  %v1712_v42 = vld [vmem:[#allocation16 + $0x1d8] sm:$0xff] }
 0x505   : > { %v1715_v41 = vld [vmem:[#allocation16 + $0x1f0] sm:$0xff] }
 0x506   : > { %3249 = vmatpush1.bf16.msra.mxu0 %v7246_v47  ;;  %3331 = vmatpush1.bf16.msra.mxu1 %v7248_v48  ;;  %v1667_v47 = vld [vmem:[#allocation16 + $0x70] sm:$0xff]  ;;  %v1664_v48 = vld [vmem:[#allocation16 + $0x58] sm:$0xff] }
 0x507   : > { %3250 = vmatprep.subr.bf16.mxu0 %v7255_v50  ;;  %3332 = vmatprep.subr.bf16.mxu1 %v7257_v51  ;;  %v1668_v50 = vld [vmem:[#allocation16 + $0x78] sm:$0xff]  ;;  %v7050_v51 = vcombine.low %v1655_v36, %v1659_v39  ;;  %v7059_v7 = vcombine.high %v1663_v46, %v1667_v47  ;;  %v7099_v36 = vcombine.high %v1703_v55, %v1707_v58  ;;  %v1711_v39 = vld [vmem:[#allocation16 + $0x1d0] sm:$0xff] }
 0x508   : > { %v7061_v9 = vcombine.high %v1664_v48, %v1668_v50  ;;  %v7060_v14 = vcombine.low %v1664_v48, %v1668_v50  ;;  %v1720_v48 = vld [vmem:[#allocation16 + $0x218] sm:$0xff] }
 0x509   : > { %v1724_v50 = vld [vmem:[#allocation16 + $0x238] sm:$0xff] }
 0x50a   : > { %3251 = vmatpush1.bf16.msra.mxu0 %v7254_v10  ;;  %3333 = vmatpush1.bf16.msra.mxu1 %v7256_v11  ;;  %v1671_v10 = vld [vmem:[#allocation16 + $0x90] sm:$0xff] }
 0x50b   : > { %3252 = vmatprep.subr.bf16.mxu0 %v7263_v12  ;;  %3334 = vmatprep.subr.bf16.mxu1 %v7265_v13  ;;  %v1675_v11 = vld [vmem:[#allocation16 + $0xb0] sm:$0xff]  ;;  %v1676_v12 = vld [vmem:[#allocation16 + $0xb8] sm:$0xff]  ;;  %v7058_v13 = vcombine.low %v1663_v46, %v1667_v47 }
 0x50c   : > { %v7067_v15 = vcombine.high %v1671_v10, %v1675_v11  ;;  %v7069_v16 = vcombine.high %v1672_v35, %v1676_v12  ;;  %v7068_v29 = vcombine.low %v1672_v35, %v1676_v12  ;;  %v1719_v46 = vld [vmem:[#allocation16 + $0x210] sm:$0xff]  ;;  %v1728_v35 = vld [vmem:[#allocation16 + $0x258] sm:$0xff] }
 0x50d   : > { %v1723_v47 = vld [vmem:[#allocation16 + $0x230] sm:$0xff]  ;;  %v1732_v12 = vld [vmem:[#allocation16 + $0x278] sm:$0xff] }
 0x50e   : > { %3253 = vmatpush1.bf16.msra.mxu0 %v7262_v18  ;;  %3335 = vmatpush1.bf16.msra.mxu1 %v7264_v21  ;;  %v1683_v18 = vld [vmem:[#allocation16 + $0xf0] sm:$0xff]  ;;  %v1680_v21 = vld [vmem:[#allocation16 + $0xd8] sm:$0xff] }
 0x50f   : > { %3254 = vmatprep.subr.bf16.mxu0 %v7271_v27  ;;  %3336 = vmatprep.subr.bf16.mxu1 %v7273_v28  ;;  %v1684_v27 = vld [vmem:[#allocation16 + $0xf8] sm:$0xff]  ;;  %v7066_v28 = vcombine.low %v1671_v10, %v1675_v11  ;;  %v7075_v30 = vcombine.high %v1679_v17, %v1683_v18  ;;  %v1727_v10 = vld [vmem:[#allocation16 + $0x250] sm:$0xff] }
 0x510   : > { %v7077_v31 = vcombine.high %v1680_v21, %v1684_v27  ;;  %v1731_v11 = vld [vmem:[#allocation16 + $0x270] sm:$0xff] }
 0x512   : > { %3255 = vmatpush1.bf16.msra.mxu0 %v7270_v33  ;;  %3337 = vmatpush1.bf16.msra.mxu1 %v7272_v23  ;;  %v1691_v33 = vld [vmem:[#allocation16 + $0x130] sm:$0xff]  ;;  %v1692_v23 = vld [vmem:[#allocation16 + $0x138] sm:$0xff] }
 0x513   : > { %3256 = vmatprep.subr.bf16.mxu0 %v7279_v34  ;;  %3338 = vmatprep.subr.bf16.mxu1 %v7281_v40  ;;  %v7074_v34 = vcombine.low %v1679_v17, %v1683_v18  ;;  %v7076_v40 = vcombine.low %v1680_v21, %v1684_v27  ;;  %v7083_v43 = vcombine.high %v1687_v32, %v1691_v33  ;;  %v1735_v17 = vld [vmem:[#allocation16 + $0x290] sm:$0xff]  ;;  %v1736_v21 = vld [vmem:[#allocation16 + $0x298] sm:$0xff] }
 0x514   : > { %v1739_v18 = vld [vmem:[#allocation16 + $0x2b0] sm:$0xff]  ;;  %v1740_v27 = vld [vmem:[#allocation16 + $0x2b8] sm:$0xff] }
 0x516   : > { %3257 = vmatpush1.bf16.msra.mxu0 %v7278_v49  ;;  %3339 = vmatpush1.bf16.msra.mxu1 %v7280_v25  ;;  %v1696_v49 = vld [vmem:[#allocation16 + $0x158] sm:$0xff] }
 0x517   : > { %3258 = vmatprep.subr.bf16.mxu0 %v7287_v53  ;;  %3340 = vmatprep.subr.bf16.mxu1 %v7289_v56  ;;  %v1700_v25 = vld [vmem:[#allocation16 + $0x178] sm:$0xff]  ;;  %v7082_v53 = vcombine.low %v1687_v32, %v1691_v33  ;;  %v1743_v32 = vld [vmem:[#allocation16 + $0x2d0] sm:$0xff] }
 0x518   : > { %v7093_v26 = vcombine.high %v1696_v49, %v1700_v25  ;;  %v1747_v33 = vld [vmem:[#allocation16 + $0x2f0] sm:$0xff] }
 0x51a   : > { %3259 = vmatpush1.bf16.msra.mxu0 %v7286_v60  ;;  %3341 = vmatpush1.bf16.msra.mxu1 %v7288_v61  ;;  %v1704_v60 = vld [vmem:[#allocation16 + $0x198] sm:$0xff] }
 0x51b   : > { %3260 = vmatprep.subr.bf16.mxu0 %v7295_v62  ;;  %3342 = vmatprep.subr.bf16.mxu1 %v7297_v63  ;;  %v1708_v61 = vld [vmem:[#allocation16 + $0x1b8] sm:$0xff]  ;;  %v7090_v62 = vcombine.low %v1695_v44, %v1699_v45  ;;  %v7092_v63 = vcombine.low %v1696_v49, %v1700_v25  ;;  %v1751_v44 = vld [vmem:[#allocation16 + $0x310] sm:$0xff] }
 0x51c   : > { %v7101_v37 = vcombine.high %v1704_v60, %v1708_v61  ;;  %v1755_v45 = vld [vmem:[#allocation16 + $0x330] sm:$0xff]  ;;  %v1752_v49 = vld [vmem:[#allocation16 + $0x318] sm:$0xff] }
 0x51d   : > { %v1756_v25 = vld [vmem:[#allocation16 + $0x338] sm:$0xff] }
 0x51e   : > { %3261 = vmatpush1.bf16.msra.mxu0 %v7294_v0  ;;  %3343 = vmatpush1.bf16.msra.mxu1 %v7296_v1  ;;  %v1716_v0 = vld [vmem:[#allocation16 + $0x1f8] sm:$0xff]  ;;  %v7098_v1 = vcombine.low %v1703_v55, %v1707_v58  ;;  %v1759_v55 = vld [vmem:[#allocation16 + $0x350] sm:$0xff] }
 0x51f   : > { %3353 = vmatprep.subr.bf16.mxu0 %v7051_v2  ;;  %3435 = vmatprep.subr.bf16.mxu1 %v7053_v3  ;;  %v7100_v2 = vcombine.low %v1704_v60, %v1708_v61  ;;  %v7107_v3 = vcombine.high %v1711_v39, %v1715_v41  ;;  %v7109_v4 = vcombine.high %v1712_v42, %v1716_v0  ;;  %v1763_v58 = vld [vmem:[#allocation16 + $0x370] sm:$0xff]  ;;  %v1760_v60 = vld [vmem:[#allocation16 + $0x358] sm:$0xff] }
 0x520   : > { %v1764_v61 = vld [vmem:[#allocation16 + $0x378] sm:$0xff] }
 0x521   : > { %3263 = vmatmul.mubr.bf16.vlgmr.msra.gmra.mrb[8].mxu0 %v9834_v52  ;;  %3345 = vmatmul.mubr.bf16.vlgmr.msra.gmra.mrb[8].mxu1 %v9834_v52 }
 0x522   : > { %3354 = vmatpush1.bf16.msra.mxu0 %v7050_v51  ;;  %3385 = vmatprep.mubr.bf16.mxu0 %v9813_v57  ;;  %v7106_v51 = vcombine.low %v1711_v39, %v1715_v41  ;;  %v1767_v39 = vld [vmem:[#allocation16 + $0x390] sm:$0xff] }
 0x523   : > { %3436 = vmatpush1.bf16.msra.mxu1 %v7052_v5  ;;  %3467 = vmatprep.mubr.bf16.mxu1 %v9813_v57  ;;  %v1688_v57 = vld [vmem:[#allocation16 + $0x118] sm:$0xff]  ;;  %v7108_v5 = vcombine.low %v1712_v42, %v1716_v0  ;;  %v1771_v41 = vld [vmem:[#allocation16 + $0x3b0] sm:$0xff] }
 0x524   : > { %3355 = vmatprep.subr.bf16.mxu0 %v7059_v7  ;;  %3437 = vmatprep.subr.bf16.mxu1 %v7061_v9  ;;  %v7085_v24 = vcombine.high %v1688_v57, %v1692_v23  ;;  %v7084_v56 = vcombine.low %v1688_v57, %v1692_v23  ;;  %v7115_v7 = vcombine.high %v1719_v46, %v1723_v47  ;;  %v1744_v57 = vld [vmem:[#allocation16 + $0x2d8] sm:$0xff] }
 0x525   : > { %v7117_v9 = vcombine.high %v1720_v48, %v1724_v50  ;;  %v1748_v23 = vld [vmem:[#allocation16 + $0x2f8] sm:$0xff] }
 0x526   : > { %3356 = vmatpush1.bf16.msra.mxu0 %v7058_v13  ;;  %v7114_v13 = vcombine.low %v1719_v46, %v1723_v47  ;;  %v1768_v42 = vld [vmem:[#allocation16 + $0x398] sm:$0xff]  ;;  %v1775_v46 = vld [vmem:[#allocation16 + $0x3d0] sm:$0xff] }
 0x527   : > { %3438 = vmatpush1.bf16.msra.mxu1 %v7060_v14  ;;  %3357 = vmatprep.subr.bf16.mxu0 %v7067_v15  ;;  %v7116_v14 = vcombine.low %v1720_v48, %v1724_v50  ;;  %v7123_v15 = vcombine.high %v1727_v10, %v1731_v11  ;;  %v1772_v0 = vld [vmem:[#allocation16 + $0x3b8] sm:$0xff]  ;;  %v1779_v47 = vld [vmem:[#allocation16 + $0x3f0] sm:$0xff] }
 0x528   : > { %3439 = vmatprep.subr.bf16.mxu1 %v7069_v16  ;;  %v7125_v16 = vcombine.high %v1728_v35, %v1732_v12  ;;  %v1776_v48 = vld [vmem:[#allocation16 + $0x3d8] sm:$0xff] }
 0x529   : > { %v1780_v50 = vld [vmem:[#allocation16 + $0x3f8] sm:$0xff] }
 0x52a   : > { %3358 = vmatpush1.bf16.msra.mxu0 %v7066_v28  ;;  %v7122_v28 = vcombine.low %v1727_v10, %v1731_v11  ;;  %v1783_v10 = vld [vmem:[#allocation16 + $0x410] sm:$0xff] }
 0x52b   : > { %3440 = vmatpush1.bf16.msra.mxu1 %v7068_v29  ;;  %3359 = vmatprep.subr.bf16.mxu0 %v7075_v30  ;;  %v7124_v29 = vcombine.low %v1728_v35, %v1732_v12  ;;  %v7131_v30 = vcombine.high %v1735_v17, %v1739_v18  ;;  %v1787_v11 = vld [vmem:[#allocation16 + $0x430] sm:$0xff]  ;;  %v1784_v35 = vld [vmem:[#allocation16 + $0x418] sm:$0xff] }
 0x52c   : > { %3441 = vmatprep.subr.bf16.mxu1 %v7077_v31  ;;  %v7133_v31 = vcombine.high %v1736_v21, %v1740_v27  ;;  %v1788_v12 = vld [vmem:[#allocation16 + $0x438] sm:$0xff] }
 0x52e   : > { %3360 = vmatpush1.bf16.msra.mxu0 %v7074_v34  ;;  %v7130_v34 = vcombine.low %v1735_v17, %v1739_v18  ;;  %v1791_v17 = vld [vmem:[#allocation16 + $0x450] sm:$0xff] }
 0x52f   : > { %3442 = vmatpush1.bf16.msra.mxu1 %v7076_v40  ;;  %3361 = vmatprep.subr.bf16.mxu0 %v7083_v43  ;;  %v7132_v40 = vcombine.low %v1736_v21, %v1740_v27  ;;  %v7139_v43 = vcombine.high %v1743_v32, %v1747_v33  ;;  %v1795_v18 = vld [vmem:[#allocation16 + $0x470] sm:$0xff]  ;;  %v7178_v21 = vcombine.low %v1783_v10, %v1787_v11  ;;  %v1792_v27 = vld [vmem:[#allocation16 + $0x458] sm:$0xff] }
 0x530   : > { %3443 = vmatprep.subr.bf16.mxu1 %v7085_v24  ;;  %v7141_v24 = vcombine.high %v1744_v57, %v1748_v23 }
 0x532   : > { %3362 = vmatpush1.bf16.msra.mxu0 %v7082_v53  ;;  %v7138_v53 = vcombine.low %v1743_v32, %v1747_v33  ;;  %v1803_v32 = vld [vmem:[#allocation16 + $0x4b0] sm:$0xff] }
 0x533   : > { %3444 = vmatpush1.bf16.msra.mxu1 %v7084_v56  ;;  %3363 = vmatprep.subr.bf16.mxu0 %v7091_v54  ;;  %v7140_v56 = vcombine.low %v1744_v57, %v1748_v23  ;;  %v7147_v54 = vcombine.high %v1751_v44, %v1755_v45  ;;  %v1800_v57 = vld [vmem:[#allocation16 + $0x498] sm:$0xff] }
 0x534   : > { %3445 = vmatprep.subr.bf16.mxu1 %v7093_v26  ;;  %v7149_v26 = vcombine.high %v1752_v49, %v1756_v25  ;;  %v1804_v23 = vld [vmem:[#allocation16 + $0x4b8] sm:$0xff] }
 0x536   : > { %3364 = vmatpush1.bf16.msra.mxu0 %v7090_v62  ;;  %v7146_v62 = vcombine.low %v1751_v44, %v1755_v45  ;;  %v1807_v44 = vld [vmem:[#allocation16 + $0x4d0] sm:$0xff] }
 0x537   : > { %3446 = vmatpush1.bf16.msra.mxu1 %v7092_v63  ;;  %3365 = vmatprep.subr.bf16.mxu0 %v7099_v36  ;;  %v7148_v63 = vcombine.low %v1752_v49, %v1756_v25  ;;  %v7155_v36 = vcombine.high %v1759_v55, %v1763_v58  ;;  %v1811_v45 = vld [vmem:[#allocation16 + $0x4f0] sm:$0xff]  ;;  %v1808_v49 = vld [vmem:[#allocation16 + $0x4d8] sm:$0xff] }
 0x538   : > { %3447 = vmatprep.subr.bf16.mxu1 %v7101_v37  ;;  %v7157_v37 = vcombine.high %v1760_v60, %v1764_v61  ;;  %v1812_v25 = vld [vmem:[#allocation16 + $0x4f8] sm:$0xff] }
 0x53a   : > { %3366 = vmatpush1.bf16.msra.mxu0 %v7098_v1  ;;  %v7154_v1 = vcombine.low %v1759_v55, %v1763_v58  ;;  %v1819_v55 = vld [vmem:[#allocation16 + $0x530] sm:$0xff]  ;;  %v1816_v58 = vld [vmem:[#allocation16 + $0x518] sm:$0xff] }
 0x53b   : > { %3448 = vmatpush1.bf16.msra.mxu1 %v7100_v2  ;;  %3367 = vmatprep.subr.bf16.mxu0 %v7107_v3  ;;  %v7156_v2 = vcombine.low %v1760_v60, %v1764_v61  ;;  %v7163_v3 = vcombine.high %v1767_v39, %v1771_v41  ;;  %v1820_v60 = vld [vmem:[#allocation16 + $0x538] sm:$0xff]  ;;  %v7204_v61 = vcombine.low %v1808_v49, %v1812_v25 }
 0x53c   : > { %3449 = vmatprep.subr.bf16.mxu1 %v7109_v4  ;;  %v7165_v4 = vcombine.high %v1768_v42, %v1772_v0 }
 0x53e   : > { %3368 = vmatpush1.bf16.msra.mxu0 %v7106_v51  ;;  %v7162_v51 = vcombine.low %v1767_v39, %v1771_v41  ;;  %v1824_v39 = vld [vmem:[#allocation16 + $0x558] sm:$0xff] }
 0x53f   : > { %3450 = vmatpush1.bf16.msra.mxu1 %v7108_v5  ;;  %3369 = vmatprep.subr.bf16.mxu0 %v7115_v7  ;;  %v7164_v5 = vcombine.low %v1768_v42, %v1772_v0  ;;  %v7171_v7 = vcombine.high %v1775_v46, %v1779_v47  ;;  %v1828_v41 = vld [vmem:[#allocation16 + $0x578] sm:$0xff]  ;;  %v7212_v0 = vcombine.low %v1816_v58, %v1820_v60 }
 0x540   : > { %3451 = vmatprep.subr.bf16.mxu1 %v7117_v9  ;;  %v7173_v9 = vcombine.high %v1776_v48, %v1780_v50 }
 0x542   : > { %3370 = vmatpush1.bf16.msra.mxu0 %v7114_v13  ;;  %v7170_v13 = vcombine.low %v1775_v46, %v1779_v47  ;;  %v1832_v46 = vld [vmem:[#allocation16 + $0x598] sm:$0xff] }
 0x543   : > { %3452 = vmatpush1.bf16.msra.mxu1 %v7116_v14  ;;  %3371 = vmatprep.subr.bf16.mxu0 %v7123_v15  ;;  %v7172_v14 = vcombine.low %v1776_v48, %v1780_v50  ;;  %v7179_v15 = vcombine.high %v1783_v10, %v1787_v11  ;;  %v1836_v47 = vld [vmem:[#allocation16 + $0x5b8] sm:$0xff]  ;;  %v7220_v50 = vcombine.low %v1824_v39, %v1828_v41 }
 0x544   : > { %3453 = vmatprep.subr.bf16.mxu1 %v7125_v16  ;;  %v7181_v16 = vcombine.high %v1784_v35, %v1788_v12  ;;  %v1840_v10 = vld [vmem:[#allocation16 + $0x5d8] sm:$0xff] }
 0x545   : > { %v1844_v11 = vld [vmem:[#allocation16 + $0x5f8] sm:$0xff] }
 0x546   : > { %3372 = vmatpush1.bf16.msra.mxu0 %v7122_v28  ;;  %v1796_v28 = vld [vmem:[#allocation16 + $0x478] sm:$0xff] }
 0x547   : > { %3454 = vmatpush1.bf16.msra.mxu1 %v7124_v29  ;;  %3373 = vmatprep.subr.bf16.mxu0 %v7131_v30  ;;  %v7180_v29 = vcombine.low %v1784_v35, %v1788_v12  ;;  %v7187_v30 = vcombine.high %v1791_v17, %v1795_v18  ;;  %v7189_v33 = vcombine.high %v1792_v27, %v1796_v28 }
 0x548   : > { %3455 = vmatprep.subr.bf16.mxu1 %v7133_v31  ;;  %v1799_v31 = vld [vmem:[#allocation16 + $0x490] sm:$0xff]  ;;  %v7228_v12 = vcombine.low %v1832_v46, %v1836_v47 }
 0x54a   : > { %3374 = vmatpush1.bf16.msra.mxu0 %v7130_v34  ;;  %v7186_v34 = vcombine.low %v1791_v17, %v1795_v18  ;;  %v1848_v17 = vld [vmem:[#allocation16 + $0x618] sm:$0xff] }
 0x54b   : > { %3456 = vmatpush1.bf16.msra.mxu1 %v7132_v40  ;;  %3375 = vmatprep.subr.bf16.mxu0 %v7139_v43  ;;  %v7188_v40 = vcombine.low %v1792_v27, %v1796_v28  ;;  %v7195_v43 = vcombine.high %v1799_v31, %v1803_v32  ;;  %v1852_v18 = vld [vmem:[#allocation16 + $0x638] sm:$0xff]  ;;  %v7236_v27 = vcombine.low %v1840_v10, %v1844_v11 }
 0x54c   : > { %3457 = vmatprep.subr.bf16.mxu1 %v7141_v24  ;;  %v7197_v24 = vcombine.high %v1800_v57, %v1804_v23 }
 0x54e   : > { %3376 = vmatpush1.bf16.msra.mxu0 %v7138_v53  ;;  %v7194_v53 = vcombine.low %v1799_v31, %v1803_v32  ;;  %v1859_v31 = vld [vmem:[#allocation16 + $0x670] sm:$0xff]  ;;  %v1856_v32 = vld [vmem:[#allocation16 + $0x658] sm:$0xff] }
 0x54f   : > { %3458 = vmatpush1.bf16.msra.mxu1 %v7140_v56  ;;  %3377 = vmatprep.subr.bf16.mxu0 %v7147_v54  ;;  %v7203_v56 = vcombine.high %v1807_v44, %v1811_v45  ;;  %v7205_v54 = vcombine.high %v1808_v49, %v1812_v25 }
 0x550   : > { %3459 = vmatprep.subr.bf16.mxu1 %v7149_v26  ;;  %v1815_v26 = vld [vmem:[#allocation16 + $0x510] sm:$0xff] }
 0x551   : > { %v7210_v42 = vcombine.low %v1815_v26, %v1819_v55 }
 0x552   : > { %3378 = vmatpush1.bf16.msra.mxu0 %v7146_v62  ;;  %v7211_v62 = vcombine.high %v1815_v26, %v1819_v55  ;;  %v1872_v26 = vld [vmem:[#allocation16 + $0x6d8] sm:$0xff] }
 0x553   : > { %3460 = vmatpush1.bf16.msra.mxu1 %v7148_v63  ;;  %3379 = vmatprep.subr.bf16.mxu0 %v7155_v36  ;;  %v7213_v63 = vcombine.high %v1816_v58, %v1820_v60  ;;  %v1823_v36 = vld [vmem:[#allocation16 + $0x550] sm:$0xff]  ;;  %v1876_v55 = vld [vmem:[#allocation16 + $0x6f8] sm:$0xff] }
 0x554   : > { %3461 = vmatprep.subr.bf16.mxu1 %v7157_v37  ;;  %v1827_v37 = vld [vmem:[#allocation16 + $0x570] sm:$0xff] }
 0x555   : > { %v7218_v48 = vcombine.low %v1823_v36, %v1827_v37 }
 0x556   : > { %3380 = vmatpush1.bf16.msra.mxu0 %v7154_v1  ;;  %v7219_v1 = vcombine.high %v1823_v36, %v1827_v37  ;;  %v1880_v36 = vld [vmem:[#allocation16 + $0x718] sm:$0xff] }
 0x557   : > { %3462 = vmatpush1.bf16.msra.mxu1 %v7156_v2  ;;  %3381 = vmatprep.subr.bf16.mxu0 %v7163_v3  ;;  %v7221_v2 = vcombine.high %v1824_v39, %v1828_v41  ;;  %v1831_v3 = vld [vmem:[#allocation16 + $0x590] sm:$0xff]  ;;  %v1884_v37 = vld [vmem:[#allocation16 + $0x738] sm:$0xff]  ;;  %v7268_v41 = vcombine.low %v1872_v26, %v1876_v55 }
 0x558   : > { %3463 = vmatprep.subr.bf16.mxu1 %v7165_v4  ;;  %v1835_v4 = vld [vmem:[#allocation16 + $0x5b0] sm:$0xff] }
 0x559   : > { %v7226_v35 = vcombine.low %v1831_v3, %v1835_v4 }
 0x55a   : > { %3382 = vmatpush1.bf16.msra.mxu0 %v7162_v51  ;;  %v7227_v51 = vcombine.high %v1831_v3, %v1835_v4  ;;  %v1888_v3 = vld [vmem:[#allocation16 + $0x758] sm:$0xff] }
 0x55b   : > { %3464 = vmatpush1.bf16.msra.mxu1 %v7164_v5  ;;  %3383 = vmatprep.subr.bf16.mxu0 %v7171_v7  ;;  %v7229_v5 = vcombine.high %v1832_v46, %v1836_v47  ;;  %v1839_v7 = vld [vmem:[#allocation16 + $0x5d0] sm:$0xff]  ;;  %v1892_v4 = vld [vmem:[#allocation16 + $0x778] sm:$0xff]  ;;  %v7276_v47 = vcombine.low %v1880_v36, %v1884_v37 }
 0x55c   : > { %3465 = vmatprep.subr.bf16.mxu1 %v7173_v9  ;;  %v1843_v9 = vld [vmem:[#allocation16 + $0x5f0] sm:$0xff] }
 0x55e   : > { %3384 = vmatpush1.bf16.msra.mxu0 %v7170_v13  ;;  %v7235_v13 = vcombine.high %v1839_v7, %v1843_v9 }
 0x55f   : > { %3466 = vmatpush1.bf16.msra.mxu1 %v7172_v14  ;;  %3394 = vmatprep.subr.bf16.mxu0 %v7179_v15  ;;  %v7237_v14 = vcombine.high %v1840_v10, %v1844_v11  ;;  %v1847_v15 = vld [vmem:[#allocation16 + $0x610] sm:$0xff]  ;;  %v7284_v11 = vcombine.low %v1888_v3, %v1892_v4 }
 0x560   : > { %3476 = vmatprep.subr.bf16.mxu1 %v7181_v16  ;;  %v1851_v16 = vld [vmem:[#allocation16 + $0x630] sm:$0xff] }
 0x561   : > { %3386 = vmatmul.mubr.bf16.vlgmr.msra.gmra.mrb[12].mxu0 %v9815_v59  ;;  %v7243_v28 = vcombine.high %v1847_v15, %v1851_v16 }
 0x562   : > { %3468 = vmatmul.mubr.bf16.vlgmr.msra.gmra.mrb[12].mxu1 %v9815_v59  ;;  %3395 = vmatpush1.bf16.msra.mxu0 %v7178_v21  ;;  %v7196_v59 = vcombine.low %v1800_v57, %v1804_v23  ;;  %v7234_v21 = vcombine.low %v1839_v7, %v1843_v9  ;;  %v7242_v57 = vcombine.low %v1847_v15, %v1851_v16  ;;  %v1896_v7 = vld [vmem:[#allocation16 + $0x798] sm:$0xff] }
 0x563   : > { %3426 = vmatprep.mubr.bf16.mxu0 %v9821_v38  ;;  %3477 = vmatpush1.bf16.msra.mxu1 %v7180_v29  ;;  %v7245_v29 = vcombine.high %v1848_v17, %v1852_v18  ;;  %v7244_v23 = vcombine.low %v1848_v17, %v1852_v18  ;;  %v1900_v9 = vld [vmem:[#allocation16 + $0x7b8] sm:$0xff] }
 0x564   : > { %3508 = vmatprep.mubr.bf16.mxu1 %v9821_v38  ;;  %3396 = vmatprep.subr.bf16.mxu0 %v7187_v30  ;;  %v7202_v38 = vcombine.low %v1807_v44, %v1811_v45  ;;  %v1855_v30 = vld [vmem:[#allocation16 + $0x650] sm:$0xff]  ;;  %v1864_v44 = vld [vmem:[#allocation16 + $0x698] sm:$0xff]  ;;  %v7292_v18 = vcombine.low %v1896_v7, %v1900_v9 }
 0x565   : > { %3478 = vmatprep.subr.bf16.mxu1 %v7189_v33  ;;  %v1860_v33 = vld [vmem:[#allocation16 + $0x678] sm:$0xff]  ;;  %v7250_v49 = vcombine.low %v1855_v30, %v1859_v31 }
 0x566   : > { %3397 = vmatpush1.bf16.msra.mxu0 %v7186_v34  ;;  %v7251_v34 = vcombine.high %v1855_v30, %v1859_v31  ;;  %v1868_v45 = vld [vmem:[#allocation16 + $0x6b8] sm:$0xff]  ;;  %v7252_v25 = vcombine.low %v1856_v32, %v1860_v33 }
 0x567   : > { %3479 = vmatpush1.bf16.msra.mxu1 %v7188_v40  ;;  %3398 = vmatprep.subr.bf16.mxu0 %v7195_v43  ;;  %v7253_v40 = vcombine.high %v1856_v32, %v1860_v33  ;;  %v1863_v43 = vld [vmem:[#allocation16 + $0x690] sm:$0xff]  ;;  %v7260_v60 = vcombine.low %v1864_v44, %v1868_v45  ;;  %v1904_v15 = vld [vmem:[#allocation16 + $0x7d8] sm:$0xff] }
 0x568   : > { %3480 = vmatprep.subr.bf16.mxu1 %v7197_v24  ;;  %v1867_v24 = vld [vmem:[#allocation16 + $0x6b0] sm:$0xff]  ;;  %v1908_v16 = vld [vmem:[#allocation16 + $0x7f8] sm:$0xff] }
 0x569   : > { %v7258_v58 = vcombine.low %v1863_v43, %v1867_v24 }
 0x56a   : > { %3399 = vmatpush1.bf16.msra.mxu0 %v7194_v53  ;;  %v7259_v53 = vcombine.high %v1863_v43, %v1867_v24 }
 0x56b   : > { %3481 = vmatpush1.bf16.msra.mxu1 %v7196_v59  ;;  %3400 = vmatprep.subr.bf16.mxu0 %v7203_v56  ;;  %v7261_v59 = vcombine.high %v1864_v44, %v1868_v45  ;;  %v1871_v56 = vld [vmem:[#allocation16 + $0x6d0] sm:$0xff] }
 0x56c   : > { %3482 = vmatprep.subr.bf16.mxu1 %v7205_v54  ;;  %v1875_v54 = vld [vmem:[#allocation16 + $0x6f0] sm:$0xff] }
 0x56d   : > { %v7266_v39 = vcombine.low %v1871_v56, %v1875_v54 }
 0x56e   : > { %3401 = vmatpush1.bf16.msra.mxu0 %v7202_v38  ;;  %v7267_v38 = vcombine.high %v1871_v56, %v1875_v54 }
 0x56f   : > { %3483 = vmatpush1.bf16.msra.mxu1 %v7204_v61  ;;  %3402 = vmatprep.subr.bf16.mxu0 %v7211_v62  ;;  %v7269_v61 = vcombine.high %v1872_v26, %v1876_v55  ;;  %v1879_v62 = vld [vmem:[#allocation16 + $0x710] sm:$0xff] }
 0x570   : > { %3484 = vmatprep.subr.bf16.mxu1 %v7213_v63  ;;  %v1883_v63 = vld [vmem:[#allocation16 + $0x730] sm:$0xff] }
 0x571   : > { %v7274_v46 = vcombine.low %v1879_v62, %v1883_v63 }
 0x572   : > { %3403 = vmatpush1.bf16.msra.mxu0 %v7210_v42  ;;  %v7275_v42 = vcombine.high %v1879_v62, %v1883_v63 }
 0x573   : > { %3485 = vmatpush1.bf16.msra.mxu1 %v7212_v0  ;;  %3404 = vmatprep.subr.bf16.mxu0 %v7219_v1  ;;  %v7277_v0 = vcombine.high %v1880_v36, %v1884_v37  ;;  %v1887_v1 = vld [vmem:[#allocation16 + $0x750] sm:$0xff] }
 0x574   : > { %3486 = vmatprep.subr.bf16.mxu1 %v7221_v2  ;;  %v1891_v2 = vld [vmem:[#allocation16 + $0x770] sm:$0xff] }
 0x575   : > { %v7282_v10 = vcombine.low %v1887_v1, %v1891_v2 }
 0x576   : > { %3405 = vmatpush1.bf16.msra.mxu0 %v7218_v48  ;;  %v7283_v48 = vcombine.high %v1887_v1, %v1891_v2 }
 0x577   : > { %3487 = vmatpush1.bf16.msra.mxu1 %v7220_v50  ;;  %3406 = vmatprep.subr.bf16.mxu0 %v7227_v51  ;;  %v7285_v50 = vcombine.high %v1888_v3, %v1892_v4  ;;  %v1895_v51 = vld [vmem:[#allocation16 + $0x790] sm:$0xff] }
 0x578   : > { %3488 = vmatprep.subr.bf16.mxu1 %v7229_v5  ;;  %v1899_v5 = vld [vmem:[#allocation16 + $0x7b0] sm:$0xff] }
 0x579   : > { %v7290_v17 = vcombine.low %v1895_v51, %v1899_v5 }
 0x57a   : > { %3407 = vmatpush1.bf16.msra.mxu0 %v7226_v35  ;;  %v7291_v35 = vcombine.high %v1895_v51, %v1899_v5 }
 0x57b   : > { %3489 = vmatpush1.bf16.msra.mxu1 %v7228_v12  ;;  %3408 = vmatprep.subr.bf16.mxu0 %v7235_v13  ;;  %v7293_v12 = vcombine.high %v1896_v7, %v1900_v9  ;;  %v1903_v13 = vld [vmem:[#allocation16 + $0x7d0] sm:$0xff] }
 0x57c   : > { %3490 = vmatprep.subr.bf16.mxu1 %v7237_v14  ;;  %v1907_v14 = vld [vmem:[#allocation16 + $0x7f0] sm:$0xff] }
 0x57e   : > { %3409 = vmatpush1.bf16.msra.mxu0 %v7234_v21  ;;  %v7299_v21 = vcombine.high %v1903_v13, %v1907_v14 }
 0x57f   : > { %3491 = vmatpush1.bf16.msra.mxu1 %v7236_v27  ;;  %3410 = vmatprep.subr.bf16.mxu0 %v7243_v28  ;;  %v7301_v27 = vcombine.high %v1904_v15, %v1908_v16  ;;  %v7298_v28 = vcombine.low %v1903_v13, %v1907_v14 }
 0x580   : > { %3492 = vmatprep.subr.bf16.mxu1 %v7245_v29  ;;  %v7300_v29 = vcombine.low %v1904_v15, %v1908_v16 }
 0x582   : > { %3411 = vmatpush1.bf16.msra.mxu0 %v7242_v57 }
 0x583   : > { %3493 = vmatpush1.bf16.msra.mxu1 %v7244_v23  ;;  %3412 = vmatprep.subr.bf16.mxu0 %v7251_v34 }
 0x584   : > { %3494 = vmatprep.subr.bf16.mxu1 %v7253_v40 }
 0x586   : > { %3413 = vmatpush1.bf16.msra.mxu0 %v7250_v49 }
 0x587   : > { %3495 = vmatpush1.bf16.msra.mxu1 %v7252_v25  ;;  %3414 = vmatprep.subr.bf16.mxu0 %v7259_v53 }
 0x588   : > { %3496 = vmatprep.subr.bf16.mxu1 %v7261_v59 }
 0x58a   : > { %3415 = vmatpush1.bf16.msra.mxu0 %v7258_v58 }
 0x58b   : > { %3497 = vmatpush1.bf16.msra.mxu1 %v7260_v60  ;;  %3416 = vmatprep.subr.bf16.mxu0 %v7267_v38 }
 0x58c   : > { %3498 = vmatprep.subr.bf16.mxu1 %v7269_v61 }
 0x58e   : > { %3417 = vmatpush1.bf16.msra.mxu0 %v7266_v39 }
 0x58f   : > { %3499 = vmatpush1.bf16.msra.mxu1 %v7268_v41  ;;  %3418 = vmatprep.subr.bf16.mxu0 %v7275_v42 }
 0x590   : > { %3500 = vmatprep.subr.bf16.mxu1 %v7277_v0 }
 0x592   : > { %3419 = vmatpush1.bf16.msra.mxu0 %v7274_v46 }
 0x593   : > { %3501 = vmatpush1.bf16.msra.mxu1 %v7276_v47  ;;  %3420 = vmatprep.subr.bf16.mxu0 %v7283_v48 }
 0x594   : > { %3502 = vmatprep.subr.bf16.mxu1 %v7285_v50 }
 0x596   : > { %3421 = vmatpush1.bf16.msra.mxu0 %v7282_v10 }
 0x597   : > { %3503 = vmatpush1.bf16.msra.mxu1 %v7284_v11  ;;  %3422 = vmatprep.subr.bf16.mxu0 %v7291_v35 }
 0x598   : > { %3504 = vmatprep.subr.bf16.mxu1 %v7293_v12 }
 0x59a   : > { %3423 = vmatpush1.bf16.msra.mxu0 %v7290_v17 }
 0x59b   : > { %3505 = vmatpush1.bf16.msra.mxu1 %v7292_v18  ;;  %3424 = vmatprep.subr.bf16.mxu0 %v7299_v21 }
 0x59c   : > { %3506 = vmatprep.subr.bf16.mxu1 %v7301_v27 }
 0x59e   : > { %3425 = vmatpush1.bf16.msra.mxu0 %v7298_v28 }
 0x59f   : > { %3507 = vmatpush1.bf16.msra.mxu1 %v7300_v29 }
 0x5a1   : > { %3427 = vmatmul.mubr.bf16.vlgmr.msra.gmra.mrb[12].mxu0 %v9834_v52 }
 0x5a2   : > { %3509 = vmatmul.mubr.bf16.vlgmr.msra.gmra.mrb[12].mxu1 %v9834_v52 }
 0x5f4   : > { %v3264_v30 = vpop.f32.mrb[8].mxu0  ;;  %v3346_v31 = vpop.f32.mrb[8].mxu1 }
 0x5f5   : > { %v3519_v32 = vrot.slane %v3264_v30, 4  ;;  %v3531_v33 = vrot.slane %v3346_v31, 4  ;;  %v3266_v57 = vpop.f32.mrb[9].mxu0  ;;  %v3348_v23 = vpop.f32.mrb[9].mxu1 }
 0x5f6   : > { %v3525_v34 = vrot.slane %v3266_v57, 4  ;;  %v3537_v40 = vrot.slane %v3348_v23, 4  ;;  %v3268_v43 = vpop.f32.mrb[10].mxu0  ;;  %v3350_v24 = vpop.f32.mrb[10].mxu1 }
 0x5f7   : > { %v3520_v44 = vadd.f32 %v3519_v32, %v3264_v30  ;;  %v3532_v45 = vadd.f32 %v3531_v33, %v3346_v31  ;;  %v3269_v49 = vpop.f32.mrb[11].mxu0  ;;  %v3351_v25 = vpop.f32.mrb[11].mxu1 }
 0x5f8   : > { %v3526_v53 = vadd.f32 %v3525_v34, %v3266_v57  ;;  %v3538_v59 = vadd.f32 %v3537_v40, %v3348_v23 }
 0x5f9   : > { %v3521_v56 = vrot.slane %v3520_v44, 2  ;;  %v3533_v54 = vrot.slane %v3532_v45, 2 }
 0x5fa   : > { %v3527_v26 = vrot.slane %v3526_v53, 2  ;;  %v3539_v52 = vrot.slane %v3538_v59, 2 }
 0x5fb   : > { %v3522_v55 = vadd.f32 %v3521_v56, %v3520_v44  ;;  %v3534_v58 = vadd.f32 %v3533_v54, %v3532_v45  ;;  %v9846_v54 = vld [vmem:[#allocation17] sm:$0xff] }
 0x5fc   : > { %v3528_v60 = vadd.f32 %v3527_v26, %v3526_v53  ;;  %v3540_v38 = vadd.f32 %v3539_v52, %v3538_v59  ;;  %v9848_v26 = vld [vmem:[#allocation19] sm:$0xff]  ;;  %v3675_v52 = vrot.slane %v9846_v54, %v9766_v20 }
 0x5fd   : > { %v3523_v61 = vrot.slane %v3522_v55, 1  ;;  %v3535_v62 = vrot.slane %v3534_v58, 1 }
 0x5fe   : > { %v3529_v63 = vrot.slane %v3528_v60, 1  ;;  %v3541_v36 = vrot.slane %v3540_v38, 1 }
 0x5ff   : > { %v3524_v37 = vadd.f32 %v3523_v61, %v3522_v55  ;;  %v3536_v39 = vadd.f32 %v3535_v62, %v3534_v58  ;;  %v3683_v58 = vrot.slane %v9846_v54, %v9798_v6  ;;  %v3724_v61 = vrot.slane %v9848_v26, %v9766_v20 }
 0x600   : > { %v3530_v41 = vadd.f32 %v3529_v63, %v3528_v60  ;;  %v3542_v42 = vadd.f32 %v3541_v36, %v3540_v38  ;;  %v3679_v62 = vrot.slane %v9846_v54, %v9769_v22  ;;  %v3736_v20 = vrot.slane %v9848_v26, %v9801_v8 }
 0x601   : > { %v3567_v0 = vmul.f32 0.125, %v3524_v37  ;;  %v3569_v1 = vmul.f32 0.125, %v3536_v39  ;;  %v3732_v37 = vrot.slane %v9848_v26, %v9798_v6  ;;  %v3687_v39 = vrot.slane %v9846_v54, %v9801_v8 }
 0x602   : > { %v3568_v2 = vmul.f32 0.125, %v3530_v41  ;;  %v3570_v3 = vmul.f32 0.125, %v3542_v42 }
 0x603   : > { %v3575_v4 = vsub.f32 %v3264_v30, %v3567_v0  ;;  %v3577_v46 = vsub.f32 %v3346_v31, %v3569_v1  ;;  %v3728_v1 = vrot.slane %v9848_v26, %v9769_v22 }
 0x604   : > { %v3576_v47 = vsub.f32 %v3266_v57, %v3568_v2  ;;  %v3578_v48 = vsub.f32 %v3348_v23, %v3570_v3 }
 0x605   : > { %v3583_v50 = vmul.f32 %v3575_v4, %v3575_v4  ;;  %v3585_v51 = vmul.f32 %v3577_v46, %v3577_v46 }
 0x606   : > { %v3584_v5 = vmul.f32 %v3576_v47, %v3576_v47  ;;  %v3586_v7 = vmul.f32 %v3578_v48, %v3578_v48 }
 0x607   : > { %v3591_v9 = vrot.slane %v3583_v50, 4  ;;  %v3603_v10 = vrot.slane %v3585_v51, 4 }
 0x608   : > { %v3597_v11 = vrot.slane %v3584_v5, 4  ;;  %v3609_v35 = vrot.slane %v3586_v7, 4 }
 0x609   : > { %v3592_v12 = vadd.f32 %v3591_v9, %v3583_v50  ;;  %v3604_v13 = vadd.f32 %v3603_v10, %v3585_v51 }
 0x60a   : > { %v3598_v14 = vadd.f32 %v3597_v11, %v3584_v5  ;;  %v3610_v15 = vadd.f32 %v3609_v35, %v3586_v7 }
 0x60b   : > { %v3593_v16 = vrot.slane %v3592_v12, 2  ;;  %v3605_v17 = vrot.slane %v3604_v13, 2 }
 0x60c   : > { %v3599_v18 = vrot.slane %v3598_v14, 2  ;;  %v3611_v21 = vrot.slane %v3610_v15, 2 }
 0x60d   : > { %v3594_v27 = vadd.f32 %v3593_v16, %v3592_v12  ;;  %v3606_v28 = vadd.f32 %v3605_v17, %v3604_v13 }
 0x60e   : > { %v3600_v29 = vadd.f32 %v3599_v18, %v3598_v14  ;;  %v3612_v30 = vadd.f32 %v3611_v21, %v3610_v15 }
 0x60f   : > { %v3595_v31 = vrot.slane %v3594_v27, 1  ;;  %v3607_v32 = vrot.slane %v3606_v28, 1 }
 0x610   : > { %v3601_v33 = vrot.slane %v3600_v29, 1  ;;  %v3613_v57 = vrot.slane %v3612_v30, 1 }
 0x611   : > { %v3596_v23 = vadd.f32 %v3595_v31, %v3594_v27  ;;  %v3608_v34 = vadd.f32 %v3607_v32, %v3606_v28 }
 0x612   : > { %v3602_v40 = vadd.f32 %v3601_v33, %v3600_v29  ;;  %v3614_v43 = vadd.f32 %v3613_v57, %v3612_v30 }
 0x613   : > { %v3639_v24 = vmul.f32 0.125, %v3596_v23  ;;  %v3641_v44 = vmul.f32 0.125, %v3608_v34 }
 0x614   : > { %v3640_v45 = vmul.f32 0.125, %v3602_v40  ;;  %v3642_v49 = vmul.f32 0.125, %v3614_v43 }
 0x615   : > { %v3647_v25 = vadd.f32 0.8, %v3639_v24  ;;  %v3649_v53 = vadd.f32 0.8, %v3641_v44 }
 0x616   : > { %v3648_v59 = vadd.f32 0.8, %v3640_v45  ;;  %v3650_v56 = vadd.f32 0.8, %v3642_v49 }
 0x617   : > { %8136 = vrsqrt.f32 %v3647_v25 }
 0x618   : > { %8138 = vrsqrt.f32 %v3649_v53 }
 0x619   : > { %8140 = vrsqrt.f32 %v3648_v59 }
 0x61a   : > { %8142 = vrsqrt.f32 %v3650_v56 }
 0x621   : > { %v8137_v55 = vpop.eup %8136 }
 0x622   : > { %v8139_v60 = vpop.eup %8138  ;;  %v3663_v38 = vmul.f32 %v8137_v55, %v3575_v4 }
 0x623   : > { %v8141_v63 = vpop.eup %8140  ;;  %v3665_v36 = vmul.f32 %v8139_v60, %v3577_v46 }
 0x624   : > { %v8143_v41 = vpop.eup %8142  ;;  %v3712_v42 = vmul.f32 %v3675_v52, %v3663_v38  ;;  %v3664_v0 = vmul.f32 %v8141_v63, %v3576_v47 }
 0x625   : > { %v3714_v2 = vmul.f32 %v3683_v58, %v3665_v36  ;;  %v3666_v3 = vmul.f32 %v8143_v41, %v3578_v48 }
 0x626   : > { %v3761_v4 = vadd.f32 %v3724_v61, %v3712_v42  ;;  %v3713_v50 = vmul.f32 %v3679_v62, %v3664_v0 }
 0x627   : > { %v3763_v46 = vadd.f32 %v3732_v37, %v3714_v2  ;;  %v3715_v51 = vmul.f32 %v3687_v39, %v3666_v3 }
 0x628   : > { %vm3769_vm8 = vcmp.gt.f32.partialorder %v3761_v4, 0.0  ;;  %v3777_v6 = vmul.f32 0.2, %v3761_v4  ;;  %v3762_v5 = vadd.f32 %v3728_v1, %v3713_v50 }
 0x629   : > { %vm3771_vm9 = vcmp.gt.f32.partialorder %v3763_v46, 0.0  ;;  %v3779_v7 = vmul.f32 0.2, %v3763_v46  ;;  %v3764_v9 = vadd.f32 %v3736_v20, %v3715_v51 }
 0x62a   : > { %v3785_v10 = vsel %vm3769_vm8, %v3761_v4, %v3777_v6  ;;  %vm3770_vm10 = vcmp.gt.f32.partialorder %v3762_v5, 0.0  ;;  %v3778_v47 = vmul.f32 0.2, %v3762_v5 }
 0x62b   : > { %v3787_v11 = vsel %vm3771_vm9, %v3763_v46, %v3779_v7  ;;  %vm3772_vm11 = vcmp.gt.f32.partialorder %v3764_v9, 0.0  ;;  %v3780_v22 = vmul.f32 0.2, %v3764_v9 }
 0x62c   : > { %v3786_v48 = vsel %vm3770_vm10, %v3762_v5, %v3778_v47 }
 0x62d   : > { %v7702_v35 = vpack.c.bf16 %v3786_v48, %v3785_v10  ;;  %v3788_v12 = vsel %vm3772_vm11, %v3764_v9, %v3780_v22 }
 0x62e   : > { %v7703_v8 = vpack.c.bf16 %v3788_v12, %v3787_v11 }
 0x62f   : > { %3825 = vst [vmem:[#allocation2] sm:$0xff] %v7702_v35 }
 0x630   : > { %3826 = vst [vmem:[#allocation2 + $0x8] sm:$0xff] %v7703_v8 }
 0x674   : > { %v3428_v13 = vpop.f32.mrb[12].mxu0 }
 0x675   : > { %v3543_v14 = vrot.slane %v3428_v13, 4  ;;  %v3510_v15 = vpop.f32.mrb[12].mxu1  ;;  %v3430_v16 = vpop.f32.mrb[13].mxu0 }
 0x676   : > { %v3555_v17 = vrot.slane %v3510_v15, 4  ;;  %v3549_v18 = vrot.slane %v3430_v16, 4  ;;  %v3512_v21 = vpop.f32.mrb[13].mxu1  ;;  %v3432_v27 = vpop.f32.mrb[14].mxu0 }
 0x677   : > { %v3544_v28 = vadd.f32 %v3543_v14, %v3428_v13  ;;  %v3561_v29 = vrot.slane %v3512_v21, 4  ;;  %v3514_v30 = vpop.f32.mrb[14].mxu1  ;;  %v3433_v31 = vpop.f32.mrb[15].mxu0 }
 0x678   : > { %v3556_v32 = vadd.f32 %v3555_v17, %v3510_v15  ;;  %v3550_v33 = vadd.f32 %v3549_v18, %v3430_v16  ;;  %v3515_v57 = vpop.f32.mrb[15].mxu1 }
 0x679   : > { %v3545_v23 = vrot.slane %v3544_v28, 2  ;;  %v3562_v34 = vadd.f32 %v3561_v29, %v3512_v21 }
 0x67a   : > { %v3557_v40 = vrot.slane %v3556_v32, 2  ;;  %v3551_v43 = vrot.slane %v3550_v33, 2 }
 0x67b   : > { %v3546_v24 = vadd.f32 %v3545_v23, %v3544_v28  ;;  %v3563_v44 = vrot.slane %v3562_v34, 2  ;;  %v3690_v23 = vsub.s32 4, %v9763_v19 }
 0x67c   : > { %v3558_v45 = vadd.f32 %v3557_v40, %v3556_v32  ;;  %v3552_v49 = vadd.f32 %v3551_v43, %v3550_v33  ;;  %v3694_v40 = vsub.s32 5, %v9763_v19  ;;  %v3702_v43 = vsub.s32 7, %v9763_v19 }
 0x67d   : > { %v3547_v25 = vrot.slane %v3546_v24, 1  ;;  %v3564_v53 = vadd.f32 %v3563_v44, %v3562_v34  ;;  %v3698_v34 = vsub.s32 6, %v9763_v19 }
 0x67e   : > { %v3559_v59 = vrot.slane %v3558_v45, 1  ;;  %v3553_v56 = vrot.slane %v3552_v49, 1 }
 0x67f   : > { %v3548_v52 = vadd.f32 %v3547_v25, %v3546_v24  ;;  %v3565_v55 = vrot.slane %v3564_v53, 1  ;;  %v3691_v24 = vrot.slane %v9846_v54, %v3690_v23 }
 0x680   : > { %v3560_v58 = vadd.f32 %v3559_v59, %v3558_v45  ;;  %v3554_v60 = vadd.f32 %v3553_v56, %v3552_v49  ;;  %v3699_v45 = vrot.slane %v9846_v54, %v3698_v34  ;;  %v3695_v59 = vrot.slane %v9846_v54, %v3694_v40 }
 0x681   : > { %v3571_v38 = vmul.f32 0.125, %v3548_v52  ;;  %v3566_v61 = vadd.f32 %v3565_v55, %v3564_v53  ;;  %v3740_v53 = vrot.slane %v9848_v26, %v3690_v23  ;;  %v3748_v55 = vrot.slane %v9848_v26, %v3698_v34 }
 0x682   : > { %v3573_v62 = vmul.f32 0.125, %v3560_v58  ;;  %v3572_v63 = vmul.f32 0.125, %v3554_v60  ;;  %v3703_v58 = vrot.slane %v9846_v54, %v3702_v43 }
 0x683   : > { %v3579_v36 = vsub.f32 %v3428_v13, %v3571_v38  ;;  %v3574_v37 = vmul.f32 0.125, %v3566_v61  ;;  %v3744_v61 = vrot.slane %v9848_v26, %v3694_v40 }
 0x684   : > { %v3581_v39 = vsub.f32 %v3510_v15, %v3573_v62  ;;  %v3580_v41 = vsub.f32 %v3430_v16, %v3572_v63 }
 0x685   : > { %v3587_v42 = vmul.f32 %v3579_v36, %v3579_v36  ;;  %v3582_v0 = vsub.f32 %v3512_v21, %v3574_v37  ;;  %v3752_v37 = vrot.slane %v9848_v26, %v3702_v43 }
 0x686   : > { %v3589_v1 = vmul.f32 %v3581_v39, %v3581_v39  ;;  %v3588_v2 = vmul.f32 %v3580_v41, %v3580_v41 }
 0x687   : > { %v3615_v3 = vrot.slane %v3587_v42, 4  ;;  %v3590_v20 = vmul.f32 %v3582_v0, %v3582_v0 }
 0x688   : > { %v3627_v4 = vrot.slane %v3589_v1, 4  ;;  %v3621_v50 = vrot.slane %v3588_v2, 4 }
 0x689   : > { %v3616_v46 = vadd.f32 %v3615_v3, %v3587_v42  ;;  %v3633_v51 = vrot.slane %v3590_v20, 4 }
 0x68a   : > { %v3628_v6 = vadd.f32 %v3627_v4, %v3589_v1  ;;  %v3622_v5 = vadd.f32 %v3621_v50, %v3588_v2 }
 0x68b   : > { %v3617_v7 = vrot.slane %v3616_v46, 2  ;;  %v3634_v9 = vadd.f32 %v3633_v51, %v3590_v20 }
 0x68c   : > { %v3629_v10 = vrot.slane %v3628_v6, 2  ;;  %v3623_v47 = vrot.slane %v3622_v5, 2 }
 0x68d   : > { %v3618_v11 = vadd.f32 %v3617_v7, %v3616_v46  ;;  %v3635_v22 = vrot.slane %v3634_v9, 2 }
 0x68e   : > { %v3630_v48 = vadd.f32 %v3629_v10, %v3628_v6  ;;  %v3624_v35 = vadd.f32 %v3623_v47, %v3622_v5 }
 0x68f   : > { %v3619_v12 = vrot.slane %v3618_v11, 1  ;;  %v3636_v8 = vadd.f32 %v3635_v22, %v3634_v9 }
 0x690   : > { %v3631_v13 = vrot.slane %v3630_v48, 1  ;;  %v3625_v14 = vrot.slane %v3624_v35, 1 }
 0x691   : > { %v3620_v15 = vadd.f32 %v3619_v12, %v3618_v11  ;;  %v3637_v16 = vrot.slane %v3636_v8, 1 }
 0x692   : > { %v3632_v17 = vadd.f32 %v3631_v13, %v3630_v48  ;;  %v3626_v18 = vadd.f32 %v3625_v14, %v3624_v35 }
 0x693   : > { %v3643_v21 = vmul.f32 0.125, %v3620_v15  ;;  %v3638_v27 = vadd.f32 %v3637_v16, %v3636_v8 }
 0x694   : > { %v3645_v28 = vmul.f32 0.125, %v3632_v17  ;;  %v3644_v29 = vmul.f32 0.125, %v3626_v18 }
 0x695   : > { %v3651_v30 = vadd.f32 0.8, %v3643_v21  ;;  %v3646_v31 = vmul.f32 0.125, %v3638_v27 }
 0x696   : > { %v3653_v32 = vadd.f32 0.8, %v3645_v28  ;;  %v3652_v33 = vadd.f32 0.8, %v3644_v29 }
 0x697   : > { %8144 = vrsqrt.f32 %v3651_v30  ;;  %v3654_v57 = vadd.f32 0.8, %v3646_v31 }
 0x698   : > { %8146 = vrsqrt.f32 %v3653_v32 }
 0x699   : > { %8148 = vrsqrt.f32 %v3652_v33 }
 0x69a   : > { %8150 = vrsqrt.f32 %v3654_v57 }
 0x6a1   : > { %v8145_v44 = vpop.eup %8144 }
 0x6a2   : > { %v8147_v49 = vpop.eup %8146  ;;  %v3667_v25 = vmul.f32 %v8145_v44, %v3579_v36 }
 0x6a3   : > { %v8149_v56 = vpop.eup %8148  ;;  %v3669_v52 = vmul.f32 %v8147_v49, %v3581_v39 }
 0x6a4   : > { %v8151_v60 = vpop.eup %8150  ;;  %v3716_v38 = vmul.f32 %v3691_v24, %v3667_v25  ;;  %v3668_v19 = vmul.f32 %v8149_v56, %v3580_v41 }
 0x6a5   : > { %v3718_v62 = vmul.f32 %v3699_v45, %v3669_v52  ;;  %v3670_v63 = vmul.f32 %v8151_v60, %v3582_v0 }
 0x6a6   : > { %v3765_v36 = vadd.f32 %v3740_v53, %v3716_v38  ;;  %v3717_v42 = vmul.f32 %v3695_v59, %v3668_v19 }
 0x6a7   : > { %v3767_v1 = vadd.f32 %v3748_v55, %v3718_v62  ;;  %v3719_v2 = vmul.f32 %v3703_v58, %v3670_v63 }
 0x6a8   : > { %vm3773_vm12 = vcmp.gt.f32.partialorder %v3765_v36, 0.0  ;;  %v3781_v3 = vmul.f32 0.2, %v3765_v36  ;;  %v3766_v39 = vadd.f32 %v3744_v61, %v3717_v42 }
 0x6a9   : > { %vm3775_vm13 = vcmp.gt.f32.partialorder %v3767_v1, 0.0  ;;  %v3783_v20 = vmul.f32 0.2, %v3767_v1  ;;  %v3768_v4 = vadd.f32 %v3752_v37, %v3719_v2 }
 0x6aa   : > { %v3789_v54 = vsel %vm3773_vm12, %v3765_v36, %v3781_v3  ;;  %vm3774_vm14 = vcmp.gt.f32.partialorder %v3766_v39, 0.0  ;;  %v3782_v50 = vmul.f32 0.2, %v3766_v39 }
 0x6ab   : > { %v3791_v41 = vsel %vm3775_vm13, %v3767_v1, %v3783_v20  ;;  %vm3776_vm15 = vcmp.gt.f32.partialorder %v3768_v4, 0.0  ;;  %v3784_v46 = vmul.f32 0.2, %v3768_v4 }
 0x6ac   : > { %v3790_v51 = vsel %vm3774_vm14, %v3766_v39, %v3782_v50 }
 0x6ad   : > { %v7704_v0 = vpack.c.bf16 %v3790_v51, %v3789_v54  ;;  %v3792_v6 = vsel %vm3776_vm15, %v3768_v4, %v3784_v46 }
 0x6ae   : > { %v7705_v26 = vpack.c.bf16 %v3792_v6, %v3791_v41 }
 0x6af   : > { %3827 = vst [vmem:[#allocation2 + $0x10] sm:$0xff] %v7704_v0 }
 0x6b0   : > { %3828 = vst [vmem:[#allocation2 + $0x18] sm:$0xff] %v7705_v26 }
 0x6b1 PF: > { %v8152_v5 = vld [vmem:[%s9727_s6 + $0x4] ss:$24 sps:$4 sm:$0xff]   ;;  %v8156_v9 = vld [vmem:[%s9727_s6] ss:$24 sps:$4 sm:$0xff]   ;;  %v8158_v47 = vld [vmem:[%s9727_s6 + $0x34] ss:$24 sps:$4 sm:$0xff]  }
 0x6b2   : > { %v8154_v7 = vld [vmem:[%s9727_s6 + $0x604] ss:$24 sps:$4 sm:$0xff]   ;;  %6197 = vmatprep.subr.bf16.mxu1 %v8152_v5  ;;  %v8157_v10 = vld [vmem:[%s9727_s6 + $0x600] ss:$24 sps:$4 sm:$0xff]   ;;  %v8160_v11 = vld [vmem:[%s9727_s6 + $0x634] ss:$24 sps:$4 sm:$0xff]  }
 0x6b3   : > { %6279 = vmatprep.subr.bf16.mxu0 %v8154_v7  ;;  %6198 = vmatpush1.bf16.msra.mxu1 %v8156_v9  ;;  %v8162_v22 = vld [vmem:[%s9727_s6 + $0x30] ss:$24 sps:$4 sm:$0xff]   ;;  %v8164_v35 = vld [vmem:[%s9727_s6 + $0x64] ss:$24 sps:$4 sm:$0xff]   ;;  %v8168_v8 = vld [vmem:[%s9727_s6 + $0x60] ss:$24 sps:$4 sm:$0xff]  }
 0x6b4   : > { %6280 = vmatpush1.bf16.msra.mxu0 %v8157_v10  ;;  %6199 = vmatprep.subr.bf16.mxu1 %v8158_v47  ;;  %v8163_v48 = vld [vmem:[%s9727_s6 + $0x630] ss:$24 sps:$4 sm:$0xff]   ;;  %v8166_v12 = vld [vmem:[%s9727_s6 + $0x664] ss:$24 sps:$4 sm:$0xff]   ;;  %v8169_v13 = vld [vmem:[%s9727_s6 + $0x660] ss:$24 sps:$4 sm:$0xff]  }
 0x6b5   : > { %6281 = vmatprep.subr.bf16.mxu0 %v8160_v11  ;;  %v8170_v14 = vld [vmem:[%s9727_s6 + $0x94] ss:$24 sps:$4 sm:$0xff]   ;;  %v8174_v16 = vld [vmem:[%s9727_s6 + $0x90] ss:$24 sps:$4 sm:$0xff]   ;;  %v8176_v18 = vld [vmem:[%s9727_s6 + $0xc4] ss:$24 sps:$4 sm:$0xff]  }
 0x6b6   : > { %v8172_v15 = vld [vmem:[%s9727_s6 + $0x694] ss:$24 sps:$4 sm:$0xff]   ;;  %v8175_v17 = vld [vmem:[%s9727_s6 + $0x690] ss:$24 sps:$4 sm:$0xff]   ;;  %v8178_v21 = vld [vmem:[%s9727_s6 + $0x6c4] ss:$24 sps:$4 sm:$0xff]  }
 0x6b7   : > { %6200 = vmatpush1.bf16.msra.mxu1 %v8162_v22  ;;  %v8180_v27 = vld [vmem:[%s9727_s6 + $0xc0] ss:$24 sps:$4 sm:$0xff]   ;;  %v8182_v29 = vld [vmem:[%s9727_s6 + $0xf4] ss:$24 sps:$4 sm:$0xff]   ;;  %v8186_v31 = vld [vmem:[%s9727_s6 + $0xf0] ss:$24 sps:$4 sm:$0xff]  }
 0x6b8   : > { %6282 = vmatpush1.bf16.msra.mxu0 %v8163_v48  ;;  %6201 = vmatprep.subr.bf16.mxu1 %v8164_v35  ;;  %v8181_v28 = vld [vmem:[%s9727_s6 + $0x6c0] ss:$24 sps:$4 sm:$0xff]   ;;  %v8184_v30 = vld [vmem:[%s9727_s6 + $0x6f4] ss:$24 sps:$4 sm:$0xff]   ;;  %v8187_v32 = vld [vmem:[%s9727_s6 + $0x6f0] ss:$24 sps:$4 sm:$0xff]  }
 0x6b9   : > { %6283 = vmatprep.subr.bf16.mxu0 %v8166_v12  ;;  %v8188_v33 = vld [vmem:[%s9727_s6 + $0x124] ss:$24 sps:$4 sm:$0xff]   ;;  %v8192_v23 = vld [vmem:[%s9727_s6 + $0x120] ss:$24 sps:$4 sm:$0xff]   ;;  %v8194_v40 = vld [vmem:[%s9727_s6 + $0x154] ss:$24 sps:$4 sm:$0xff]  }
 0x6ba   : > { %v8190_v57 = vld [vmem:[%s9727_s6 + $0x724] ss:$24 sps:$4 sm:$0xff]   ;;  %v8193_v34 = vld [vmem:[%s9727_s6 + $0x720] ss:$24 sps:$4 sm:$0xff]   ;;  %v8196_v43 = vld [vmem:[%s9727_s6 + $0x754] ss:$24 sps:$4 sm:$0xff]  }
 0x6bb   : > { %6202 = vmatpush1.bf16.msra.mxu1 %v8168_v8  ;;  %v8198_v24 = vld [vmem:[%s9727_s6 + $0x150] ss:$24 sps:$4 sm:$0xff]   ;;  %v8200_v45 = vld [vmem:[%s9727_s6 + $0x184] ss:$24 sps:$4 sm:$0xff]   ;;  %v8204_v25 = vld [vmem:[%s9727_s6 + $0x180] ss:$24 sps:$4 sm:$0xff]  }
 0x6bc   : > { %6284 = vmatpush1.bf16.msra.mxu0 %v8169_v13  ;;  %6203 = vmatprep.subr.bf16.mxu1 %v8170_v14  ;;  %v8199_v44 = vld [vmem:[%s9727_s6 + $0x750] ss:$24 sps:$4 sm:$0xff]   ;;  %v8202_v49 = vld [vmem:[%s9727_s6 + $0x784] ss:$24 sps:$4 sm:$0xff]   ;;  %v8205_v53 = vld [vmem:[%s9727_s6 + $0x780] ss:$24 sps:$4 sm:$0xff]  }
 0x6bd   : > { %6285 = vmatprep.subr.bf16.mxu0 %v8172_v15  ;;  %v8206_v59 = vld [vmem:[%s9727_s6 + $0x1b4] ss:$24 sps:$4 sm:$0xff]   ;;  %v8210_v52 = vld [vmem:[%s9727_s6 + $0x1b0] ss:$24 sps:$4 sm:$0xff]   ;;  %v8212_v58 = vld [vmem:[%s9727_s6 + $0x1e4] ss:$24 sps:$4 sm:$0xff]  }
 0x6be   : > { %v8208_v56 = vld [vmem:[%s9727_s6 + $0x7b4] ss:$24 sps:$4 sm:$0xff]   ;;  %v8211_v55 = vld [vmem:[%s9727_s6 + $0x7b0] ss:$24 sps:$4 sm:$0xff]   ;;  %v8214_v60 = vld [vmem:[%s9727_s6 + $0x7e4] ss:$24 sps:$4 sm:$0xff]  }
 0x6bf   : > { %6204 = vmatpush1.bf16.msra.mxu1 %v8174_v16  ;;  %v8216_v38 = vld [vmem:[%s9727_s6 + $0x1e0] ss:$24 sps:$4 sm:$0xff]   ;;  %v8218_v61 = vld [vmem:[%s9727_s6 + $0x214] ss:$24 sps:$4 sm:$0xff]   ;;  %v8222_v37 = vld [vmem:[%s9727_s6 + $0x210] ss:$24 sps:$4 sm:$0xff]  }
 0x6c0   : > { %6286 = vmatpush1.bf16.msra.mxu0 %v8175_v17  ;;  %6205 = vmatprep.subr.bf16.mxu1 %v8176_v18  ;;  %v8217_v19 = vld [vmem:[%s9727_s6 + $0x7e0] ss:$24 sps:$4 sm:$0xff]   ;;  %v8220_v62 = vld [vmem:[%s9727_s6 + $0x814] ss:$24 sps:$4 sm:$0xff]   ;;  %v8223_v42 = vld [vmem:[%s9727_s6 + $0x810] ss:$24 sps:$4 sm:$0xff]  }
 0x6c1   : > { %6287 = vmatprep.subr.bf16.mxu0 %v8178_v21  ;;  %v3829_v63 = vld [vmem:[#allocation2] sm:$0xff]  ;;  %v3831_v1 = vld [vmem:[#allocation2 + $0x10] sm:$0xff] }
 0x6c2   : > { %v9925_v36 = vcombine.high %v3829_v63, %v3829_v63  ;;  %v8224_v2 = vld [vmem:[%s9727_s6 + $0x244] ss:$24 sps:$4 sm:$0xff]   ;;  %v9930_v39 = vcombine.high %v3831_v1, %v3831_v1  ;;  %v8228_v20 = vld [vmem:[%s9727_s6 + $0x240] ss:$24 sps:$4 sm:$0xff]   ;;  %v8230_v54 = vld [vmem:[%s9727_s6 + $0x274] ss:$24 sps:$4 sm:$0xff]   ;;  %v9950_v22 = vcombine.low %v3829_v63, %v3829_v63  ;;  %v9952_v48 = vcombine.low %v3831_v1, %v3831_v1 }
 0x6c3   : > { %6206 = vmatpush1.bf16.msra.mxu1 %v8180_v27  ;;  %v8226_v3 = vld [vmem:[%s9727_s6 + $0x844] ss:$24 sps:$4 sm:$0xff]   ;;  %v8229_v4 = vld [vmem:[%s9727_s6 + $0x840] ss:$24 sps:$4 sm:$0xff]   ;;  %v8232_v50 = vld [vmem:[%s9727_s6 + $0x874] ss:$24 sps:$4 sm:$0xff]  }
 0x6c4   : > { %6288 = vmatpush1.bf16.msra.mxu0 %v8181_v28  ;;  %6207 = vmatprep.subr.bf16.mxu1 %v8182_v29  ;;  %v8234_v41 = vld [vmem:[%s9727_s6 + $0x270] ss:$24 sps:$4 sm:$0xff]   ;;  %v8236_v51 = vld [vmem:[%s9727_s6 + $0x2a4] ss:$24 sps:$4 sm:$0xff]   ;;  %v8240_v6 = vld [vmem:[%s9727_s6 + $0x2a0] ss:$24 sps:$4 sm:$0xff]  }
 0x6c5   : > { %6289 = vmatprep.subr.bf16.mxu0 %v8184_v30  ;;  %6229 = vmatprep.mubr.bf16.mxu1 %v9925_v36  ;;  %v8235_v46 = vld [vmem:[%s9727_s6 + $0x870] ss:$24 sps:$4 sm:$0xff]   ;;  %v8238_v0 = vld [vmem:[%s9727_s6 + $0x8a4] ss:$24 sps:$4 sm:$0xff]   ;;  %v8241_v26 = vld [vmem:[%s9727_s6 + $0x8a0] ss:$24 sps:$4 sm:$0xff]  }
 0x6c6   : > { %6311 = vmatprep.mubr.bf16.mxu0 %v9930_v39  ;;  %v8242_v5 = vld [vmem:[%s9727_s6 + $0x2d4] ss:$24 sps:$4 sm:$0xff]   ;;  %v8246_v9 = vld [vmem:[%s9727_s6 + $0x2d0] ss:$24 sps:$4 sm:$0xff]   ;;  %v8251_v47 = vld [vmem:[%s9727_s6 + $0x304] ss:$24 sps:$4 sm:$0xff]  }
 0x6c7   : > { %6208 = vmatpush1.bf16.msra.mxu1 %v8186_v31  ;;  %v8244_v7 = vld [vmem:[%s9727_s6 + $0x8d4] ss:$24 sps:$4 sm:$0xff]   ;;  %v8247_v10 = vld [vmem:[%s9727_s6 + $0x8d0] ss:$24 sps:$4 sm:$0xff]   ;;  %v8255_v11 = vld [vmem:[%s9727_s6 + $0x904] ss:$24 sps:$4 sm:$0xff]  }
 0x6c8   : > { %6290 = vmatpush1.bf16.msra.mxu0 %v8187_v32  ;;  %6209 = vmatprep.subr.bf16.mxu1 %v8188_v33  ;;  %v8249_v35 = vld [vmem:[%s9727_s6 + $0x300] ss:$24 sps:$4 sm:$0xff]   ;;  %v8260_v8 = vld [vmem:[%s9727_s6 + $0x334] ss:$24 sps:$4 sm:$0xff]   ;;  %v8258_v14 = vld [vmem:[%s9727_s6 + $0x330] ss:$24 sps:$4 sm:$0xff]  }
 0x6c9   : > { %6291 = vmatprep.subr.bf16.mxu0 %v8190_v57  ;;  %v8253_v12 = vld [vmem:[%s9727_s6 + $0x900] ss:$24 sps:$4 sm:$0xff]   ;;  %v8263_v13 = vld [vmem:[%s9727_s6 + $0x934] ss:$24 sps:$4 sm:$0xff]   ;;  %v8261_v15 = vld [vmem:[%s9727_s6 + $0x930] ss:$24 sps:$4 sm:$0xff]  }
 0x6ca   : > { %v8266_v16 = vld [vmem:[%s9727_s6 + $0x364] ss:$24 sps:$4 sm:$0xff]   ;;  %v8264_v18 = vld [vmem:[%s9727_s6 + $0x360] ss:$24 sps:$4 sm:$0xff]   ;;  %v8272_v27 = vld [vmem:[%s9727_s6 + $0x394] ss:$24 sps:$4 sm:$0xff]  }
 0x6cb   : > { %6210 = vmatpush1.bf16.msra.mxu1 %v8192_v23  ;;  %v8269_v17 = vld [vmem:[%s9727_s6 + $0x964] ss:$24 sps:$4 sm:$0xff]   ;;  %v8267_v21 = vld [vmem:[%s9727_s6 + $0x960] ss:$24 sps:$4 sm:$0xff]   ;;  %v8275_v28 = vld [vmem:[%s9727_s6 + $0x994] ss:$24 sps:$4 sm:$0xff]  }
 0x6cc   : > { %6292 = vmatpush1.bf16.msra.mxu0 %v8193_v34  ;;  %6211 = vmatprep.subr.bf16.mxu1 %v8194_v40  ;;  %v8270_v29 = vld [vmem:[%s9727_s6 + $0x390] ss:$24 sps:$4 sm:$0xff]   ;;  %v8278_v31 = vld [vmem:[%s9727_s6 + $0x3c4] ss:$24 sps:$4 sm:$0xff]   ;;  %v8276_v33 = vld [vmem:[%s9727_s6 + $0x3c0] ss:$24 sps:$4 sm:$0xff]  }
 0x6cd   : > { %6293 = vmatprep.subr.bf16.mxu0 %v8196_v43  ;;  %v8273_v30 = vld [vmem:[%s9727_s6 + $0x990] ss:$24 sps:$4 sm:$0xff]   ;;  %v8281_v32 = vld [vmem:[%s9727_s6 + $0x9c4] ss:$24 sps:$4 sm:$0xff]   ;;  %v8279_v57 = vld [vmem:[%s9727_s6 + $0x9c0] ss:$24 sps:$4 sm:$0xff]  }
 0x6ce   : > { %v8284_v23 = vld [vmem:[%s9727_s6 + $0x3f4] ss:$24 sps:$4 sm:$0xff]   ;;  %v8282_v40 = vld [vmem:[%s9727_s6 + $0x3f0] ss:$24 sps:$4 sm:$0xff]  }
 0x6cf   : > { %6212 = vmatpush1.bf16.msra.mxu1 %v8198_v24  ;;  %v8287_v34 = vld [vmem:[%s9727_s6 + $0x9f4] ss:$24 sps:$4 sm:$0xff]   ;;  %v8285_v43 = vld [vmem:[%s9727_s6 + $0x9f0] ss:$24 sps:$4 sm:$0xff]   ;;  %v8290_v24 = vld [vmem:[%s9727_s6 + $0x424] ss:$24 sps:$4 sm:$0xff]  }
 0x6d0   : > { %6294 = vmatpush1.bf16.msra.mxu0 %v8199_v44  ;;  %6213 = vmatprep.subr.bf16.mxu1 %v8200_v45  ;;  %v8293_v44 = vld [vmem:[%s9727_s6 + $0xa24] ss:$24 sps:$4 sm:$0xff]   ;;  %v9980_v45 = vld [vmem:[#allocation2 + $0x8] sm:$0xff] }
 0x6d1   : > { %6295 = vmatprep.subr.bf16.mxu0 %v8202_v49  ;;  %v9982_v49 = vld [vmem:[#allocation2 + $0x18] sm:$0xff]  ;;  %v8308_v63 = vld [vmem:[%s9727_s6 + $0x4b4] ss:$24 sps:$4 sm:$0xff]   ;;  %v8309_v1 = vld [vmem:[%s9727_s6 + $0xab0] ss:$24 sps:$4 sm:$0xff]  }
 0x6d3   : > { %6214 = vmatpush1.bf16.msra.mxu1 %v8204_v25  ;;  %v8288_v25 = vld [vmem:[%s9727_s6 + $0x420] ss:$24 sps:$4 sm:$0xff]  }
 0x6d4   : > { %6296 = vmatpush1.bf16.msra.mxu0 %v8205_v53  ;;  %6215 = vmatprep.subr.bf16.mxu1 %v8206_v59  ;;  %v8291_v53 = vld [vmem:[%s9727_s6 + $0xa20] ss:$24 sps:$4 sm:$0xff]   ;;  %v9988_v59 = vcombine.high %v9980_v45, %v9980_v45 }
 0x6d5   : > { %6297 = vmatprep.subr.bf16.mxu0 %v8208_v56  ;;  %v9992_v56 = vcombine.high %v9982_v49, %v9982_v49 }
 0x6d7   : > { %6216 = vmatpush1.bf16.msra.mxu1 %v8210_v52  ;;  %v8296_v52 = vld [vmem:[%s9727_s6 + $0x454] ss:$24 sps:$4 sm:$0xff]  }
 0x6d8   : > { %6298 = vmatpush1.bf16.msra.mxu0 %v8211_v55  ;;  %6217 = vmatprep.subr.bf16.mxu1 %v8212_v58  ;;  %v8299_v55 = vld [vmem:[%s9727_s6 + $0xa54] ss:$24 sps:$4 sm:$0xff]   ;;  %v8294_v58 = vld [vmem:[%s9727_s6 + $0x450] ss:$24 sps:$4 sm:$0xff]  }
 0x6d9   : > { %6299 = vmatprep.subr.bf16.mxu0 %v8214_v60  ;;  %v8297_v60 = vld [vmem:[%s9727_s6 + $0xa50] ss:$24 sps:$4 sm:$0xff]  }
 0x6db   : > { %6218 = vmatpush1.bf16.msra.mxu1 %v8216_v38  ;;  %v8302_v38 = vld [vmem:[%s9727_s6 + $0x484] ss:$24 sps:$4 sm:$0xff]  }
 0x6dc   : > { %6300 = vmatpush1.bf16.msra.mxu0 %v8217_v19  ;;  %6219 = vmatprep.subr.bf16.mxu1 %v8218_v61  ;;  %v8305_v19 = vld [vmem:[%s9727_s6 + $0xa84] ss:$24 sps:$4 sm:$0xff]   ;;  %v8300_v61 = vld [vmem:[%s9727_s6 + $0x480] ss:$24 sps:$4 sm:$0xff]  }
 0x6dd   : > { %6301 = vmatprep.subr.bf16.mxu0 %v8220_v62  ;;  %v8303_v62 = vld [vmem:[%s9727_s6 + $0xa80] ss:$24 sps:$4 sm:$0xff]  }
 0x6df   : > { %6220 = vmatpush1.bf16.msra.mxu1 %v8222_v37  ;;  %v8311_v37 = vld [vmem:[%s9727_s6 + $0xab4] ss:$24 sps:$4 sm:$0xff]  }
 0x6e0   : > { %6302 = vmatpush1.bf16.msra.mxu0 %v8223_v42  ;;  %6221 = vmatprep.subr.bf16.mxu1 %v8224_v2  ;;  %v8306_v42 = vld [vmem:[%s9727_s6 + $0x4b0] ss:$24 sps:$4 sm:$0xff]   ;;  %v8314_v2 = vld [vmem:[%s9727_s6 + $0x4e4] ss:$24 sps:$4 sm:$0xff]  }
 0x6e1   : > { %6303 = vmatprep.subr.bf16.mxu0 %v8226_v3  ;;  %v8317_v3 = vld [vmem:[%s9727_s6 + $0xae4] ss:$24 sps:$4 sm:$0xff]  }
 0x6e3   : > { %6222 = vmatpush1.bf16.msra.mxu1 %v8228_v20  ;;  %v8312_v20 = vld [vmem:[%s9727_s6 + $0x4e0] ss:$24 sps:$4 sm:$0xff]  }
 0x6e4   : > { %6304 = vmatpush1.bf16.msra.mxu0 %v8229_v4  ;;  %6223 = vmatprep.subr.bf16.mxu1 %v8230_v54  ;;  %v8315_v4 = vld [vmem:[%s9727_s6 + $0xae0] ss:$24 sps:$4 sm:$0xff]   ;;  %v8320_v54 = vld [vmem:[%s9727_s6 + $0x514] ss:$24 sps:$4 sm:$0xff]  }
 0x6e5   : > { %6305 = vmatprep.subr.bf16.mxu0 %v8232_v50  ;;  %v8323_v50 = vld [vmem:[%s9727_s6 + $0xb14] ss:$24 sps:$4 sm:$0xff]  }
 0x6e7   : > { %6224 = vmatpush1.bf16.msra.mxu1 %v8234_v41  ;;  %v8318_v41 = vld [vmem:[%s9727_s6 + $0x510] ss:$24 sps:$4 sm:$0xff]  }
 0x6e8   : > { %6306 = vmatpush1.bf16.msra.mxu0 %v8235_v46  ;;  %6225 = vmatprep.subr.bf16.mxu1 %v8236_v51  ;;  %v8321_v46 = vld [vmem:[%s9727_s6 + $0xb10] ss:$24 sps:$4 sm:$0xff]   ;;  %v8326_v51 = vld [vmem:[%s9727_s6 + $0x544] ss:$24 sps:$4 sm:$0xff]  }
 0x6e9   : > { %6307 = vmatprep.subr.bf16.mxu0 %v8238_v0  ;;  %v8329_v0 = vld [vmem:[%s9727_s6 + $0xb44] ss:$24 sps:$4 sm:$0xff]  }
 0x6eb   : > { %6226 = vmatpush1.bf16.msra.mxu1 %v8240_v6  ;;  %v8324_v6 = vld [vmem:[%s9727_s6 + $0x540] ss:$24 sps:$4 sm:$0xff]  }
 0x6ec   : > { %6308 = vmatpush1.bf16.msra.mxu0 %v8241_v26  ;;  %6227 = vmatprep.subr.bf16.mxu1 %v8242_v5  ;;  %v8327_v26 = vld [vmem:[%s9727_s6 + $0xb40] ss:$24 sps:$4 sm:$0xff]   ;;  %v8332_v5 = vld [vmem:[%s9727_s6 + $0x574] ss:$24 sps:$4 sm:$0xff]  }
 0x6ed   : > { %6309 = vmatprep.subr.bf16.mxu0 %v8244_v7  ;;  %v8335_v7 = vld [vmem:[%s9727_s6 + $0xb74] ss:$24 sps:$4 sm:$0xff]  }
 0x6ef   : > { %6228 = vmatpush1.bf16.msra.mxu1 %v8246_v9  ;;  %v8330_v9 = vld [vmem:[%s9727_s6 + $0x570] ss:$24 sps:$4 sm:$0xff]  }
 0x6f0   : > { %6310 = vmatpush1.bf16.msra.mxu0 %v8247_v10  ;;  %6238 = vmatprep.subr.bf16.mxu1 %v8251_v47  ;;  %v8333_v10 = vld [vmem:[%s9727_s6 + $0xb70] ss:$24 sps:$4 sm:$0xff]   ;;  %v8338_v47 = vld [vmem:[%s9727_s6 + $0x5a4] ss:$24 sps:$4 sm:$0xff]  }
 0x6f1   : > { %6320 = vmatprep.subr.bf16.mxu0 %v8255_v11  ;;  %v8341_v11 = vld [vmem:[%s9727_s6 + $0xba4] ss:$24 sps:$4 sm:$0xff]  }
 0x6f2   : > { %6230 = vmatmul.mubr.bf16.vlgmr.msra.gmra.mrb[0].mxu1 %v9950_v22 }
 0x6f3   : > { %6312 = vmatmul.mubr.bf16.vlgmr.msra.gmra.mrb[0].mxu0 %v9952_v48  ;;  %6239 = vmatpush1.bf16.msra.mxu1 %v8249_v35  ;;  %v8336_v35 = vld [vmem:[%s9727_s6 + $0x5a0] ss:$24 sps:$4 sm:$0xff]  }
 0x6f4   : > { %6321 = vmatpush1.bf16.msra.mxu0 %v8253_v12  ;;  %6240 = vmatprep.subr.bf16.mxu1 %v8260_v8  ;;  %v8339_v12 = vld [vmem:[%s9727_s6 + $0xba0] ss:$24 sps:$4 sm:$0xff]   ;;  %v8344_v8 = vld [vmem:[%s9727_s6 + $0x5d4] ss:$24 sps:$4 sm:$0xff]  }
 0x6f5   : > { %6322 = vmatprep.subr.bf16.mxu0 %v8263_v13  ;;  %6270 = vmatprep.mubr.bf16.mxu1 %v9988_v59  ;;  %v8347_v13 = vld [vmem:[%s9727_s6 + $0xbd4] ss:$24 sps:$4 sm:$0xff]  }
 0x6f6   : > { %6352 = vmatprep.mubr.bf16.mxu0 %v9992_v56 }
 0x6f7   : > { %6241 = vmatpush1.bf16.msra.mxu1 %v8258_v14  ;;  %v8342_v14 = vld [vmem:[%s9727_s6 + $0x5d0] ss:$24 sps:$4 sm:$0xff]  }
 0x6f8   : > { %6323 = vmatpush1.bf16.msra.mxu0 %v8261_v15  ;;  %6242 = vmatprep.subr.bf16.mxu1 %v8266_v16  ;;  %v8345_v15 = vld [vmem:[%s9727_s6 + $0xbd0] ss:$24 sps:$4 sm:$0xff]   ;;  %v8354_v16 = vld [vmem:[%s9727_s6 + $0xc] ss:$24 sps:$4 sm:$0xff]  }
 0x6f9   : > { %6324 = vmatprep.subr.bf16.mxu0 %v8269_v17  ;;  %v8357_v17 = vld [vmem:[%s9727_s6 + $0x14] ss:$24 sps:$4 sm:$0xff]  }
 0x6fb   : > { %6243 = vmatpush1.bf16.msra.mxu1 %v8264_v18  ;;  %v10036_v18 = vcombine.low %v9980_v45, %v9980_v45  ;;  %v8381_v45 = vld [vmem:[%s9727_s6 + $0xd4] ss:$24 sps:$4 sm:$0xff]  }
 0x6fc   : > { %6325 = vmatpush1.bf16.msra.mxu0 %v8267_v21  ;;  %6244 = vmatprep.subr.bf16.mxu1 %v8272_v27  ;;  %v10040_v21 = vcombine.low %v9982_v49, %v9982_v49  ;;  %v8352_v27 = vld [vmem:[%s9727_s6 + $0x8] ss:$24 sps:$4 sm:$0xff]  }
 0x6fd   : > { %6326 = vmatprep.subr.bf16.mxu0 %v8275_v28  ;;  %v8355_v28 = vld [vmem:[%s9727_s6 + $0x10] ss:$24 sps:$4 sm:$0xff]  }
 0x6fe   : > { %v8376_v49 = vld [vmem:[%s9727_s6 + $0xc8] ss:$24 sps:$4 sm:$0xff]  }
 0x6ff   : > { %6245 = vmatpush1.bf16.msra.mxu1 %v8270_v29  ;;  %v8360_v29 = vld [vmem:[%s9727_s6 + $0x3c] ss:$24 sps:$4 sm:$0xff]  }
 0x700   : > { %6327 = vmatpush1.bf16.msra.mxu0 %v8273_v30  ;;  %6246 = vmatprep.subr.bf16.mxu1 %v8278_v31  ;;  %v8363_v30 = vld [vmem:[%s9727_s6 + $0x44] ss:$24 sps:$4 sm:$0xff]   ;;  %v8358_v31 = vld [vmem:[%s9727_s6 + $0x38] ss:$24 sps:$4 sm:$0xff]  }
 0x701   : > { %6328 = vmatprep.subr.bf16.mxu0 %v8281_v32  ;;  %v8361_v32 = vld [vmem:[%s9727_s6 + $0x40] ss:$24 sps:$4 sm:$0xff]  }
 0x703   : > { %6247 = vmatpush1.bf16.msra.mxu1 %v8276_v33  ;;  %v8366_v33 = vld [vmem:[%s9727_s6 + $0x6c] ss:$24 sps:$4 sm:$0xff]  }
 0x704   : > { %6329 = vmatpush1.bf16.msra.mxu0 %v8279_v57  ;;  %6248 = vmatprep.subr.bf16.mxu1 %v8284_v23  ;;  %v8369_v57 = vld [vmem:[%s9727_s6 + $0x74] ss:$24 sps:$4 sm:$0xff]   ;;  %v8364_v23 = vld [vmem:[%s9727_s6 + $0x68] ss:$24 sps:$4 sm:$0xff]  }
 0x705   : > { %6330 = vmatprep.subr.bf16.mxu0 %v8287_v34  ;;  %v8367_v34 = vld [vmem:[%s9727_s6 + $0x70] ss:$24 sps:$4 sm:$0xff]  }
 0x707   : > { %6249 = vmatpush1.bf16.msra.mxu1 %v8282_v40  ;;  %v8372_v40 = vld [vmem:[%s9727_s6 + $0x9c] ss:$24 sps:$4 sm:$0xff]  }
 0x708   : > { %6331 = vmatpush1.bf16.msra.mxu0 %v8285_v43  ;;  %6250 = vmatprep.subr.bf16.mxu1 %v8290_v24  ;;  %v8375_v43 = vld [vmem:[%s9727_s6 + $0xa4] ss:$24 sps:$4 sm:$0xff]   ;;  %v8370_v24 = vld [vmem:[%s9727_s6 + $0x98] ss:$24 sps:$4 sm:$0xff]  }
 0x709   : > { %6332 = vmatprep.subr.bf16.mxu0 %v8293_v44  ;;  %v8373_v44 = vld [vmem:[%s9727_s6 + $0xa0] ss:$24 sps:$4 sm:$0xff]  }
 0x70b   : > { %6251 = vmatpush1.bf16.msra.mxu1 %v8288_v25  ;;  %v8379_v25 = vld [vmem:[%s9727_s6 + $0xd0] ss:$24 sps:$4 sm:$0xff]  }
 0x70c   : > { %6333 = vmatpush1.bf16.msra.mxu0 %v8291_v53  ;;  %6252 = vmatprep.subr.bf16.mxu1 %v8296_v52  ;;  %v8384_v53 = vld [vmem:[%s9727_s6 + $0xfc] ss:$24 sps:$4 sm:$0xff]  }
 0x70d   : > { %6334 = vmatprep.subr.bf16.mxu0 %v8299_v55  ;;  %v8387_v52 = vld [vmem:[%s9727_s6 + $0x104] ss:$24 sps:$4 sm:$0xff]   ;;  %v8382_v55 = vld [vmem:[%s9727_s6 + $0xf8] ss:$24 sps:$4 sm:$0xff]  }
 0x70f   : > { %6253 = vmatpush1.bf16.msra.mxu1 %v8294_v58  ;;  %v8385_v58 = vld [vmem:[%s9727_s6 + $0x100] ss:$24 sps:$4 sm:$0xff]  }
 0x710   : > { %6335 = vmatpush1.bf16.msra.mxu0 %v8297_v60  ;;  %6254 = vmatprep.subr.bf16.mxu1 %v8302_v38  ;;  %v8390_v60 = vld [vmem:[%s9727_s6 + $0x12c] ss:$24 sps:$4 sm:$0xff]  }
 0x711   : > { %6336 = vmatprep.subr.bf16.mxu0 %v8305_v19  ;;  %v8393_v38 = vld [vmem:[%s9727_s6 + $0x134] ss:$24 sps:$4 sm:$0xff]   ;;  %v8388_v19 = vld [vmem:[%s9727_s6 + $0x128] ss:$24 sps:$4 sm:$0xff]  }
 0x713   : > { %6255 = vmatpush1.bf16.msra.mxu1 %v8300_v61  ;;  %v8391_v61 = vld [vmem:[%s9727_s6 + $0x130] ss:$24 sps:$4 sm:$0xff]  }
 0x714   : > { %6337 = vmatpush1.bf16.msra.mxu0 %v8303_v62  ;;  %6256 = vmatprep.subr.bf16.mxu1 %v8308_v63  ;;  %v8396_v62 = vld [vmem:[%s9727_s6 + $0x15c] ss:$24 sps:$4 sm:$0xff]  }
 0x715   : > { %6338 = vmatprep.subr.bf16.mxu0 %v8311_v37  ;;  %v8399_v63 = vld [vmem:[%s9727_s6 + $0x164] ss:$24 sps:$4 sm:$0xff]   ;;  %v8394_v37 = vld [vmem:[%s9727_s6 + $0x158] ss:$24 sps:$4 sm:$0xff]  }
 0x717   : > { %6257 = vmatpush1.bf16.msra.mxu1 %v8306_v42  ;;  %v8397_v42 = vld [vmem:[%s9727_s6 + $0x160] ss:$24 sps:$4 sm:$0xff]  }
 0x718   : > { %6339 = vmatpush1.bf16.msra.mxu0 %v8309_v1  ;;  %6258 = vmatprep.subr.bf16.mxu1 %v8314_v2  ;;  %v8402_v1 = vld [vmem:[%s9727_s6 + $0x18c] ss:$24 sps:$4 sm:$0xff]  }
 0x719   : > { %6340 = vmatprep.subr.bf16.mxu0 %v8317_v3  ;;  %v8405_v2 = vld [vmem:[%s9727_s6 + $0x194] ss:$24 sps:$4 sm:$0xff]   ;;  %v8400_v3 = vld [vmem:[%s9727_s6 + $0x188] ss:$24 sps:$4 sm:$0xff]  }
 0x71b   : > { %6259 = vmatpush1.bf16.msra.mxu1 %v8312_v20  ;;  %v8403_v20 = vld [vmem:[%s9727_s6 + $0x190] ss:$24 sps:$4 sm:$0xff]  }
 0x71c   : > { %6341 = vmatpush1.bf16.msra.mxu0 %v8315_v4  ;;  %6260 = vmatprep.subr.bf16.mxu1 %v8320_v54  ;;  %v8408_v4 = vld [vmem:[%s9727_s6 + $0x1bc] ss:$24 sps:$4 sm:$0xff]  }
 0x71d   : > { %6342 = vmatprep.subr.bf16.mxu0 %v8323_v50  ;;  %v8411_v54 = vld [vmem:[%s9727_s6 + $0x1c4] ss:$24 sps:$4 sm:$0xff]   ;;  %v8406_v50 = vld [vmem:[%s9727_s6 + $0x1b8] ss:$24 sps:$4 sm:$0xff]  }
 0x71f   : > { %6261 = vmatpush1.bf16.msra.mxu1 %v8318_v41  ;;  %v8409_v41 = vld [vmem:[%s9727_s6 + $0x1c0] ss:$24 sps:$4 sm:$0xff]  }
 0x720   : > { %6343 = vmatpush1.bf16.msra.mxu0 %v8321_v46  ;;  %6262 = vmatprep.subr.bf16.mxu1 %v8326_v51  ;;  %v8414_v46 = vld [vmem:[%s9727_s6 + $0x1ec] ss:$24 sps:$4 sm:$0xff]  }
 0x721   : > { %6344 = vmatprep.subr.bf16.mxu0 %v8329_v0  ;;  %v8417_v51 = vld [vmem:[%s9727_s6 + $0x1f4] ss:$24 sps:$4 sm:$0xff]   ;;  %v8412_v0 = vld [vmem:[%s9727_s6 + $0x1e8] ss:$24 sps:$4 sm:$0xff]  }
 0x723   : > { %6263 = vmatpush1.bf16.msra.mxu1 %v8324_v6  ;;  %v8415_v6 = vld [vmem:[%s9727_s6 + $0x1f0] ss:$24 sps:$4 sm:$0xff]  }
 0x724   : > { %6345 = vmatpush1.bf16.msra.mxu0 %v8327_v26  ;;  %6264 = vmatprep.subr.bf16.mxu1 %v8332_v5  ;;  %v8420_v26 = vld [vmem:[%s9727_s6 + $0x21c] ss:$24 sps:$4 sm:$0xff]  }
 0x725   : > { %6346 = vmatprep.subr.bf16.mxu0 %v8335_v7  ;;  %v8423_v5 = vld [vmem:[%s9727_s6 + $0x224] ss:$24 sps:$4 sm:$0xff]   ;;  %v8418_v7 = vld [vmem:[%s9727_s6 + $0x218] ss:$24 sps:$4 sm:$0xff]  }
 0x727   : > { %6265 = vmatpush1.bf16.msra.mxu1 %v8330_v9  ;;  %v8421_v9 = vld [vmem:[%s9727_s6 + $0x220] ss:$24 sps:$4 sm:$0xff]  }
 0x728   : > { %6347 = vmatpush1.bf16.msra.mxu0 %v8333_v10  ;;  %6266 = vmatprep.subr.bf16.mxu1 %v8338_v47  ;;  %v8426_v10 = vld [vmem:[%s9727_s6 + $0x24c] ss:$24 sps:$4 sm:$0xff]  }
 0x729   : > { %6348 = vmatprep.subr.bf16.mxu0 %v8341_v11  ;;  %v8429_v47 = vld [vmem:[%s9727_s6 + $0x254] ss:$24 sps:$4 sm:$0xff]   ;;  %v8424_v11 = vld [vmem:[%s9727_s6 + $0x248] ss:$24 sps:$4 sm:$0xff]  }
 0x72b   : > { %6267 = vmatpush1.bf16.msra.mxu1 %v8336_v35  ;;  %v8427_v35 = vld [vmem:[%s9727_s6 + $0x250] ss:$24 sps:$4 sm:$0xff]  }
 0x72c   : > { %6349 = vmatpush1.bf16.msra.mxu0 %v8339_v12  ;;  %6268 = vmatprep.subr.bf16.mxu1 %v8344_v8  ;;  %v8432_v12 = vld [vmem:[%s9727_s6 + $0x27c] ss:$24 sps:$4 sm:$0xff]  }
 0x72d   : > { %6350 = vmatprep.subr.bf16.mxu0 %v8347_v13  ;;  %v8435_v8 = vld [vmem:[%s9727_s6 + $0x284] ss:$24 sps:$4 sm:$0xff]   ;;  %v8430_v13 = vld [vmem:[%s9727_s6 + $0x278] ss:$24 sps:$4 sm:$0xff]  }
 0x72f   : > { %6269 = vmatpush1.bf16.msra.mxu1 %v8342_v14  ;;  %v8433_v14 = vld [vmem:[%s9727_s6 + $0x280] ss:$24 sps:$4 sm:$0xff]  }
 0x730   : > { %6351 = vmatpush1.bf16.msra.mxu0 %v8345_v15  ;;  %6361 = vmatprep.subr.bf16.mxu1 %v8354_v16  ;;  %v8438_v15 = vld [vmem:[%s9727_s6 + $0x2ac] ss:$24 sps:$4 sm:$0xff]  }
 0x731   : > { %6525 = vmatprep.subr.bf16.mxu0 %v8357_v17  ;;  %v8441_v16 = vld [vmem:[%s9727_s6 + $0x2b4] ss:$24 sps:$4 sm:$0xff]   ;;  %v8436_v17 = vld [vmem:[%s9727_s6 + $0x2a8] ss:$24 sps:$4 sm:$0xff]  }
 0x732   : > { %6271 = vmatmul.mubr.bf16.vlgmr.msra.gmra.mrb[0].mxu1 %v10036_v18 }
 0x733   : > { %6353 = vmatmul.mubr.bf16.vlgmr.msra.gmra.mrb[0].mxu0 %v10040_v21  ;;  %6362 = vmatpush1.bf16.msra.mxu1 %v8352_v27  ;;  %v8439_v27 = vld [vmem:[%s9727_s6 + $0x2b0] ss:$24 sps:$4 sm:$0xff]  }
 0x734   : > { %6526 = vmatpush1.bf16.msra.mxu0 %v8355_v28  ;;  %6363 = vmatprep.subr.bf16.mxu1 %v8360_v29  ;;  %v8444_v28 = vld [vmem:[%s9727_s6 + $0x2dc] ss:$24 sps:$4 sm:$0xff]  }
 0x735   : > { %6527 = vmatprep.subr.bf16.mxu0 %v8363_v30  ;;  %6393 = vmatprep.mubr.bf16.mxu1 %v9925_v36  ;;  %v8447_v29 = vld [vmem:[%s9727_s6 + $0x2e4] ss:$24 sps:$4 sm:$0xff]   ;;  %v8442_v30 = vld [vmem:[%s9727_s6 + $0x2d8] ss:$24 sps:$4 sm:$0xff]  }
 0x736   : > { %6557 = vmatprep.mubr.bf16.mxu0 %v9925_v36  ;;  %v8378_v36 = vld [vmem:[%s9727_s6 + $0xcc] ss:$24 sps:$4 sm:$0xff]  }
 0x737   : > { %6364 = vmatpush1.bf16.msra.mxu1 %v8358_v31  ;;  %v8445_v31 = vld [vmem:[%s9727_s6 + $0x2e0] ss:$24 sps:$4 sm:$0xff]  }
 0x738   : > { %6528 = vmatpush1.bf16.msra.mxu0 %v8361_v32  ;;  %6365 = vmatprep.subr.bf16.mxu1 %v8366_v33  ;;  %v8450_v32 = vld [vmem:[%s9727_s6 + $0x30c] ss:$24 sps:$4 sm:$0xff]  }
 0x739   : > { %6529 = vmatprep.subr.bf16.mxu0 %v8369_v57  ;;  %v8453_v33 = vld [vmem:[%s9727_s6 + $0x314] ss:$24 sps:$4 sm:$0xff]   ;;  %v8448_v57 = vld [vmem:[%s9727_s6 + $0x308] ss:$24 sps:$4 sm:$0xff]  }
 0x73b   : > { %6366 = vmatpush1.bf16.msra.mxu1 %v8364_v23  ;;  %v8451_v23 = vld [vmem:[%s9727_s6 + $0x310] ss:$24 sps:$4 sm:$0xff]  }
 0x73c   : > { %6530 = vmatpush1.bf16.msra.mxu0 %v8367_v34  ;;  %6367 = vmatprep.subr.bf16.mxu1 %v8372_v40  ;;  %v8456_v34 = vld [vmem:[%s9727_s6 + $0x33c] ss:$24 sps:$4 sm:$0xff]  }
 0x73d   : > { %6531 = vmatprep.subr.bf16.mxu0 %v8375_v43  ;;  %v8459_v40 = vld [vmem:[%s9727_s6 + $0x344] ss:$24 sps:$4 sm:$0xff]   ;;  %v8454_v43 = vld [vmem:[%s9727_s6 + $0x338] ss:$24 sps:$4 sm:$0xff]  }
 0x73f   : > { %6368 = vmatpush1.bf16.msra.mxu1 %v8370_v24  ;;  %v8457_v24 = vld [vmem:[%s9727_s6 + $0x340] ss:$24 sps:$4 sm:$0xff]  }
 0x740   : > { %6532 = vmatpush1.bf16.msra.mxu0 %v8373_v44  ;;  %6369 = vmatprep.subr.bf16.mxu1 %v8378_v36  ;;  %v8462_v44 = vld [vmem:[%s9727_s6 + $0x36c] ss:$24 sps:$4 sm:$0xff]  }
 0x741   : > { %6533 = vmatprep.subr.bf16.mxu0 %v8381_v45  ;;  %v8465_v36 = vld [vmem:[%s9727_s6 + $0x374] ss:$24 sps:$4 sm:$0xff]   ;;  %v8460_v45 = vld [vmem:[%s9727_s6 + $0x368] ss:$24 sps:$4 sm:$0xff]  }
 0x743   : > { %6370 = vmatpush1.bf16.msra.mxu1 %v8376_v49  ;;  %v8468_v49 = vld [vmem:[%s9727_s6 + $0x39c] ss:$24 sps:$4 sm:$0xff]  }
 0x744   : > { %6534 = vmatpush1.bf16.msra.mxu0 %v8379_v25  ;;  %6371 = vmatprep.subr.bf16.mxu1 %v8384_v53  ;;  %v8471_v25 = vld [vmem:[%s9727_s6 + $0x3a4] ss:$24 sps:$4 sm:$0xff]   ;;  %v8466_v53 = vld [vmem:[%s9727_s6 + $0x398] ss:$24 sps:$4 sm:$0xff]  }
 0x745   : > { %6535 = vmatprep.subr.bf16.mxu0 %v8387_v52  ;;  %v8469_v52 = vld [vmem:[%s9727_s6 + $0x3a0] ss:$24 sps:$4 sm:$0xff]  }
 0x747   : > { %6372 = vmatpush1.bf16.msra.mxu1 %v8382_v55  ;;  %v8477_v55 = vld [vmem:[%s9727_s6 + $0x3d4] ss:$24 sps:$4 sm:$0xff]  }
 0x748   : > { %6536 = vmatpush1.bf16.msra.mxu0 %v8385_v58  ;;  %6373 = vmatprep.subr.bf16.mxu1 %v8390_v60  ;;  %v8472_v58 = vld [vmem:[%s9727_s6 + $0x3c8] ss:$24 sps:$4 sm:$0xff]  }
 0x749   : > { %6537 = vmatprep.subr.bf16.mxu0 %v8393_v38  ;;  %v8475_v60 = vld [vmem:[%s9727_s6 + $0x3d0] ss:$24 sps:$4 sm:$0xff]   ;;  %v8480_v38 = vld [vmem:[%s9727_s6 + $0x3fc] ss:$24 sps:$4 sm:$0xff]  }
 0x74b   : > { %6374 = vmatpush1.bf16.msra.mxu1 %v8388_v19  ;;  %v8483_v19 = vld [vmem:[%s9727_s6 + $0x404] ss:$24 sps:$4 sm:$0xff]  }
 0x74c   : > { %6538 = vmatpush1.bf16.msra.mxu0 %v8391_v61  ;;  %6375 = vmatprep.subr.bf16.mxu1 %v8396_v62  ;;  %v8478_v61 = vld [vmem:[%s9727_s6 + $0x3f8] ss:$24 sps:$4 sm:$0xff]  }
 0x74d   : > { %6539 = vmatprep.subr.bf16.mxu0 %v8399_v63  ;;  %v8481_v62 = vld [vmem:[%s9727_s6 + $0x400] ss:$24 sps:$4 sm:$0xff]   ;;  %v8486_v63 = vld [vmem:[%s9727_s6 + $0x42c] ss:$24 sps:$4 sm:$0xff]  }
 0x74f   : > { %6376 = vmatpush1.bf16.msra.mxu1 %v8394_v37  ;;  %v8489_v37 = vld [vmem:[%s9727_s6 + $0x434] ss:$24 sps:$4 sm:$0xff]  }
 0x750   : > { %6540 = vmatpush1.bf16.msra.mxu0 %v8397_v42  ;;  %6377 = vmatprep.subr.bf16.mxu1 %v8402_v1  ;;  %v8484_v42 = vld [vmem:[%s9727_s6 + $0x428] ss:$24 sps:$4 sm:$0xff]  }
 0x751   : > { %6541 = vmatprep.subr.bf16.mxu0 %v8405_v2  ;;  %v8487_v1 = vld [vmem:[%s9727_s6 + $0x430] ss:$24 sps:$4 sm:$0xff]   ;;  %v8492_v2 = vld [vmem:[%s9727_s6 + $0x45c] ss:$24 sps:$4 sm:$0xff]  }
 0x753   : > { %6378 = vmatpush1.bf16.msra.mxu1 %v8400_v3  ;;  %v8495_v3 = vld [vmem:[%s9727_s6 + $0x464] ss:$24 sps:$4 sm:$0xff]  }
 0x754   : > { %6542 = vmatpush1.bf16.msra.mxu0 %v8403_v20  ;;  %6379 = vmatprep.subr.bf16.mxu1 %v8408_v4  ;;  %v8490_v20 = vld [vmem:[%s9727_s6 + $0x458] ss:$24 sps:$4 sm:$0xff]  }
 0x755   : > { %6543 = vmatprep.subr.bf16.mxu0 %v8411_v54  ;;  %v8493_v4 = vld [vmem:[%s9727_s6 + $0x460] ss:$24 sps:$4 sm:$0xff]   ;;  %v8498_v54 = vld [vmem:[%s9727_s6 + $0x48c] ss:$24 sps:$4 sm:$0xff]  }
 0x757   : > { %6380 = vmatpush1.bf16.msra.mxu1 %v8406_v50  ;;  %v8501_v50 = vld [vmem:[%s9727_s6 + $0x494] ss:$24 sps:$4 sm:$0xff]  }
 0x758   : > { %6544 = vmatpush1.bf16.msra.mxu0 %v8409_v41  ;;  %6381 = vmatprep.subr.bf16.mxu1 %v8414_v46  ;;  %v8496_v41 = vld [vmem:[%s9727_s6 + $0x488] ss:$24 sps:$4 sm:$0xff]  }
 0x759   : > { %6545 = vmatprep.subr.bf16.mxu0 %v8417_v51  ;;  %v8499_v46 = vld [vmem:[%s9727_s6 + $0x490] ss:$24 sps:$4 sm:$0xff]   ;;  %v8504_v51 = vld [vmem:[%s9727_s6 + $0x4bc] ss:$24 sps:$4 sm:$0xff]  }
 0x75b   : > { %6382 = vmatpush1.bf16.msra.mxu1 %v8412_v0  ;;  %v8507_v0 = vld [vmem:[%s9727_s6 + $0x4c4] ss:$24 sps:$4 sm:$0xff]  }
 0x75c   : > { %6546 = vmatpush1.bf16.msra.mxu0 %v8415_v6  ;;  %6383 = vmatprep.subr.bf16.mxu1 %v8420_v26  ;;  %v8502_v6 = vld [vmem:[%s9727_s6 + $0x4b8] ss:$24 sps:$4 sm:$0xff]  }
 0x75d   : > { %6547 = vmatprep.subr.bf16.mxu0 %v8423_v5  ;;  %v8505_v26 = vld [vmem:[%s9727_s6 + $0x4c0] ss:$24 sps:$4 sm:$0xff]   ;;  %v8510_v5 = vld [vmem:[%s9727_s6 + $0x4ec] ss:$24 sps:$4 sm:$0xff]  }
 0x75f   : > { %6384 = vmatpush1.bf16.msra.mxu1 %v8418_v7  ;;  %v8513_v7 = vld [vmem:[%s9727_s6 + $0x4f4] ss:$24 sps:$4 sm:$0xff]  }
 0x760   : > { %6548 = vmatpush1.bf16.msra.mxu0 %v8421_v9  ;;  %6385 = vmatprep.subr.bf16.mxu1 %v8426_v10  ;;  %v8508_v9 = vld [vmem:[%s9727_s6 + $0x4e8] ss:$24 sps:$4 sm:$0xff]  }
 0x761   : > { %6549 = vmatprep.subr.bf16.mxu0 %v8429_v47  ;;  %v8511_v10 = vld [vmem:[%s9727_s6 + $0x4f0] ss:$24 sps:$4 sm:$0xff]   ;;  %v8516_v47 = vld [vmem:[%s9727_s6 + $0x51c] ss:$24 sps:$4 sm:$0xff]  }
 0x763   : > { %6386 = vmatpush1.bf16.msra.mxu1 %v8424_v11  ;;  %v8519_v11 = vld [vmem:[%s9727_s6 + $0x524] ss:$24 sps:$4 sm:$0xff]  }
 0x764   : > { %6550 = vmatpush1.bf16.msra.mxu0 %v8427_v35  ;;  %6387 = vmatprep.subr.bf16.mxu1 %v8432_v12  ;;  %v8514_v35 = vld [vmem:[%s9727_s6 + $0x518] ss:$24 sps:$4 sm:$0xff]  }
 0x765   : > { %6551 = vmatprep.subr.bf16.mxu0 %v8435_v8  ;;  %v8517_v12 = vld [vmem:[%s9727_s6 + $0x520] ss:$24 sps:$4 sm:$0xff]   ;;  %v8522_v8 = vld [vmem:[%s9727_s6 + $0x54c] ss:$24 sps:$4 sm:$0xff]  }
 0x767   : > { %6388 = vmatpush1.bf16.msra.mxu1 %v8430_v13  ;;  %v8525_v13 = vld [vmem:[%s9727_s6 + $0x554] ss:$24 sps:$4 sm:$0xff]  }
 0x768   : > { %6552 = vmatpush1.bf16.msra.mxu0 %v8433_v14  ;;  %6389 = vmatprep.subr.bf16.mxu1 %v8438_v15  ;;  %v8520_v14 = vld [vmem:[%s9727_s6 + $0x548] ss:$24 sps:$4 sm:$0xff]  }
 0x769   : > { %6553 = vmatprep.subr.bf16.mxu0 %v8441_v16  ;;  %v8523_v15 = vld [vmem:[%s9727_s6 + $0x550] ss:$24 sps:$4 sm:$0xff]   ;;  %v8528_v16 = vld [vmem:[%s9727_s6 + $0x57c] ss:$24 sps:$4 sm:$0xff]  }
 0x76b   : > { %6390 = vmatpush1.bf16.msra.mxu1 %v8436_v17  ;;  %v8531_v17 = vld [vmem:[%s9727_s6 + $0x584] ss:$24 sps:$4 sm:$0xff]  }
 0x76c   : > { %6554 = vmatpush1.bf16.msra.mxu0 %v8439_v27  ;;  %6391 = vmatprep.subr.bf16.mxu1 %v8444_v28  ;;  %v8526_v27 = vld [vmem:[%s9727_s6 + $0x578] ss:$24 sps:$4 sm:$0xff]  }
 0x76d   : > { %6555 = vmatprep.subr.bf16.mxu0 %v8447_v29  ;;  %v8529_v28 = vld [vmem:[%s9727_s6 + $0x580] ss:$24 sps:$4 sm:$0xff]   ;;  %v8534_v29 = vld [vmem:[%s9727_s6 + $0x5ac] ss:$24 sps:$4 sm:$0xff]  }
 0x76f   : > { %6392 = vmatpush1.bf16.msra.mxu1 %v8442_v30  ;;  %v8537_v30 = vld [vmem:[%s9727_s6 + $0x5b4] ss:$24 sps:$4 sm:$0xff]  }
 0x770   : > { %6556 = vmatpush1.bf16.msra.mxu0 %v8445_v31  ;;  %6402 = vmatprep.subr.bf16.mxu1 %v8450_v32  ;;  %v8532_v31 = vld [vmem:[%s9727_s6 + $0x5a8] ss:$24 sps:$4 sm:$0xff]  }
 0x771   : > { %6566 = vmatprep.subr.bf16.mxu0 %v8453_v33  ;;  %v8535_v32 = vld [vmem:[%s9727_s6 + $0x5b0] ss:$24 sps:$4 sm:$0xff]   ;;  %v8540_v33 = vld [vmem:[%s9727_s6 + $0x5dc] ss:$24 sps:$4 sm:$0xff]  }
 0x772   : > { %6394 = vmatmul.mubr.bf16.vlgmr.msra.gmra.mrb[4].mxu1 %v9950_v22 }
 0x773   : > { %6558 = vmatmul.mubr.bf16.vlgmr.msra.gmra.mrb[4].mxu0 %v9950_v22  ;;  %6403 = vmatpush1.bf16.msra.mxu1 %v8448_v57  ;;  %v8463_v22 = vld [vmem:[%s9727_s6 + $0x370] ss:$24 sps:$4 sm:$0xff]   ;;  %v8543_v57 = vld [vmem:[%s9727_s6 + $0x5e4] ss:$24 sps:$4 sm:$0xff]  }
 0x774   : > { %6567 = vmatpush1.bf16.msra.mxu0 %v8451_v23  ;;  %6404 = vmatprep.subr.bf16.mxu1 %v8456_v34  ;;  %v8538_v23 = vld [vmem:[%s9727_s6 + $0x5d8] ss:$24 sps:$4 sm:$0xff]  }
 0x775   : > { %6568 = vmatprep.subr.bf16.mxu0 %v8459_v40  ;;  %6434 = vmatprep.mubr.bf16.mxu1 %v9988_v59  ;;  %v8541_v34 = vld [vmem:[%s9727_s6 + $0x5e0] ss:$24 sps:$4 sm:$0xff]   ;;  %v8546_v40 = vld [vmem:[%s9727_s6 + $0x60c] ss:$24 sps:$4 sm:$0xff]  }
 0x776   : > { %6598 = vmatprep.mubr.bf16.mxu0 %v9988_v59  ;;  %v8474_v59 = vld [vmem:[%s9727_s6 + $0x3cc] ss:$24 sps:$4 sm:$0xff]  }
 0x777   : > { %6405 = vmatpush1.bf16.msra.mxu1 %v8454_v43  ;;  %v8549_v43 = vld [vmem:[%s9727_s6 + $0x614] ss:$24 sps:$4 sm:$0xff]  }
 0x778   : > { %6569 = vmatpush1.bf16.msra.mxu0 %v8457_v24  ;;  %6406 = vmatprep.subr.bf16.mxu1 %v8462_v44  ;;  %v8544_v24 = vld [vmem:[%s9727_s6 + $0x608] ss:$24 sps:$4 sm:$0xff]  }
 0x779   : > { %6570 = vmatprep.subr.bf16.mxu0 %v8465_v36  ;;  %v8547_v44 = vld [vmem:[%s9727_s6 + $0x610] ss:$24 sps:$4 sm:$0xff]   ;;  %v8552_v36 = vld [vmem:[%s9727_s6 + $0x63c] ss:$24 sps:$4 sm:$0xff]  }
 0x77b   : > { %6407 = vmatpush1.bf16.msra.mxu1 %v8460_v45  ;;  %v8555_v45 = vld [vmem:[%s9727_s6 + $0x644] ss:$24 sps:$4 sm:$0xff]  }
 0x77c   : > { %6571 = vmatpush1.bf16.msra.mxu0 %v8463_v22  ;;  %6408 = vmatprep.subr.bf16.mxu1 %v8468_v49  ;;  %v8550_v22 = vld [vmem:[%s9727_s6 + $0x638] ss:$24 sps:$4 sm:$0xff]  }
 0x77d   : > { %6572 = vmatprep.subr.bf16.mxu0 %v8471_v25  ;;  %v8553_v49 = vld [vmem:[%s9727_s6 + $0x640] ss:$24 sps:$4 sm:$0xff]   ;;  %v8558_v25 = vld [vmem:[%s9727_s6 + $0x66c] ss:$24 sps:$4 sm:$0xff]  }
 0x77f   : > { %6409 = vmatpush1.bf16.msra.mxu1 %v8466_v53  ;;  %v8561_v53 = vld [vmem:[%s9727_s6 + $0x674] ss:$24 sps:$4 sm:$0xff]  }
 0x780   : > { %6573 = vmatpush1.bf16.msra.mxu0 %v8469_v52  ;;  %6410 = vmatprep.subr.bf16.mxu1 %v8474_v59  ;;  %v8559_v52 = vld [vmem:[%s9727_s6 + $0x670] ss:$24 sps:$4 sm:$0xff]   ;;  %v8564_v59 = vld [vmem:[%s9727_s6 + $0x69c] ss:$24 sps:$4 sm:$0xff]  }
 0x781   : > { %6574 = vmatprep.subr.bf16.mxu0 %v8477_v55  ;;  %v8567_v55 = vld [vmem:[%s9727_s6 + $0x6a4] ss:$24 sps:$4 sm:$0xff]  }
 0x783   : > { %6411 = vmatpush1.bf16.msra.mxu1 %v8472_v58  ;;  %v8562_v58 = vld [vmem:[%s9727_s6 + $0x698] ss:$24 sps:$4 sm:$0xff]  }
 0x784   : > { %6575 = vmatpush1.bf16.msra.mxu0 %v8475_v60  ;;  %6412 = vmatprep.subr.bf16.mxu1 %v8480_v38  ;;  %v8565_v60 = vld [vmem:[%s9727_s6 + $0x6a0] ss:$24 sps:$4 sm:$0xff]   ;;  %v8573_v38 = vld [vmem:[%s9727_s6 + $0x6d4] ss:$24 sps:$4 sm:$0xff]  }
 0x785   : > { %6576 = vmatprep.subr.bf16.mxu0 %v8483_v19  ;;  %v8568_v19 = vld [vmem:[%s9727_s6 + $0x6c8] ss:$24 sps:$4 sm:$0xff]  }
 0x787   : > { %6413 = vmatpush1.bf16.msra.mxu1 %v8478_v61  ;;  %v8571_v61 = vld [vmem:[%s9727_s6 + $0x6d0] ss:$24 sps:$4 sm:$0xff]  }
 0x788   : > { %6577 = vmatpush1.bf16.msra.mxu0 %v8481_v62  ;;  %6414 = vmatprep.subr.bf16.mxu1 %v8486_v63  ;;  %v8576_v62 = vld [vmem:[%s9727_s6 + $0x6fc] ss:$24 sps:$4 sm:$0xff]  }
 0x789   : > { %6578 = vmatprep.subr.bf16.mxu0 %v8489_v37  ;;  %v8579_v63 = vld [vmem:[%s9727_s6 + $0x704] ss:$24 sps:$4 sm:$0xff]   ;;  %v8574_v37 = vld [vmem:[%s9727_s6 + $0x6f8] ss:$24 sps:$4 sm:$0xff]  }
 0x78b   : > { %6415 = vmatpush1.bf16.msra.mxu1 %v8484_v42  ;;  %v8577_v42 = vld [vmem:[%s9727_s6 + $0x700] ss:$24 sps:$4 sm:$0xff]  }
 0x78c   : > { %6579 = vmatpush1.bf16.msra.mxu0 %v8487_v1  ;;  %6416 = vmatprep.subr.bf16.mxu1 %v8492_v2  ;;  %v8582_v1 = vld [vmem:[%s9727_s6 + $0x72c] ss:$24 sps:$4 sm:$0xff]  }
 0x78d   : > { %6580 = vmatprep.subr.bf16.mxu0 %v8495_v3  ;;  %v8585_v2 = vld [vmem:[%s9727_s6 + $0x734] ss:$24 sps:$4 sm:$0xff]   ;;  %v8580_v3 = vld [vmem:[%s9727_s6 + $0x728] ss:$24 sps:$4 sm:$0xff]  }
 0x78f   : > { %6417 = vmatpush1.bf16.msra.mxu1 %v8490_v20  ;;  %v8583_v20 = vld [vmem:[%s9727_s6 + $0x730] ss:$24 sps:$4 sm:$0xff]  }
 0x790   : > { %6581 = vmatpush1.bf16.msra.mxu0 %v8493_v4  ;;  %6418 = vmatprep.subr.bf16.mxu1 %v8498_v54  ;;  %v8588_v4 = vld [vmem:[%s9727_s6 + $0x75c] ss:$24 sps:$4 sm:$0xff]  }
 0x791   : > { %6582 = vmatprep.subr.bf16.mxu0 %v8501_v50  ;;  %v8591_v54 = vld [vmem:[%s9727_s6 + $0x764] ss:$24 sps:$4 sm:$0xff]   ;;  %v8586_v50 = vld [vmem:[%s9727_s6 + $0x758] ss:$24 sps:$4 sm:$0xff]  }
 0x793   : > { %6419 = vmatpush1.bf16.msra.mxu1 %v8496_v41  ;;  %v8589_v41 = vld [vmem:[%s9727_s6 + $0x760] ss:$24 sps:$4 sm:$0xff]  }
 0x794   : > { %6583 = vmatpush1.bf16.msra.mxu0 %v8499_v46  ;;  %6420 = vmatprep.subr.bf16.mxu1 %v8504_v51  ;;  %v8594_v46 = vld [vmem:[%s9727_s6 + $0x78c] ss:$24 sps:$4 sm:$0xff]  }
 0x795   : > { %6584 = vmatprep.subr.bf16.mxu0 %v8507_v0  ;;  %v8597_v51 = vld [vmem:[%s9727_s6 + $0x794] ss:$24 sps:$4 sm:$0xff]   ;;  %v8592_v0 = vld [vmem:[%s9727_s6 + $0x788] ss:$24 sps:$4 sm:$0xff]  }
 0x797   : > { %6421 = vmatpush1.bf16.msra.mxu1 %v8502_v6  ;;  %v8595_v6 = vld [vmem:[%s9727_s6 + $0x790] ss:$24 sps:$4 sm:$0xff]  }
 0x798   : > { %6585 = vmatpush1.bf16.msra.mxu0 %v8505_v26  ;;  %6422 = vmatprep.subr.bf16.mxu1 %v8510_v5  ;;  %v8600_v26 = vld [vmem:[%s9727_s6 + $0x7bc] ss:$24 sps:$4 sm:$0xff]  }
 0x799   : > { %6586 = vmatprep.subr.bf16.mxu0 %v8513_v7  ;;  %v8603_v5 = vld [vmem:[%s9727_s6 + $0x7c4] ss:$24 sps:$4 sm:$0xff]   ;;  %v8598_v7 = vld [vmem:[%s9727_s6 + $0x7b8] ss:$24 sps:$4 sm:$0xff]  }
 0x79b   : > { %6423 = vmatpush1.bf16.msra.mxu1 %v8508_v9  ;;  %v8601_v9 = vld [vmem:[%s9727_s6 + $0x7c0] ss:$24 sps:$4 sm:$0xff]  }
 0x79c   : > { %6587 = vmatpush1.bf16.msra.mxu0 %v8511_v10  ;;  %6424 = vmatprep.subr.bf16.mxu1 %v8516_v47  ;;  %v8606_v10 = vld [vmem:[%s9727_s6 + $0x7ec] ss:$24 sps:$4 sm:$0xff]  }
 0x79d   : > { %6588 = vmatprep.subr.bf16.mxu0 %v8519_v11  ;;  %v8609_v47 = vld [vmem:[%s9727_s6 + $0x7f4] ss:$24 sps:$4 sm:$0xff]   ;;  %v8604_v11 = vld [vmem:[%s9727_s6 + $0x7e8] ss:$24 sps:$4 sm:$0xff]  }
 0x79f   : > { %6425 = vmatpush1.bf16.msra.mxu1 %v8514_v35  ;;  %v8607_v35 = vld [vmem:[%s9727_s6 + $0x7f0] ss:$24 sps:$4 sm:$0xff]  }
 0x7a0   : > { %6589 = vmatpush1.bf16.msra.mxu0 %v8517_v12  ;;  %6426 = vmatprep.subr.bf16.mxu1 %v8522_v8  ;;  %v8612_v12 = vld [vmem:[%s9727_s6 + $0x81c] ss:$24 sps:$4 sm:$0xff]  }
 0x7a1   : > { %6590 = vmatprep.subr.bf16.mxu0 %v8525_v13  ;;  %v8615_v8 = vld [vmem:[%s9727_s6 + $0x824] ss:$24 sps:$4 sm:$0xff]   ;;  %v8610_v13 = vld [vmem:[%s9727_s6 + $0x818] ss:$24 sps:$4 sm:$0xff]  }
 0x7a3   : > { %6427 = vmatpush1.bf16.msra.mxu1 %v8520_v14  ;;  %v8613_v14 = vld [vmem:[%s9727_s6 + $0x820] ss:$24 sps:$4 sm:$0xff]  }
 0x7a4   : > { %6591 = vmatpush1.bf16.msra.mxu0 %v8523_v15  ;;  %6428 = vmatprep.subr.bf16.mxu1 %v8528_v16  ;;  %v8618_v15 = vld [vmem:[%s9727_s6 + $0x84c] ss:$24 sps:$4 sm:$0xff]  }
 0x7a5   : > { %6592 = vmatprep.subr.bf16.mxu0 %v8531_v17  ;;  %v8621_v16 = vld [vmem:[%s9727_s6 + $0x854] ss:$24 sps:$4 sm:$0xff]   ;;  %v8616_v17 = vld [vmem:[%s9727_s6 + $0x848] ss:$24 sps:$4 sm:$0xff]  }
 0x7a7   : > { %6429 = vmatpush1.bf16.msra.mxu1 %v8526_v27  ;;  %v8619_v27 = vld [vmem:[%s9727_s6 + $0x850] ss:$24 sps:$4 sm:$0xff]  }
 0x7a8   : > { %6593 = vmatpush1.bf16.msra.mxu0 %v8529_v28  ;;  %6430 = vmatprep.subr.bf16.mxu1 %v8534_v29  ;;  %v8624_v28 = vld [vmem:[%s9727_s6 + $0x87c] ss:$24 sps:$4 sm:$0xff]  }
 0x7a9   : > { %6594 = vmatprep.subr.bf16.mxu0 %v8537_v30  ;;  %v8627_v29 = vld [vmem:[%s9727_s6 + $0x884] ss:$24 sps:$4 sm:$0xff]   ;;  %v8622_v30 = vld [vmem:[%s9727_s6 + $0x878] ss:$24 sps:$4 sm:$0xff]  }
 0x7ab   : > { %6431 = vmatpush1.bf16.msra.mxu1 %v8532_v31  ;;  %v8625_v31 = vld [vmem:[%s9727_s6 + $0x880] ss:$24 sps:$4 sm:$0xff]  }
 0x7ac   : > { %6595 = vmatpush1.bf16.msra.mxu0 %v8535_v32  ;;  %6432 = vmatprep.subr.bf16.mxu1 %v8540_v33  ;;  %v8630_v32 = vld [vmem:[%s9727_s6 + $0x8ac] ss:$24 sps:$4 sm:$0xff]  }
 0x7ad   : > { %6596 = vmatprep.subr.bf16.mxu0 %v8543_v57  ;;  %v8633_v33 = vld [vmem:[%s9727_s6 + $0x8b4] ss:$24 sps:$4 sm:$0xff]   ;;  %v8628_v57 = vld [vmem:[%s9727_s6 + $0x8a8] ss:$24 sps:$4 sm:$0xff]  }
 0x7af   : > { %6433 = vmatpush1.bf16.msra.mxu1 %v8538_v23  ;;  %v8631_v23 = vld [vmem:[%s9727_s6 + $0x8b0] ss:$24 sps:$4 sm:$0xff]  }
 0x7b0   : > { %6597 = vmatpush1.bf16.msra.mxu0 %v8541_v34  ;;  %6443 = vmatprep.subr.bf16.mxu1 %v8546_v40  ;;  %v8636_v34 = vld [vmem:[%s9727_s6 + $0x8dc] ss:$24 sps:$4 sm:$0xff]  }
 0x7b1   : > { %6607 = vmatprep.subr.bf16.mxu0 %v8549_v43  ;;  %v8639_v40 = vld [vmem:[%s9727_s6 + $0x8e4] ss:$24 sps:$4 sm:$0xff]   ;;  %v8634_v43 = vld [vmem:[%s9727_s6 + $0x8d8] ss:$24 sps:$4 sm:$0xff]  }
 0x7b2   : > { %6435 = vmatmul.mubr.bf16.vlgmr.msra.gmra.mrb[4].mxu1 %v10036_v18 }
 0x7b3   : > { %6599 = vmatmul.mubr.bf16.vlgmr.msra.gmra.mrb[4].mxu0 %v10036_v18  ;;  %6444 = vmatpush1.bf16.msra.mxu1 %v8544_v24  ;;  %v8556_v18 = vld [vmem:[%s9727_s6 + $0x668] ss:$24 sps:$4 sm:$0xff]  }
 0x7b4   : > { %6608 = vmatpush1.bf16.msra.mxu0 %v8547_v44  ;;  %6445 = vmatprep.subr.bf16.mxu1 %v8552_v36  ;;  %v8637_v24 = vld [vmem:[%s9727_s6 + $0x8e0] ss:$24 sps:$4 sm:$0xff]   ;;  %v8642_v44 = vld [vmem:[%s9727_s6 + $0x90c] ss:$24 sps:$4 sm:$0xff]  }
 0x7b5   : > { %6609 = vmatprep.subr.bf16.mxu0 %v8555_v45  ;;  %6475 = vmatprep.mubr.bf16.mxu1 %v9930_v39  ;;  %v8645_v36 = vld [vmem:[%s9727_s6 + $0x914] ss:$24 sps:$4 sm:$0xff]   ;;  %v8640_v45 = vld [vmem:[%s9727_s6 + $0x908] ss:$24 sps:$4 sm:$0xff]  }
 0x7b6   : > { %6639 = vmatprep.mubr.bf16.mxu0 %v9930_v39  ;;  %v8570_v39 = vld [vmem:[%s9727_s6 + $0x6cc] ss:$24 sps:$4 sm:$0xff]  }
 0x7b7   : > { %6446 = vmatpush1.bf16.msra.mxu1 %v8550_v22  ;;  %v8643_v22 = vld [vmem:[%s9727_s6 + $0x910] ss:$24 sps:$4 sm:$0xff]  }
 0x7b8   : > { %6610 = vmatpush1.bf16.msra.mxu0 %v8553_v49  ;;  %6447 = vmatprep.subr.bf16.mxu1 %v8558_v25  ;;  %v8648_v49 = vld [vmem:[%s9727_s6 + $0x93c] ss:$24 sps:$4 sm:$0xff]  }
 0x7b9   : > { %6611 = vmatprep.subr.bf16.mxu0 %v8561_v53  ;;  %v8651_v25 = vld [vmem:[%s9727_s6 + $0x944] ss:$24 sps:$4 sm:$0xff]   ;;  %v8646_v53 = vld [vmem:[%s9727_s6 + $0x938] ss:$24 sps:$4 sm:$0xff]  }
 0x7bb   : > { %6448 = vmatpush1.bf16.msra.mxu1 %v8556_v18  ;;  %v8649_v18 = vld [vmem:[%s9727_s6 + $0x940] ss:$24 sps:$4 sm:$0xff]  }
 0x7bc   : > { %6612 = vmatpush1.bf16.msra.mxu0 %v8559_v52  ;;  %6449 = vmatprep.subr.bf16.mxu1 %v8564_v59  ;;  %v8654_v52 = vld [vmem:[%s9727_s6 + $0x96c] ss:$24 sps:$4 sm:$0xff]  }
 0x7bd   : > { %6613 = vmatprep.subr.bf16.mxu0 %v8567_v55  ;;  %v8657_v59 = vld [vmem:[%s9727_s6 + $0x974] ss:$24 sps:$4 sm:$0xff]   ;;  %v4219_v55 = vlaneseq }
 0x7bf   : > { %6450 = vmatpush1.bf16.msra.mxu1 %v8562_v58  ;;  %v8655_v58 = vld [vmem:[%s9727_s6 + $0x970] ss:$24 sps:$4 sm:$0xff]  }
 0x7c0   : > { %6614 = vmatpush1.bf16.msra.mxu0 %v8565_v60  ;;  %6451 = vmatprep.subr.bf16.mxu1 %v8570_v39  ;;  %v8660_v60 = vld [vmem:[%s9727_s6 + $0x99c] ss:$24 sps:$4 sm:$0xff]  }
 0x7c1   : > { %6615 = vmatprep.subr.bf16.mxu0 %v8573_v38  ;;  %v8663_v39 = vld [vmem:[%s9727_s6 + $0x9a4] ss:$24 sps:$4 sm:$0xff]   ;;  %v10262_v38 = vshrl.u32 %v4219_v55, 7 }
 0x7c2   : > { %v8720_v55 = vld [vmem:[%s9727_s6 + $0xb7c] ss:$24 sps:$4 sm:$0xff]  }
 0x7c3   : > { %6452 = vmatpush1.bf16.msra.mxu1 %v8568_v19  ;;  %v8661_v19 = vld [vmem:[%s9727_s6 + $0x9a0] ss:$24 sps:$4 sm:$0xff]  }
 0x7c4   : > { %6616 = vmatpush1.bf16.msra.mxu0 %v8571_v61  ;;  %6453 = vmatprep.subr.bf16.mxu1 %v8576_v62  ;;  %v8666_v61 = vld [vmem:[%s9727_s6 + $0x9cc] ss:$24 sps:$4 sm:$0xff]  }
 0x7c5   : > { %6617 = vmatprep.subr.bf16.mxu0 %v8579_v63  ;;  %v8669_v62 = vld [vmem:[%s9727_s6 + $0x9d4] ss:$24 sps:$4 sm:$0xff]   ;;  %v4221_v63 = vsub.s32 0, %v10262_v38 }
 0x7c7   : > { %6454 = vmatpush1.bf16.msra.mxu1 %v8574_v37  ;;  %v4225_v37 = vsub.s32 1, %v10262_v38 }
 0x7c8   : > { %6618 = vmatpush1.bf16.msra.mxu0 %v8577_v42  ;;  %6455 = vmatprep.subr.bf16.mxu1 %v8582_v1  ;;  %v8664_v42 = vld [vmem:[%s9727_s6 + $0x9c8] ss:$24 sps:$4 sm:$0xff]  }
 0x7c9   : > { %6619 = vmatprep.subr.bf16.mxu0 %v8585_v2  ;;  %v8667_v1 = vld [vmem:[%s9727_s6 + $0x9d0] ss:$24 sps:$4 sm:$0xff]  }
 0x7ca   : > { %v10274_v2 = vld [vmem:[%s642_s25] sm:$0x3f] }
 0x7cb   : > { %6456 = vmatpush1.bf16.msra.mxu1 %v8580_v3  ;;  %v8672_v3 = vld [vmem:[%s9727_s6 + $0x9fc] ss:$24 sps:$4 sm:$0xff]  }
 0x7cc   : > { %6620 = vmatpush1.bf16.msra.mxu0 %v8583_v20  ;;  %6457 = vmatprep.subr.bf16.mxu1 %v8588_v4  ;;  %v8675_v20 = vld [vmem:[%s9727_s6 + $0xa04] ss:$24 sps:$4 sm:$0xff]   ;;  %v4222_v4 = vrot.slane %v10274_v2, %v4221_v63 }
 0x7cd   : > { %6621 = vmatprep.subr.bf16.mxu0 %v8591_v54  ;;  %v4226_v54 = vrot.slane %v10274_v2, %v4225_v37  ;;  %v8735_v63 = vld [vmem:[%s9727_s6 + $0xbe4] ss:$24 sps:$4 sm:$0xff]   ;;  %v8730_v37 = vld [vmem:[%s9727_s6 + $0xbd8] ss:$24 sps:$4 sm:$0xff]  }
 0x7cf   : > { %6458 = vmatpush1.bf16.msra.mxu1 %v8586_v50  ;;  %v8670_v50 = vld [vmem:[%s9727_s6 + $0x9f8] ss:$24 sps:$4 sm:$0xff]  }
 0x7d0   : > { %6622 = vmatpush1.bf16.msra.mxu0 %v8589_v41  ;;  %6459 = vmatprep.subr.bf16.mxu1 %v8594_v46  ;;  %v8673_v41 = vld [vmem:[%s9727_s6 + $0xa00] ss:$24 sps:$4 sm:$0xff]   ;;  %v8678_v46 = vld [vmem:[%s9727_s6 + $0xa2c] ss:$24 sps:$4 sm:$0xff]  }
 0x7d1   : > { %6623 = vmatprep.subr.bf16.mxu0 %v8597_v51  ;;  %v8681_v51 = vld [vmem:[%s9727_s6 + $0xa34] ss:$24 sps:$4 sm:$0xff]  }
 0x7d3   : > { %6460 = vmatpush1.bf16.msra.mxu1 %v8592_v0 }
 0x7d4   : > { %6624 = vmatpush1.bf16.msra.mxu0 %v8595_v6  ;;  %6461 = vmatprep.subr.bf16.mxu1 %v8600_v26 }
 0x7d5   : > { %6625 = vmatprep.subr.bf16.mxu0 %v8603_v5 }
 0x7d7   : > { %6462 = vmatpush1.bf16.msra.mxu1 %v8598_v7 }
 0x7d8   : > { %6626 = vmatpush1.bf16.msra.mxu0 %v8601_v9  ;;  %6463 = vmatprep.subr.bf16.mxu1 %v8606_v10 }
 0x7d9   : > { %6627 = vmatprep.subr.bf16.mxu0 %v8609_v47 }
 0x7db   : > { %6464 = vmatpush1.bf16.msra.mxu1 %v8604_v11  ;;  %v8676_v11 = vld [vmem:[%s9727_s6 + $0xa28] ss:$24 sps:$4 sm:$0xff]  }
 0x7dc   : > { %6628 = vmatpush1.bf16.msra.mxu0 %v8607_v35  ;;  %6465 = vmatprep.subr.bf16.mxu1 %v8612_v12  ;;  %v8679_v35 = vld [vmem:[%s9727_s6 + $0xa30] ss:$24 sps:$4 sm:$0xff]  }
 0x7dd   : > { %6629 = vmatprep.subr.bf16.mxu0 %v8615_v8 }
 0x7df   : > { %6466 = vmatpush1.bf16.msra.mxu1 %v8610_v13 }
 0x7e0   : > { %6630 = vmatpush1.bf16.msra.mxu0 %v8613_v14  ;;  %6467 = vmatprep.subr.bf16.mxu1 %v8618_v15  ;;  %v8684_v14 = vld [vmem:[%s9727_s6 + $0xa5c] ss:$24 sps:$4 sm:$0xff]  }
 0x7e1   : > { %6631 = vmatprep.subr.bf16.mxu0 %v8621_v16  ;;  %v8687_v15 = vld [vmem:[%s9727_s6 + $0xa64] ss:$24 sps:$4 sm:$0xff]  }
 0x7e3   : > { %6468 = vmatpush1.bf16.msra.mxu1 %v8616_v17  ;;  %v8682_v17 = vld [vmem:[%s9727_s6 + $0xa58] ss:$24 sps:$4 sm:$0xff]  }
 0x7e4   : > { %6632 = vmatpush1.bf16.msra.mxu0 %v8619_v27  ;;  %6469 = vmatprep.subr.bf16.mxu1 %v8624_v28  ;;  %v8685_v27 = vld [vmem:[%s9727_s6 + $0xa60] ss:$24 sps:$4 sm:$0xff]   ;;  %v8690_v28 = vld [vmem:[%s9727_s6 + $0xa8c] ss:$24 sps:$4 sm:$0xff]  }
 0x7e5   : > { %6633 = vmatprep.subr.bf16.mxu0 %v8627_v29  ;;  %v8693_v29 = vld [vmem:[%s9727_s6 + $0xa94] ss:$24 sps:$4 sm:$0xff]  }
 0x7e7   : > { %6470 = vmatpush1.bf16.msra.mxu1 %v8622_v30  ;;  %v8688_v30 = vld [vmem:[%s9727_s6 + $0xa88] ss:$24 sps:$4 sm:$0xff]  }
 0x7e8   : > { %6634 = vmatpush1.bf16.msra.mxu0 %v8625_v31  ;;  %6471 = vmatprep.subr.bf16.mxu1 %v8630_v32  ;;  %v8691_v31 = vld [vmem:[%s9727_s6 + $0xa90] ss:$24 sps:$4 sm:$0xff]   ;;  %v8696_v32 = vld [vmem:[%s9727_s6 + $0xabc] ss:$24 sps:$4 sm:$0xff]  }
 0x7e9   : > { %6635 = vmatprep.subr.bf16.mxu0 %v8633_v33  ;;  %v8699_v33 = vld [vmem:[%s9727_s6 + $0xac4] ss:$24 sps:$4 sm:$0xff]  }
 0x7eb   : > { %6472 = vmatpush1.bf16.msra.mxu1 %v8628_v57  ;;  %v8694_v57 = vld [vmem:[%s9727_s6 + $0xab8] ss:$24 sps:$4 sm:$0xff]  }
 0x7ec   : > { %6636 = vmatpush1.bf16.msra.mxu0 %v8631_v23  ;;  %6473 = vmatprep.subr.bf16.mxu1 %v8636_v34  ;;  %v8697_v23 = vld [vmem:[%s9727_s6 + $0xac0] ss:$24 sps:$4 sm:$0xff]  }
 0x7ed   : > { %6637 = vmatprep.subr.bf16.mxu0 %v8639_v40  ;;  %v8702_v40 = vld [vmem:[%s9727_s6 + $0xaec] ss:$24 sps:$4 sm:$0xff]  }
 0x7ef   : > { %6474 = vmatpush1.bf16.msra.mxu1 %v8634_v43  ;;  %v8705_v43 = vld [vmem:[%s9727_s6 + $0xaf4] ss:$24 sps:$4 sm:$0xff]  }
 0x7f0   : > { %6638 = vmatpush1.bf16.msra.mxu0 %v8637_v24  ;;  %6484 = vmatprep.subr.bf16.mxu1 %v8642_v44  ;;  %v8700_v44 = vld [vmem:[%s9727_s6 + $0xae8] ss:$24 sps:$4 sm:$0xff]  }
 0x7f1   : > { %6648 = vmatprep.subr.bf16.mxu0 %v8645_v36  ;;  %v8703_v36 = vld [vmem:[%s9727_s6 + $0xaf0] ss:$24 sps:$4 sm:$0xff]  }
 0x7f2   : > { %6476 = vmatmul.mubr.bf16.vlgmr.msra.gmra.mrb[4].mxu1 %v9952_v48 }
 0x7f3   : > { %6640 = vmatmul.mubr.bf16.vlgmr.msra.gmra.mrb[4].mxu0 %v9952_v48  ;;  %6485 = vmatpush1.bf16.msra.mxu1 %v8640_v45  ;;  %v8652_v48 = vld [vmem:[%s9727_s6 + $0x968] ss:$24 sps:$4 sm:$0xff]   ;;  %v8708_v45 = vld [vmem:[%s9727_s6 + $0xb1c] ss:$24 sps:$4 sm:$0xff]  }
 0x7f4   : > { %6649 = vmatpush1.bf16.msra.mxu0 %v8643_v22  ;;  %6486 = vmatprep.subr.bf16.mxu1 %v8648_v49  ;;  %v8711_v22 = vld [vmem:[%s9727_s6 + $0xb24] ss:$24 sps:$4 sm:$0xff]   ;;  %v8706_v49 = vld [vmem:[%s9727_s6 + $0xb18] ss:$24 sps:$4 sm:$0xff]  }
 0x7f5   : > { %6650 = vmatprep.subr.bf16.mxu0 %v8651_v25  ;;  %6516 = vmatprep.mubr.bf16.mxu1 %v9992_v56  ;;  %v8709_v25 = vld [vmem:[%s9727_s6 + $0xb20] ss:$24 sps:$4 sm:$0xff]  }
 0x7f6   : > { %6680 = vmatprep.mubr.bf16.mxu0 %v9992_v56  ;;  %v8658_v56 = vld [vmem:[%s9727_s6 + $0x998] ss:$24 sps:$4 sm:$0xff]  }
 0x7f7   : > { %6487 = vmatpush1.bf16.msra.mxu1 %v8646_v53  ;;  %v8714_v53 = vld [vmem:[%s9727_s6 + $0xb4c] ss:$24 sps:$4 sm:$0xff]  }
 0x7f8   : > { %6651 = vmatpush1.bf16.msra.mxu0 %v8649_v18  ;;  %6488 = vmatprep.subr.bf16.mxu1 %v8654_v52  ;;  %v8717_v18 = vld [vmem:[%s9727_s6 + $0xb54] ss:$24 sps:$4 sm:$0xff]   ;;  %v8712_v52 = vld [vmem:[%s9727_s6 + $0xb48] ss:$24 sps:$4 sm:$0xff]  }
 0x7f9   : > { %6652 = vmatprep.subr.bf16.mxu0 %v8657_v59  ;;  %v8715_v59 = vld [vmem:[%s9727_s6 + $0xb50] ss:$24 sps:$4 sm:$0xff]  }
 0x7fb   : > { %6489 = vmatpush1.bf16.msra.mxu1 %v8652_v48  ;;  %v8723_v48 = vld [vmem:[%s9727_s6 + $0xb84] ss:$24 sps:$4 sm:$0xff]  }
 0x7fc   : > { %6653 = vmatpush1.bf16.msra.mxu0 %v8655_v58  ;;  %6490 = vmatprep.subr.bf16.mxu1 %v8660_v60  ;;  %v8718_v58 = vld [vmem:[%s9727_s6 + $0xb78] ss:$24 sps:$4 sm:$0xff]  }
 0x7fd   : > { %6654 = vmatprep.subr.bf16.mxu0 %v8663_v39  ;;  %v8721_v60 = vld [vmem:[%s9727_s6 + $0xb80] ss:$24 sps:$4 sm:$0xff]   ;;  %v8726_v39 = vld [vmem:[%s9727_s6 + $0xbac] ss:$24 sps:$4 sm:$0xff]  }
 0x7ff   : > { %6491 = vmatpush1.bf16.msra.mxu1 %v8658_v56  ;;  %v8729_v56 = vld [vmem:[%s9727_s6 + $0xbb4] ss:$24 sps:$4 sm:$0xff]  }
 0x800   : > { %6655 = vmatpush1.bf16.msra.mxu0 %v8661_v19  ;;  %6492 = vmatprep.subr.bf16.mxu1 %v8666_v61  ;;  %v8724_v19 = vld [vmem:[%s9727_s6 + $0xba8] ss:$24 sps:$4 sm:$0xff]  }
 0x801   : > { %6656 = vmatprep.subr.bf16.mxu0 %v8669_v62  ;;  %v8727_v61 = vld [vmem:[%s9727_s6 + $0xbb0] ss:$24 sps:$4 sm:$0xff]   ;;  %v8732_v62 = vld [vmem:[%s9727_s6 + $0xbdc] ss:$24 sps:$4 sm:$0xff]  }
 0x803   : > { %6493 = vmatpush1.bf16.msra.mxu1 %v8664_v42  ;;  %v8733_v42 = vld [vmem:[%s9727_s6 + $0xbe0] ss:$24 sps:$4 sm:$0xff]  }
 0x804   : > { %6657 = vmatpush1.bf16.msra.mxu0 %v8667_v1  ;;  %6494 = vmatprep.subr.bf16.mxu1 %v8672_v3  ;;  %v4229_v1 = vsub.s32 2, %v10262_v38  ;;  %v4237_v3 = vsub.s32 4, %v10262_v38 }
 0x805   : > { %6658 = vmatprep.subr.bf16.mxu0 %v8675_v20  ;;  %v6272_v0 = vpop.f32.mrb[0].mxu1  ;;  %v4233_v20 = vsub.s32 3, %v10262_v38 }
 0x806   : > { %v6354_v6 = vpop.f32.mrb[0].mxu0  ;;  %v7751_v26 = vadd.f32 %v6272_v0, %v4222_v4  ;;  %v6274_v5 = vpop.f32.mrb[1].mxu1  ;;  %v4241_v4 = vsub.s32 5, %v10262_v38 }
 0x807   : > { %v6356_v7 = vpop.f32.mrb[1].mxu0  ;;  %v7753_v9 = vadd.f32 %v6274_v5, %v4226_v54  ;;  %v6276_v10 = vpop.f32.mrb[2].mxu1  ;;  %6495 = vmatpush1.bf16.msra.mxu1 %v8670_v50  ;;  %v4230_v54 = vrot.slane %v10274_v2, %v4229_v1  ;;  %v4238_v50 = vrot.slane %v10274_v2, %v4237_v3 }
 0x808   : > { %v6358_v47 = vpop.f32.mrb[2].mxu0  ;;  %6659 = vmatpush1.bf16.msra.mxu0 %v8673_v41  ;;  %v7752_v12 = vadd.f32 %v7751_v26, %v6354_v6  ;;  %v6277_v8 = vpop.f32.mrb[3].mxu1  ;;  %6496 = vmatprep.subr.bf16.mxu1 %v8678_v46  ;;  %v4234_v41 = vrot.slane %v10274_v2, %v4233_v20  ;;  %v4242_v46 = vrot.slane %v10274_v2, %v4241_v4 }
 0x809   : > { %v6359_v13 = vpop.f32.mrb[3].mxu0  ;;  %6660 = vmatprep.subr.bf16.mxu0 %v8681_v51  ;;  %v7754_v16 = vadd.f32 %v7753_v9, %v6356_v7 }
 0x80a   : > { %8736 = vtanh.f32 %v7752_v12 }
 0x80b   : > { %8738 = vtanh.f32 %v7754_v16  ;;  %6497 = vmatpush1.bf16.msra.mxu1 %v8676_v11 }
 0x80c   : > { %6661 = vmatpush1.bf16.msra.mxu0 %v8679_v35  ;;  %6498 = vmatprep.subr.bf16.mxu1 %v8684_v14 }
 0x80d   : > { %6662 = vmatprep.subr.bf16.mxu0 %v8687_v15 }
 0x80f   : > { %6499 = vmatpush1.bf16.msra.mxu1 %v8682_v17 }
 0x810   : > { %6663 = vmatpush1.bf16.msra.mxu0 %v8685_v27  ;;  %6500 = vmatprep.subr.bf16.mxu1 %v8690_v28 }
 0x811   : > { %6664 = vmatprep.subr.bf16.mxu0 %v8693_v29 }
 0x813   : > { %6501 = vmatpush1.bf16.msra.mxu1 %v8688_v30 }
 0x814   : > { %6665 = vmatpush1.bf16.msra.mxu0 %v8691_v31  ;;  %v8737_v34 = vpop.eup %8736  ;;  %6502 = vmatprep.subr.bf16.mxu1 %v8696_v32 }
 0x815   : > { %6666 = vmatprep.subr.bf16.mxu0 %v8699_v33  ;;  %v8739_v24 = vpop.eup %8738  ;;  %6695 = vst [vmem:[%s9740_s0] sm:$0xff] %v8737_v34 }
 0x816   : > { %6696 = vst [vmem:[%s9740_s0 + $0x8] sm:$0xff] %v8739_v24 }
 0x817   : > { %6503 = vmatpush1.bf16.msra.mxu1 %v8694_v57 }
 0x818   : > { %6667 = vmatpush1.bf16.msra.mxu0 %v8697_v23  ;;  %6504 = vmatprep.subr.bf16.mxu1 %v8702_v40 }
 0x819   : > { %6668 = vmatprep.subr.bf16.mxu0 %v8705_v43 }
 0x81b   : > { %6505 = vmatpush1.bf16.msra.mxu1 %v8700_v44 }
 0x81c   : > { %6669 = vmatpush1.bf16.msra.mxu0 %v8703_v36  ;;  %6506 = vmatprep.subr.bf16.mxu1 %v8708_v45 }
 0x81d   : > { %6670 = vmatprep.subr.bf16.mxu0 %v8711_v22 }
 0x81f   : > { %6507 = vmatpush1.bf16.msra.mxu1 %v8706_v49 }
 0x820   : > { %6671 = vmatpush1.bf16.msra.mxu0 %v8709_v25  ;;  %6508 = vmatprep.subr.bf16.mxu1 %v8714_v53 }
 0x821   : > { %6672 = vmatprep.subr.bf16.mxu0 %v8717_v18 }
 0x823   : > { %6509 = vmatpush1.bf16.msra.mxu1 %v8712_v52 }
 0x824   : > { %6673 = vmatpush1.bf16.msra.mxu0 %v8715_v59  ;;  %6510 = vmatprep.subr.bf16.mxu1 %v8720_v55 }
 0x825   : > { %6674 = vmatprep.subr.bf16.mxu0 %v8723_v48 }
 0x827   : > { %6511 = vmatpush1.bf16.msra.mxu1 %v8718_v58 }
 0x828   : > { %6675 = vmatpush1.bf16.msra.mxu0 %v8721_v60  ;;  %6512 = vmatprep.subr.bf16.mxu1 %v8726_v39 }
 0x829   : > { %6676 = vmatprep.subr.bf16.mxu0 %v8729_v56 }
 0x82b   : > { %6513 = vmatpush1.bf16.msra.mxu1 %v8724_v19 }
 0x82c   : > { %6677 = vmatpush1.bf16.msra.mxu0 %v8727_v61  ;;  %6514 = vmatprep.subr.bf16.mxu1 %v8732_v62 }
 0x82d   : > { %6678 = vmatprep.subr.bf16.mxu0 %v8735_v63 }
 0x82f   : > { %6515 = vmatpush1.bf16.msra.mxu1 %v8730_v37 }
 0x830   : > { %6679 = vmatpush1.bf16.msra.mxu0 %v8733_v42 }
 0x832   : > { %6517 = vmatmul.mubr.bf16.vlgmr.msra.gmra.mrb[4].mxu1 %v10040_v21 }
 0x833   : > { %6681 = vmatmul.mubr.bf16.vlgmr.msra.gmra.mrb[4].mxu0 %v10040_v21 }
 0x905   : > { %v6518_v51 = vpop.f32.mrb[4].mxu1 }
 0x906   : > { %v6682_v0 = vpop.f32.mrb[4].mxu0  ;;  %v7755_v6 = vadd.f32 %v6518_v51, %v4230_v54  ;;  %v6520_v26 = vpop.f32.mrb[5].mxu1 }
 0x907   : > { %v7757_v21 = vadd.f32 %v6682_v0, %v4238_v50  ;;  %v6684_v5 = vpop.f32.mrb[5].mxu0  ;;  %v7756_v7 = vadd.f32 %v6520_v26, %v4234_v41  ;;  %v6522_v38 = vpop.f32.mrb[6].mxu1 }
 0x908   : > { %v7758_v9 = vadd.f32 %v6684_v5, %v4242_v46  ;;  %v6686_v10 = vpop.f32.mrb[6].mxu0  ;;  %8740 = vtanh.f32 %v7755_v6  ;;  %v6523_v47 = vpop.f32.mrb[7].mxu1 }
 0x909   : > { %v6687_v11 = vpop.f32.mrb[7].mxu0  ;;  %8742 = vtanh.f32 %v7757_v21 }
 0x90a   : > { %8744 = vtanh.f32 %v7756_v7 }
 0x90b   : > { %8746 = vtanh.f32 %v7758_v9 }
 0x912   : > { %v8741_v2 = vpop.eup %8740 }
 0x913   : > { %v8743_v35 = vpop.eup %8742  ;;  %6697 = vst [vmem:[%s9740_s0 + $0x10] sm:$0xff] %v8741_v2 }
 0x914   : > { %v8745_v12 = vpop.eup %8744  ;;  %6699 = vst [vmem:[%s9740_s0 + $0x20] sm:$0xff] %v8743_v35 }
 0x915   : > { %v8747_v8 = vpop.eup %8746  ;;  %6698 = vst [vmem:[%s9740_s0 + $0x18] sm:$0xff] %v8745_v12 }
 0x916   : > { %6700 = vst [vmem:[%s9740_s0 + $0x28] sm:$0xff] %v8747_v8 }
 0x917 PF: > { %s33_s20 = sadd.s32 1, %s9206_s20   ;;  %s10453_s22 = sld [smem:[#allocation33_spill]] }
 0x918   : > { %p30_p8 = scmp.ge.s32.totalorder %s33_s20, 6   ;;  %s10454_s9 = sld [smem:[#allocation34_spill]] }
 0x919   : > { %s10455_s29 = smov %s9182_s30  ;;  %s10456_s30 = smov %s9186_s15 }
 0x91a   : > { %s10457_s15 = smov %s9518_s16  ;;  %s10458_s16 = smov %s9198_s18 }
 0x91b   : > { %s10459_s17 = smov %s9202_s19  ;;  %32 = sbr.rel (!%p30_p8) target bundleno = 27 (0x1b), region = 176 }
 0x91d   : > { %s10460_s18 = smov %s10453_s22 }
 0x91e   : > { %s10461_s19 = smov %s10454_s9 }
 0x922   :  { %6729 = vsyncpa [#allocation4], 1 }
 0x923   :  { %6731 = vsyncpa [#allocation4 + $0x1], 1 }
 0x924   :  { %6732 = vsyncpa [#allocation6], 1 }
 0x925   :  { %6733 = vsyncpa [#allocation9], 1 }
 0x926   :  { %6734 = vsyncpa [#allocation12], 1 }
 0x927   :  { %6735 = vsyncpa [#allocation15], 1 }
 0x928   :  { %6736 = vsyncpa [#allocation18], 1 }
 0x929   :  { %6737 = vsyncpa [#allocation21], 1 }
 0x92a   :  { %6739 = vsyncpa [#allocation21 + $0x1], 1 }

</bundles_post_ra>
